<compile_context>
chip_gen: v7x
topology: tpu7x:2x2x1
jax: 0.10.0
libtpu: 0.0.40
codegen_flags: <defaults>
</compile_context>

<pallas_src>
import jax
import jax.numpy as jnp
import numpy as np
from jax import lax
from jax.experimental import pallas as pl
from jax.experimental.pallas import tpu as pltpu

BN_EPS = 1e-5
LANE = 128


# ----------------------------------------------------------------------------
# Kernel
# ----------------------------------------------------------------------------
def _cnn_kernel(x_ref, pool_ref, w1_ref, w2_ref, fc_ref, out_ref):
    # x_ref  : (M, 8)  lanes = [x(t-2), x(t-1), x(t), x(t+1), x(t+2),
    #                           ones, mask_prev, mask_next]
    # pool_ref: (TB, M) grid-invariant averaging matrix (1/L per sample row)
    # w1_ref : (24, C1) three 8-row conv1+BN slabs (bias folded via ones lane)
    # w2_ref : (3*C1 + 1, C2) conv2+BN taps + bias row
    # fc_ref : (C2 + 1, 128)  fc weight (lane-padded) + bias row
    C1 = w1_ref.shape[1]
    C2 = w2_ref.shape[1]

    x = x_ref[...]                                           # (M, 8)

    # conv1 (1->C1, k=3) + folded BN + ReLU evaluated at t-1, t, t+1.  Each is
    # one small MXU matmul; mask lanes zero the halo rows that conv2's zero
    # padding provides in the reference network.
    def conv1_at(j):
        return jnp.maximum(
            jnp.dot(x, w1_ref[8 * j:8 * (j + 1), :],
                    preferred_element_type=jnp.float32), 0.0)

    h1_prev = conv1_at(0) * x[:, 6:7]                        # (M, C1)
    h1 = conv1_at(1)                                         # (M, C1)
    h1_next = conv1_at(2) * x[:, 7:8]                        # (M, C1)

    # conv2 (C1->C2, k=3) + folded BN + ReLU: three accumulated MXU matmuls.
    h2 = jnp.dot(h1_prev, w2_ref[0:C1, :],
                 preferred_element_type=jnp.float32)
    h2 = h2 + jnp.dot(h1, w2_ref[C1:2 * C1, :],
                      preferred_element_type=jnp.float32)
    h2 = h2 + jnp.dot(h1_next, w2_ref[2 * C1:3 * C1, :],
                      preferred_element_type=jnp.float32)
    h2 = jnp.maximum(h2 + w2_ref[3 * C1:3 * C1 + 1, :], 0.0)  # (M, C2)

    # AdaptiveAvgPool1d(1): precomputed (TB, M) pooling matmul.
    pooled = jnp.dot(pool_ref[...], h2,
                     preferred_element_type=jnp.float32)      # (TB, C2)

    # Dropout(0.3) is identity in eval mode.  Linear(C2 -> 128-lane padded).
    logits = jnp.dot(pooled, fc_ref[0:C2, :],
                     preferred_element_type=jnp.float32)
    out_ref[...] = logits + fc_ref[C2:C2 + 1, :]              # (TB, 128) store


# ----------------------------------------------------------------------------
# Wrapper
# ----------------------------------------------------------------------------
def _default_grid_steps():
    """2 steps for dual-TensorCore chips (v7x), 1 maximal step otherwise."""
    try:
        kind = jax.local_devices()[0].device_kind.lower()
    except Exception:
        return 1
    if "v7" in kind or "7x" in kind:
        return 2
    return 1


def cnn_classifier_forward(x, packed_params, num_classes, *, grid_steps=None):
    """x: (B, 1, L) float32 (NCL, like PyTorch).  Returns (B, num_classes)."""
    w1b, w2b, fcwb = packed_params
    B, _, L = x.shape
    nlanes = fcwb.shape[1]

    if grid_steps is None:
        grid_steps = _default_grid_steps()
    G = max(1, min(int(grid_steps), B))
    tile_b = pl.cdiv(B, G)
    tile_b = ((tile_b + 7) // 8) * 8          # sublane-friendly tile height
    B_pad = G * tile_b
    M = tile_b * L                            # rows (samples x positions) / step

    # ---- wrapper-side layout plumbing (fused into the surrounding jit) ----
    x2d = x[:, 0, :].astype(jnp.float32)
    if B_pad != B:
        x2d = jnp.pad(x2d, ((0, B_pad - B), (0, 0)))
    xp = jnp.pad(x2d, ((0, 0), (2, 2)))                           # (B_pad, L+4)
    taps = jnp.stack([xp[:, c:c + L] for c in range(5)], axis=-1)  # (B_pad,L,5)
    pos = jnp.arange(L)
    ones_c = jnp.ones((L,), jnp.float32)
    mprev = (pos > 0).astype(jnp.float32)
    mnext = (pos < L - 1).astype(jnp.float32)
    extra = jnp.broadcast_to(
        jnp.stack([ones_c, mprev, mnext], axis=-1)[None], (B_pad, L, 3))
    x_packed = jnp.concatenate([taps, extra], axis=-1).reshape(B_pad * L, 8)

    # Grid-invariant AdaptiveAvgPool(1) matrix: (tile_b, M), 1/L per sample.
    pool = jnp.repeat(jnp.eye(tile_b, dtype=jnp.float32) / L, L, axis=1)

    out = pl.pallas_call(
        _cnn_kernel,
        out_shape=jax.ShapeDtypeStruct((B_pad, nlanes), jnp.float32),
        grid_spec=pltpu.PrefetchScalarGridSpec(
            num_scalar_prefetch=0,
            grid=(G,),
            in_specs=[
                pl.BlockSpec((M, 8), lambda i: (i, 0)),            # packed taps
                pl.BlockSpec((tile_b, M), lambda i: (0, 0)),       # pool matrix
                pl.BlockSpec(w1b.shape, lambda i: (0, 0)),         # conv1 slabs
                pl.BlockSpec(w2b.shape, lambda i: (0, 0)),         # conv2 + bias
                pl.BlockSpec(fcwb.shape, lambda i: (0, 0)),        # fc + bias
            ],
            out_specs=pl.BlockSpec((tile_b, nlanes), lambda i: (i, 0)),
        ),
        compiler_params=pltpu.CompilerParams(
            dimension_semantics=("parallel",)),
    )(x_packed, pool, w1b, w2b, fcwb)
    return out[:B, :num_classes]


# ----------------------------------------------------------------------------
# Parameter generation / packing / reference
# ----------------------------------------------------------------------------
def make_torch_params(key, num_classes=3):
    ks = jax.random.split(key, 12)
    f32 = jnp.float32
    w1 = jax.random.normal(ks[0], (32, 1, 3), f32) * 0.3
    b1 = jax.random.normal(ks[1], (32,), f32) * 0.1
    g1 = 1.0 + 0.1 * jax.random.normal(ks[2], (32,), f32)
    be1 = 0.1 * jax.random.normal(ks[3], (32,), f32)
    m1 = 0.05 * jax.random.normal(ks[4], (32,), f32)
    v1 = 0.5 + jnp.abs(jax.random.normal(ks[5], (32,), f32)) * 0.5
    w2 = jax.random.normal(ks[6], (64, 32, 3), f32) * 0.1
    b2 = jax.random.normal(ks[7], (64,), f32) * 0.1
    g2 = 1.0 + 0.1 * jax.random.normal(ks[8], (64,), f32)
    be2 = 0.1 * jax.random.normal(ks[9], (64,), f32)
    m2 = 0.05 * jax.random.normal(ks[10], (64,), f32)
    v2 = 0.5 + jnp.abs(jax.random.normal(ks[11], (64,), f32)) * 0.5
    kfc = jax.random.split(ks[0], 2)
    fcw = jax.random.normal(kfc[0], (num_classes, 64), f32) * 0.2
    fcb = jax.random.normal(kfc[1], (num_classes,), f32) * 0.1
    return (w1, b1, g1, be1, m1, v1, w2, b2, g2, be2, m2, v2, fcw, fcb)


def fold_and_pack(torch_params, num_lanes=LANE):
    """Fold eval-mode BN into conv weights/biases and pack MXU-friendly slabs."""
    (w1, b1, g1, be1, m1, v1, w2, b2, g2, be2, m2, v2, fcw, fcb) = torch_params
    num_classes = fcw.shape[0]
    C1, C2 = w1.shape[0], w2.shape[0]

    s1 = g1 * lax.rsqrt(v1 + BN_EPS)
    w1f = jnp.transpose(w1[:, 0, :], (1, 0)) * s1[None, :]        # (3, C1) [k, o]
    b1f = (b1 - m1) * s1 + be1                                    # (C1,)

    # Packed input lanes: [x(t-2), x(t-1), x(t), x(t+1), x(t+2), 1, mp, mn].
    # Slab j computes conv1+BN output at position t-1+j (j=0 prev, 1 ctr, 2 nxt).
    def slab(j):
        s = jnp.zeros((8, C1), jnp.float32)
        s = s.at[j:j + 3, :].set(w1f)
        s = s.at[5, :].set(b1f)                                   # ones lane
        return s
    w1b = jnp.concatenate([slab(0), slab(1), slab(2)], axis=0)    # (24, C1)

    s2 = g2 * lax.rsqrt(v2 + BN_EPS)
    w2f = jnp.transpose(w2, (2, 1, 0)) * s2[None, None, :]        # (3, C1, C2)
    b2f = (b2 - m2) * s2 + be2
    w2b = jnp.concatenate([w2f.reshape(3 * C1, C2), b2f[None, :]],
                          axis=0)                                 # (3*C1+1, C2)

    fcwb = jnp.concatenate([jnp.transpose(fcw, (1, 0)), fcb[None, :]],
                           axis=0)                                # (C2+1, NC)
    fcwb = jnp.pad(fcwb, ((0, 0), (0, num_lanes - num_classes)))  # lane-dense
    return (w1b, w2b, fcwb)


def reference_forward(x, torch_params):
    """Plain-JAX reference mirroring the PyTorch forward (eval mode)."""
    (w1, b1, g1, be1, m1, v1, w2, b2, g2, be2, m2, v2, fcw, fcb) = torch_params
    dn = ("NCH", "OIH", "NCH")
    h = lax.conv_general_dilated(x, w1, (1,), [(1, 1)], dimension_numbers=dn)
    h = h + b1[None, :, None]
    h = (h - m1[None, :, None]) * lax.rsqrt(v1[None, :, None] + BN_EPS) \
        * g1[None, :, None] + be1[None, :, None]
    h = jnp.maximum(h, 0.0)
    h = lax.conv_general_dilated(h, w2, (1,), [(1, 1)], dimension_numbers=dn)
    h = h + b2[None, :, None]
    h = (h - m2[None, :, None]) * lax.rsqrt(v2[None, :, None] + BN_EPS) \
        * g2[None, :, None] + be2[None, :, None]
    h = jnp.maximum(h, 0.0)
    pooled = jnp.mean(h, axis=-1)                                 # (B, 64)
    return pooled @ fcw.T + fcb[None, :]


# ----------------------------------------------------------------------------
if __name__ == "__main__":
    key = jax.random.PRNGKey(0)
    k_x, k_p = jax.random.split(key)

    B, L, NUM_CLASSES = 32, 16, 3
    x = jax.random.normal(k_x, (B, 1, L), jnp.float32)            # NCL layout

    torch_params = make_torch_params(k_p, num_classes=NUM_CLASSES)
    packed_params = fold_and_pack(torch_params)

    # im2col / masks / pool matrix fuse into the same jit as the pallas_call.
    fwd = jax.jit(lambda xx, pp: cnn_classifier_forward(xx, pp, NUM_CLASSES))
    out = jax.block_until_ready(fwd(x, packed_params))

    ref = jax.block_until_ready(reference_forward(x, torch_params))
    np.testing.assert_allclose(np.asarray(out), np.asarray(ref),
                               rtol=2e-3, atol=3e-3)
    print("KERNEL_OK")
</pallas_src>

<mosaic_0001>
module attributes {stable_mosaic.version = 11 : i64} {
  func.func @_cnn_kernel(%arg0: i32, %arg1: memref<512x8xf32, #tpu.memory_space<vmem>>, %arg2: memref<32x512xf32, #tpu.memory_space<vmem>>, %arg3: memref<24x32xf32, #tpu.memory_space<vmem>>, %arg4: memref<97x64xf32, #tpu.memory_space<vmem>>, %arg5: memref<65x128xf32, #tpu.memory_space<vmem>>, %arg6: memref<32x128xf32, #tpu.memory_space<vmem>>) attributes {dimension_semantics = [#tpu.dimension_semantics<parallel>], iteration_bounds = array<i64: 1>, scalar_prefetch = 0 : i64, scratch_operands = 0 : i64, tpu.core_type = #tpu.core_type<tc>, window_params = [{transform_indices = @transform_0, window_bounds = array<i64: 512, 8>}, {pipeline_mode = #tpu.pipeline_mode<synchronous>, transform_indices = @transform_1, window_bounds = array<i64: 32, 512>}, {pipeline_mode = #tpu.pipeline_mode<synchronous>, transform_indices = @transform_2, window_bounds = array<i64: 24, 32>}, {pipeline_mode = #tpu.pipeline_mode<synchronous>, transform_indices = @transform_3, window_bounds = array<i64: 97, 64>}, {pipeline_mode = #tpu.pipeline_mode<synchronous>, transform_indices = @transform_4, window_bounds = array<i64: 65, 128>}, {transform_indices = @transform_5, window_bounds = array<i64: 32, 128>}]} {
    %c0 = arith.constant 0 : index
    %c0_0 = arith.constant 0 : index
    %0 = vector.load %arg1[%c0, %c0_0] : memref<512x8xf32, #tpu.memory_space<vmem>>, vector<512x8xf32>
    %c0_1 = arith.constant 0 : index
    %c0_2 = arith.constant 0 : index
    %1 = vector.load %arg3[%c0_1, %c0_2] : memref<24x32xf32, #tpu.memory_space<vmem>>, vector<8x32xf32>
    %cst = arith.constant dense<0.000000e+00> : vector<512x32xf32>
    %2 = tpu.matmul %0, %1, %cst {dimension_numbers = #tpu.dot_dimension_numbers<[1], [0], [0], [1], [0, 0, 1, 1], [], []>} : vector<512x8xf32>, vector<8x32xf32>, vector<512x32xf32> -> vector<512x32xf32>
    %cst_3 = arith.constant 0.000000e+00 : f32
    %3 = vector.broadcast %cst_3 : f32 to vector<512x32xf32>
    %4 = arith.maximumf %2, %3 : vector<512x32xf32>
    %5 = vector.extract_strided_slice %0 {offsets = [0, 6], sizes = [512, 1], strides = [1, 1]} : vector<512x8xf32> to vector<512x1xf32>
    %6 = vector.broadcast %5 : vector<512x1xf32> to vector<512x32xf32>
    %7 = arith.mulf %4, %6 : vector<512x32xf32>
    %c8 = arith.constant 8 : index
    %c0_4 = arith.constant 0 : index
    %8 = vector.load %arg3[%c8, %c0_4] : memref<24x32xf32, #tpu.memory_space<vmem>>, vector<8x32xf32>
    %cst_5 = arith.constant dense<0.000000e+00> : vector<512x32xf32>
    %9 = tpu.matmul %0, %8, %cst_5 {dimension_numbers = #tpu.dot_dimension_numbers<[1], [0], [0], [1], [0, 0, 1, 1], [], []>} : vector<512x8xf32>, vector<8x32xf32>, vector<512x32xf32> -> vector<512x32xf32>
    %cst_6 = arith.constant 0.000000e+00 : f32
    %10 = vector.broadcast %cst_6 : f32 to vector<512x32xf32>
    %11 = arith.maximumf %9, %10 : vector<512x32xf32>
    %c16 = arith.constant 16 : index
    %c0_7 = arith.constant 0 : index
    %12 = vector.load %arg3[%c16, %c0_7] : memref<24x32xf32, #tpu.memory_space<vmem>>, vector<8x32xf32>
    %cst_8 = arith.constant dense<0.000000e+00> : vector<512x32xf32>
    %13 = tpu.matmul %0, %12, %cst_8 {dimension_numbers = #tpu.dot_dimension_numbers<[1], [0], [0], [1], [0, 0, 1, 1], [], []>} : vector<512x8xf32>, vector<8x32xf32>, vector<512x32xf32> -> vector<512x32xf32>
    %cst_9 = arith.constant 0.000000e+00 : f32
    %14 = vector.broadcast %cst_9 : f32 to vector<512x32xf32>
    %15 = arith.maximumf %13, %14 : vector<512x32xf32>
    %16 = vector.extract_strided_slice %0 {offsets = [0, 7], sizes = [512, 1], strides = [1, 1]} : vector<512x8xf32> to vector<512x1xf32>
    %17 = vector.broadcast %16 : vector<512x1xf32> to vector<512x32xf32>
    %18 = arith.mulf %15, %17 : vector<512x32xf32>
    %c0_10 = arith.constant 0 : index
    %c0_11 = arith.constant 0 : index
    %19 = vector.load %arg4[%c0_10, %c0_11] : memref<97x64xf32, #tpu.memory_space<vmem>>, vector<32x64xf32>
    %cst_12 = arith.constant dense<0.000000e+00> : vector<512x64xf32>
    %20 = tpu.matmul %7, %19, %cst_12 {dimension_numbers = #tpu.dot_dimension_numbers<[1], [0], [0], [1], [0, 0, 1, 1], [], []>} : vector<512x32xf32>, vector<32x64xf32>, vector<512x64xf32> -> vector<512x64xf32>
    %c32 = arith.constant 32 : index
    %c0_13 = arith.constant 0 : index
    %21 = vector.load %arg4[%c32, %c0_13] : memref<97x64xf32, #tpu.memory_space<vmem>>, vector<32x64xf32>
    %cst_14 = arith.constant dense<0.000000e+00> : vector<512x64xf32>
    %22 = tpu.matmul %11, %21, %cst_14 {dimension_numbers = #tpu.dot_dimension_numbers<[1], [0], [0], [1], [0, 0, 1, 1], [], []>} : vector<512x32xf32>, vector<32x64xf32>, vector<512x64xf32> -> vector<512x64xf32>
    %23 = arith.addf %20, %22 : vector<512x64xf32>
    %c64 = arith.constant 64 : index
    %c0_15 = arith.constant 0 : index
    %24 = vector.load %arg4[%c64, %c0_15] : memref<97x64xf32, #tpu.memory_space<vmem>>, vector<32x64xf32>
    %cst_16 = arith.constant dense<0.000000e+00> : vector<512x64xf32>
    %25 = tpu.matmul %18, %24, %cst_16 {dimension_numbers = #tpu.dot_dimension_numbers<[1], [0], [0], [1], [0, 0, 1, 1], [], []>} : vector<512x32xf32>, vector<32x64xf32>, vector<512x64xf32> -> vector<512x64xf32>
    %26 = arith.addf %23, %25 : vector<512x64xf32>
    %c96 = arith.constant 96 : index
    %c0_17 = arith.constant 0 : index
    %27 = vector.load %arg4[%c96, %c0_17] : memref<97x64xf32, #tpu.memory_space<vmem>>, vector<1x64xf32>
    %28 = vector.broadcast %27 : vector<1x64xf32> to vector<512x64xf32>
    %29 = arith.addf %26, %28 : vector<512x64xf32>
    %cst_18 = arith.constant 0.000000e+00 : f32
    %30 = vector.broadcast %cst_18 : f32 to vector<512x64xf32>
    %31 = arith.maximumf %29, %30 : vector<512x64xf32>
    %c0_19 = arith.constant 0 : index
    %c0_20 = arith.constant 0 : index
    %32 = vector.load %arg2[%c0_19, %c0_20] : memref<32x512xf32, #tpu.memory_space<vmem>>, vector<32x512xf32>
    %cst_21 = arith.constant dense<0.000000e+00> : vector<32x64xf32>
    %33 = tpu.matmul %32, %31, %cst_21 {dimension_numbers = #tpu.dot_dimension_numbers<[1], [0], [0], [1], [0, 0, 1, 1], [], []>} : vector<32x512xf32>, vector<512x64xf32>, vector<32x64xf32> -> vector<32x64xf32>
    %c0_22 = arith.constant 0 : index
    %c0_23 = arith.constant 0 : index
    %34 = vector.load %arg5[%c0_22, %c0_23] : memref<65x128xf32, #tpu.memory_space<vmem>>, vector<64x128xf32>
    %cst_24 = arith.constant dense<0.000000e+00> : vector<32x128xf32>
    %35 = tpu.matmul %33, %34, %cst_24 {dimension_numbers = #tpu.dot_dimension_numbers<[1], [0], [0], [1], [0, 0, 1, 1], [], []>} : vector<32x64xf32>, vector<64x128xf32>, vector<32x128xf32> -> vector<32x128xf32>
    %c64_25 = arith.constant 64 : index
    %c0_26 = arith.constant 0 : index
    %36 = vector.load %arg5[%c64_25, %c0_26] : memref<65x128xf32, #tpu.memory_space<vmem>>, vector<1x128xf32>
    %37 = vector.broadcast %36 : vector<1x128xf32> to vector<32x128xf32>
    %38 = arith.addf %35, %37 : vector<32x128xf32>
    %c0_27 = arith.constant 0 : index
    %c0_28 = arith.constant 0 : index
    %39 = vector.load %arg6[%c0_27, %c0_28] : memref<32x128xf32, #tpu.memory_space<vmem>>, vector<32x128xf32>
    tpu.vector_store %arg6[%c0_27, %c0_28], %38 {strides = array<i32>} : memref<32x128xf32, #tpu.memory_space<vmem>>, vector<32x128xf32>,
    return
  }
  func.func @transform_0(%arg0: i32) -> (i32, i32) {
    %c0_i32 = arith.constant 0 : i32
    %c0_i32_0 = arith.constant 0 : i32
    return %arg0, %c0_i32 : i32, i32
  }
  func.func @transform_1(%arg0: i32) -> (i32, i32) {
    %c0_i32 = arith.constant 0 : i32
    %c0_i32_0 = arith.constant 0 : i32
    %c0_i32_1 = arith.constant 0 : i32
    return %c0_i32, %c0_i32_0 : i32, i32
  }
  func.func @transform_2(%arg0: i32) -> (i32, i32) {
    %c0_i32 = arith.constant 0 : i32
    %c0_i32_0 = arith.constant 0 : i32
    %c0_i32_1 = arith.constant 0 : i32
    return %c0_i32, %c0_i32_0 : i32, i32
  }
  func.func @transform_3(%arg0: i32) -> (i32, i32) {
    %c0_i32 = arith.constant 0 : i32
    %c0_i32_0 = arith.constant 0 : i32
    %c0_i32_1 = arith.constant 0 : i32
    return %c0_i32, %c0_i32_0 : i32, i32
  }
  func.func @transform_4(%arg0: i32) -> (i32, i32) {
    %c0_i32 = arith.constant 0 : i32
    %c0_i32_0 = arith.constant 0 : i32
    %c0_i32_1 = arith.constant 0 : i32
    return %c0_i32, %c0_i32_0 : i32, i32
  }
  func.func @transform_5(%arg0: i32) -> (i32, i32) {
    %c0_i32 = arith.constant 0 : i32
    %c0_i32_0 = arith.constant 0 : i32
    return %arg0, %c0_i32 : i32, i32
  }
}

</mosaic_0001>

<bundles_post_ra>
// kernel: _lambda_.1
= control target key start
LH: loop header
LB: loop body
LE: loop exit
PB: predicated region body
PF: predicated region fallthrough
CT: control target
= control target key end

     0   :  { %vm85_vm0 = vcmask 64512   ;;  %v6270_v3 = vmov 6   ;;  %vm2275_vm1 = vcmask 261120   ;;  %vm4407_vm2 = vcmask 523264   ;;  %s8301_s2 = inlined_call_operand.vmem [shape: f32[24,32], index: 2, kind: input, shape index: {}]   ;;  %s8302_s0 = inlined_call_operand.vmem [shape: f32[512,8], index: 0, kind: input, shape index: {}]   ;;  %s8303_s3 = inlined_call_operand.vmem [shape: f32[97,64], index: 3, kind: input, shape index: {}]   ;;  %s8304_s1 = inlined_call_operand.vmem [shape: f32[32,512], index: 1, kind: input, shape index: {}]   ;;  %s8305_s4 = inlined_call_operand.vmem [shape: f32[65,128], index: 4, kind: input, shape index: {}]   ;;  %s8306_s5 = inlined_call_operand.vmem [shape: f32[32,128], index: 5, kind: output, shape index: {}]  }
   0x1   :  { %v84_v0 = vld [vmem:[%s8301_s2] sm:$0xff]  ;;  %v6313_v2 = vld [vmem:[%s8302_s0 + $0x8] sm:$0xff]  ;;  %6266 = vset.pattern.permute.xlu0 %v6270_v3  ;;  %6267 = vset.pattern.permute.xlu1 %v6270_v3  ;;  %v6320_v4 = vld [vmem:[%s8302_s0 + $0x10] sm:$0xff] }
   0x2   :  { %v6308_v1 = vld [vmem:[%s8302_s0] sm:$0xff]  ;;  %5402 = vmatprep.subr.mxu0 %v84_v0  ;;  %736 = vperm.xlu1 %6267, %v6320_v4   ;;  %v6331_v5 = vld [vmem:[%s8302_s0 + $0x18] sm:$0xff]  ;;  %v6347_v7 = vld [vmem:[%s8302_s0 + $0x28] sm:$0xff] }
   0x3   :  { %5404 = vmatprep.mubr.msk.f32.mxu0 %vm85_vm0, %v6308_v1  ;;  %5403 = vmatpush3.msra.mxu0 %v84_v0  ;;  %v6336_v6 = vld [vmem:[%s8302_s0 + $0x20] sm:$0xff]  ;;  %v6352_v8 = vld [vmem:[%s8302_s0 + $0x30] sm:$0xff]  ;;  %v1047_v9 = vld [vmem:[%s8301_s2 + $0x8] sm:$0xff] }
   0x4   :  { %728 = vperm.xlu0 %6266, %v6308_v1   ;;  %5405 = vmatmul.mubr.msk.f32.vlgmr.msra.gmra.mrb[0].mxu0 %vm85_vm0, %v6313_v2  ;;  %v6366_v10 = vld [vmem:[%s8302_s0 + $0x38] sm:$0xff]  ;;  %v6371_v11 = vld [vmem:[%s8302_s0 + $0x40] sm:$0xff]  ;;  %v6382_v12 = vld [vmem:[%s8302_s0 + $0x48] sm:$0xff] }
   0x5   :  { %5407 = vmatprep.mubr.msk.f32.mxu0 %vm85_vm0, %v6320_v4  ;;  %5500 = vmatprep.subr.mxu0 %v1047_v9  ;;  %v6387_v13 = vld [vmem:[%s8302_s0 + $0x50] sm:$0xff]  ;;  %v6402_v15 = vld [vmem:[%s8302_s0 + $0x198] sm:$0xff]  ;;  %v6415_v17 = vld [vmem:[%s8302_s0 + $0x1a0] sm:$0xff] }
   0x6   :  { %740 = vperm.xlu1 %6267, %v6331_v5   ;;  %5501 = vmatpush3.msra.mxu0 %v1047_v9  ;;  %v6392_v14 = vld [vmem:[%s8302_s0 + $0x190] sm:$0xff]  ;;  %v6410_v16 = vld [vmem:[%s8302_s0 + $0x58] sm:$0xff]  ;;  %v6422_v18 = vld [vmem:[%s8302_s0 + $0x60] sm:$0xff] }
   0x7   :  { %6134 = vmatprep.subr.mxu1 %v1047_v9  ;;  %5577 = vmatprep.mubr.msk.f32.mxu1 %vm85_vm0, %v6392_v14  ;;  %v6432_v19 = vld [vmem:[%s8302_s0 + $0x1a8] sm:$0xff]  ;;  %v6445_v21 = vld [vmem:[%s8302_s0 + $0x1b0] sm:$0xff]  ;;  %v6462_v23 = vld [vmem:[%s8302_s0 + $0x1b8] sm:$0xff] }
   0x8   :  { %732 = vperm.xlu0 %6266, %v6313_v2   ;;  %5408 = vmatmul.mubr.msk.f32.gmra.mrb[2].mxu0 %vm85_vm0, %v6331_v5  ;;  %v6440_v20 = vld [vmem:[%s8302_s0 + $0x68] sm:$0xff]  ;;  %v6452_v22 = vld [vmem:[%s8302_s0 + $0x70] sm:$0xff]  ;;  %v6470_v24 = vld [vmem:[%s8302_s0 + $0x78] sm:$0xff] }
   0x9   :  { %5410 = vmatprep.mubr.msk.f32.mxu0 %vm85_vm0, %v6336_v6  ;;  %6135 = vmatpush3.msra.mxu1 %v1047_v9  ;;  %v6475_v25 = vld [vmem:[%s8302_s0 + $0x1c0] sm:$0xff]  ;;  %v6492_v27 = vld [vmem:[%s8302_s0 + $0x1c8] sm:$0xff]  ;;  %v6505_v29 = vld [vmem:[%s8302_s0 + $0x1d0] sm:$0xff] }
   0xa   :  { %748 = vperm.xlu1 %6267, %v6347_v7   ;;  %5578 = vmatmul.mubr.msk.f32.vlgmr.msra.gmra.mrb[0].mxu1 %vm85_vm0, %v6402_v15  ;;  %v6482_v26 = vld [vmem:[%s8302_s0 + $0x80] sm:$0xff]  ;;  %8321 = vst [vmem:[#allocation2_spill] sm:$0xff] %v6492_v27  ;;  %v6500_v28 = vld [vmem:[%s8302_s0 + $0x88] sm:$0xff]  ;;  %8322 = vst [vmem:[#allocation3_spill] sm:$0xff] %v6505_v29 }
   0xb   :  { %5580 = vmatprep.mubr.msk.f32.mxu1 %vm85_vm0, %v6415_v17  ;;  %v6512_v30 = vld [vmem:[%s8302_s0 + $0x90] sm:$0xff]  ;;  %v6522_v31 = vld [vmem:[%s8302_s0 + $0x1d8] sm:$0xff]  ;;  %v6535_v33 = vld [vmem:[%s8302_s0 + $0x1e0] sm:$0xff] }
   0xc   :  { %744 = vperm.xlu0 %6266, %v6336_v6   ;;  %5411 = vmatmul.mubr.msk.f32.gmra.mrb[4].mxu0 %vm85_vm0, %v6347_v7  ;;  %8323 = vst [vmem:[#allocation4_spill] sm:$0xff] %v6522_v31  ;;  %v6530_v32 = vld [vmem:[%s8302_s0 + $0x98] sm:$0xff]  ;;  %8324 = vst [vmem:[#allocation5_spill] sm:$0xff] %v6535_v33  ;;  %v6542_v34 = vld [vmem:[%s8302_s0 + $0xa0] sm:$0xff] }
   0xd   :  { %5413 = vmatprep.mubr.msk.f32.mxu0 %vm85_vm0, %v6352_v8  ;;  %v6552_v35 = vld [vmem:[%s8302_s0 + $0x1e8] sm:$0xff]  ;;  %v6565_v37 = vld [vmem:[%s8302_s0 + $0x1f0] sm:$0xff]  ;;  %v6582_v39 = vld [vmem:[%s8302_s0 + $0x1f8] sm:$0xff] }
   0xe   :  { %756 = vperm.xlu1 %6267, %v6366_v10   ;;  %5581 = vmatmul.mubr.msk.f32.gmra.mrb[2].mxu1 %vm85_vm0, %v6432_v19  ;;  %8325 = vst [vmem:[#allocation6_spill] sm:$0xff] %v6552_v35  ;;  %v6560_v36 = vld [vmem:[%s8302_s0 + $0xa8] sm:$0xff]  ;;  %8326 = vst [vmem:[#allocation7_spill] sm:$0xff] %v6565_v37  ;;  %v6572_v38 = vld [vmem:[%s8302_s0 + $0xb0] sm:$0xff] }
   0xf   :  { %5583 = vmatprep.mubr.msk.f32.mxu1 %vm85_vm0, %v6445_v21  ;;  %8327 = vst [vmem:[#allocation8_spill] sm:$0xff] %v6582_v39  ;;  %v6590_v40 = vld [vmem:[%s8302_s0 + $0xb8] sm:$0xff]  ;;  %v6597_v41 = vld [vmem:[%s8302_s0 + $0xc0] sm:$0xff]  ;;  %v6608_v42 = vld [vmem:[%s8302_s0 + $0xc8] sm:$0xff] }
  0x10   :  { %752 = vperm.xlu0 %6266, %v6352_v8   ;;  %5414 = vmatmul.mubr.msk.f32.gmra.mrb[6].mxu0 %vm85_vm0, %v6366_v10  ;;  %v6613_v43 = vld [vmem:[%s8302_s0 + $0xd0] sm:$0xff]  ;;  %v6624_v44 = vld [vmem:[%s8302_s0 + $0xd8] sm:$0xff]  ;;  %v6629_v45 = vld [vmem:[%s8302_s0 + $0xe0] sm:$0xff] }
  0x11   :  { %5416 = vmatprep.mubr.msk.f32.mxu0 %vm85_vm0, %v6371_v11  ;;  %v6640_v46 = vld [vmem:[%s8302_s0 + $0xe8] sm:$0xff]  ;;  %v6645_v47 = vld [vmem:[%s8302_s0 + $0xf0] sm:$0xff]  ;;  %v6656_v48 = vld [vmem:[%s8302_s0 + $0xf8] sm:$0xff] }
  0x12   :  { %764 = vperm.xlu1 %6267, %v6382_v12   ;;  %5584 = vmatmul.mubr.msk.f32.gmra.mrb[4].mxu1 %vm85_vm0, %v6462_v23  ;;  %v6661_v49 = vld [vmem:[%s8302_s0 + $0x100] sm:$0xff]  ;;  %v6672_v50 = vld [vmem:[%s8302_s0 + $0x108] sm:$0xff]  ;;  %v6677_v51 = vld [vmem:[%s8302_s0 + $0x110] sm:$0xff] }
  0x13   :  { %5586 = vmatprep.mubr.msk.f32.mxu1 %vm85_vm0, %v6475_v25  ;;  %v6688_v52 = vld [vmem:[%s8302_s0 + $0x118] sm:$0xff]  ;;  %v6693_v53 = vld [vmem:[%s8302_s0 + $0x120] sm:$0xff]  ;;  %v6704_v54 = vld [vmem:[%s8302_s0 + $0x128] sm:$0xff] }
  0x14   :  { %760 = vperm.xlu0 %6266, %v6371_v11   ;;  %5417 = vmatmul.mubr.msk.f32.gmra.mrb[8].mxu0 %vm85_vm0, %v6382_v12  ;;  %v6709_v55 = vld [vmem:[%s8302_s0 + $0x130] sm:$0xff]  ;;  %v6720_v56 = vld [vmem:[%s8302_s0 + $0x138] sm:$0xff]  ;;  %v6725_v57 = vld [vmem:[%s8302_s0 + $0x140] sm:$0xff] }
  0x15   :  { %5419 = vmatprep.mubr.msk.f32.mxu0 %vm85_vm0, %v6387_v13  ;;  %v6736_v58 = vld [vmem:[%s8302_s0 + $0x148] sm:$0xff]  ;;  %v6741_v59 = vld [vmem:[%s8302_s0 + $0x150] sm:$0xff]  ;;  %v6752_v60 = vld [vmem:[%s8302_s0 + $0x158] sm:$0xff] }
  0x16   :  { %772 = vperm.xlu1 %6267, %v6410_v16   ;;  %5587 = vmatmul.mubr.msk.f32.gmra.mrb[6].mxu1 %vm85_vm0, %v6492_v27  ;;  %v6757_v61 = vld [vmem:[%s8302_s0 + $0x160] sm:$0xff]  ;;  %v6768_v62 = vld [vmem:[%s8302_s0 + $0x168] sm:$0xff]  ;;  %v6773_v63 = vld [vmem:[%s8302_s0 + $0x170] sm:$0xff] }
  0x17   :  { %5589 = vmatprep.mubr.msk.f32.mxu1 %vm85_vm0, %v6505_v29  ;;  %v6784_v0 = vld [vmem:[%s8302_s0 + $0x178] sm:$0xff]  ;;  %v6789_v3 = vld [vmem:[%s8302_s0 + $0x180] sm:$0xff]  ;;  %v6800_v9 = vld [vmem:[%s8302_s0 + $0x188] sm:$0xff] }
  0x18   :  { %768 = vperm.xlu0 %6266, %v6387_v13   ;;  %5420 = vmatmul.mubr.msk.f32.gmra.mrb[10].mxu0 %vm85_vm0, %v6410_v16 }
  0x19   :  { %5422 = vmatprep.mubr.msk.f32.mxu0 %vm85_vm0, %v6422_v18 }
  0x1a   :  { %780 = vperm.xlu1 %6267, %v6440_v20   ;;  %5590 = vmatmul.mubr.msk.f32.gmra.mrb[8].mxu1 %vm85_vm0, %v6522_v31 }
  0x1b   :  { %5592 = vmatprep.mubr.msk.f32.mxu1 %vm85_vm0, %v6535_v33 }
  0x1c   :  { %776 = vperm.xlu0 %6266, %v6422_v18   ;;  %5423 = vmatmul.mubr.msk.f32.gmra.mrb[12].mxu0 %vm85_vm0, %v6440_v20 }
  0x1d   :  { %5425 = vmatprep.mubr.msk.f32.mxu0 %vm85_vm0, %v6452_v22 }
  0x1e   :  { %788 = vperm.xlu1 %6267, %v6470_v24   ;;  %5593 = vmatmul.mubr.msk.f32.gmra.mrb[10].mxu1 %vm85_vm0, %v6552_v35 }
  0x1f   :  { %5595 = vmatprep.mubr.msk.f32.mxu1 %vm85_vm0, %v6565_v37 }
  0x20   :  { %784 = vperm.xlu0 %6266, %v6452_v22   ;;  %5426 = vmatmul.mubr.msk.f32.gmra.mrb[14].mxu0 %vm85_vm0, %v6470_v24 }
  0x21   :  { %5428 = vmatprep.mubr.msk.f32.mxu0 %vm85_vm0, %v6482_v26 }
  0x22   :  { %796 = vperm.xlu1 %6267, %v6500_v28   ;;  %5596 = vmatmul.mubr.msk.f32.gmra.mrb[12].mxu1 %vm85_vm0, %v6582_v39 }
  0x24   :  { %792 = vperm.xlu0 %6266, %v6482_v26   ;;  %5429 = vmatmul.mubr.msk.f32.gmra.mrb[16].mxu0 %vm85_vm0, %v6500_v28 }
  0x25   :  { %5431 = vmatprep.mubr.msk.f32.mxu0 %vm85_vm0, %v6512_v30 }
  0x26   :  { %804 = vperm.xlu1 %6267, %v6530_v32  }
  0x28   :  { %800 = vperm.xlu0 %6266, %v6512_v30   ;;  %5432 = vmatmul.mubr.msk.f32.gmra.mrb[18].mxu0 %vm85_vm0, %v6530_v32 }
  0x29   :  { %5434 = vmatprep.mubr.msk.f32.mxu0 %vm85_vm0, %v6542_v34 }
  0x2a   :  { %812 = vperm.xlu1 %6267, %v6560_v36  }
  0x2c   :  { %808 = vperm.xlu0 %6266, %v6542_v34   ;;  %5435 = vmatmul.mubr.msk.f32.gmra.mrb[20].mxu0 %vm85_vm0, %v6560_v36 }
  0x2d   :  { %5437 = vmatprep.mubr.msk.f32.mxu0 %vm85_vm0, %v6572_v38 }
  0x2e   :  { %820 = vperm.xlu1 %6267, %v6590_v40  }
  0x30   :  { %816 = vperm.xlu0 %6266, %v6572_v38   ;;  %5438 = vmatmul.mubr.msk.f32.gmra.mrb[22].mxu0 %vm85_vm0, %v6590_v40 }
  0x31   :  { %5440 = vmatprep.mubr.msk.f32.mxu0 %vm85_vm0, %v6597_v41 }
  0x32   :  { %828 = vperm.xlu1 %6267, %v6608_v42  }
  0x34   :  { %824 = vperm.xlu0 %6266, %v6597_v41   ;;  %5441 = vmatmul.mubr.msk.f32.gmra.mrb[24].mxu0 %vm85_vm0, %v6608_v42 }
  0x35   :  { %5443 = vmatprep.mubr.msk.f32.mxu0 %vm85_vm0, %v6613_v43 }
  0x36   :  { %836 = vperm.xlu1 %6267, %v6624_v44  }
  0x38   :  { %832 = vperm.xlu0 %6266, %v6613_v43   ;;  %5444 = vmatmul.mubr.msk.f32.gmra.mrb[26].mxu0 %vm85_vm0, %v6624_v44 }
  0x39   :  { %5446 = vmatprep.mubr.msk.f32.mxu0 %vm85_vm0, %v6629_v45 }
  0x3a   :  { %844 = vperm.xlu1 %6267, %v6640_v46  }
  0x3c   :  { %840 = vperm.xlu0 %6266, %v6629_v45   ;;  %5447 = vmatmul.mubr.msk.f32.gmra.mrb[28].mxu0 %vm85_vm0, %v6640_v46 }
  0x3d   :  { %5449 = vmatprep.mubr.msk.f32.mxu0 %vm85_vm0, %v6645_v47 }
  0x3e   :  { %852 = vperm.xlu1 %6267, %v6656_v48  }
  0x40   :  { %848 = vperm.xlu0 %6266, %v6645_v47   ;;  %5450 = vmatmul.mubr.msk.f32.gmra.mrb[30].mxu0 %vm85_vm0, %v6656_v48 }
  0x41   :  { %5452 = vmatprep.mubr.msk.f32.mxu0 %vm85_vm0, %v6661_v49 }
  0x42   :  { %860 = vperm.xlu1 %6267, %v6672_v50  }
  0x44   :  { %856 = vperm.xlu0 %6266, %v6661_v49   ;;  %5453 = vmatmul.mubr.msk.f32.gmra.mrb[32].mxu0 %vm85_vm0, %v6672_v50 }
  0x45   :  { %5455 = vmatprep.mubr.msk.f32.mxu0 %vm85_vm0, %v6677_v51 }
  0x46   :  { %868 = vperm.xlu1 %6267, %v6688_v52  }
  0x48   :  { %864 = vperm.xlu0 %6266, %v6677_v51   ;;  %5456 = vmatmul.mubr.msk.f32.gmra.mrb[34].mxu0 %vm85_vm0, %v6688_v52 }
  0x49   :  { %5458 = vmatprep.mubr.msk.f32.mxu0 %vm85_vm0, %v6693_v53 }
  0x4a   :  { %876 = vperm.xlu1 %6267, %v6704_v54  }
  0x4c   :  { %872 = vperm.xlu0 %6266, %v6693_v53   ;;  %5459 = vmatmul.mubr.msk.f32.gmra.mrb[36].mxu0 %vm85_vm0, %v6704_v54 }
  0x4d   :  { %5461 = vmatprep.mubr.msk.f32.mxu0 %vm85_vm0, %v6709_v55 }
  0x4e   :  { %884 = vperm.xlu1 %6267, %v6720_v56  }
  0x50   :  { %880 = vperm.xlu0 %6266, %v6709_v55   ;;  %5462 = vmatmul.mubr.msk.f32.gmra.mrb[38].mxu0 %vm85_vm0, %v6720_v56 }
  0x51   :  { %5464 = vmatprep.mubr.msk.f32.mxu0 %vm85_vm0, %v6725_v57 }
  0x52   :  { %892 = vperm.xlu1 %6267, %v6736_v58  }
  0x54   :  { %888 = vperm.xlu0 %6266, %v6725_v57   ;;  %5465 = vmatmul.mubr.msk.f32.gmra.mrb[40].mxu0 %vm85_vm0, %v6736_v58 }
  0x55   :  { %5467 = vmatprep.mubr.msk.f32.mxu0 %vm85_vm0, %v6741_v59 }
  0x56   :  { %900 = vperm.xlu1 %6267, %v6752_v60  }
  0x58   :  { %896 = vperm.xlu0 %6266, %v6741_v59   ;;  %5468 = vmatmul.mubr.msk.f32.gmra.mrb[42].mxu0 %vm85_vm0, %v6752_v60 }
  0x59   :  { %5470 = vmatprep.mubr.msk.f32.mxu0 %vm85_vm0, %v6757_v61 }
  0x5a   :  { %908 = vperm.xlu1 %6267, %v6768_v62  }
  0x5c   :  { %904 = vperm.xlu0 %6266, %v6757_v61   ;;  %5471 = vmatmul.mubr.msk.f32.gmra.mrb[44].mxu0 %vm85_vm0, %v6768_v62 }
  0x5d   :  { %5473 = vmatprep.mubr.msk.f32.mxu0 %vm85_vm0, %v6773_v63 }
  0x5e   :  { %916 = vperm.xlu1 %6267, %v6784_v0  }
  0x60   :  { %912 = vperm.xlu0 %6266, %v6773_v63   ;;  %5474 = vmatmul.mubr.msk.f32.gmra.mrb[46].mxu0 %vm85_vm0, %v6784_v0 }
  0x61   :  { %5476 = vmatprep.mubr.msk.f32.mxu0 %vm85_vm0, %v6789_v3 }
  0x62   :  { %924 = vperm.xlu1 %6267, %v6800_v9  }
  0x64   :  { %920 = vperm.xlu0 %6266, %v6789_v3   ;;  %5477 = vmatmul.mubr.msk.f32.gmra.mrb[48].mxu0 %vm85_vm0, %v6800_v9 }
  0x65   :  { %5479 = vmatprep.mubr.msk.f32.mxu0 %vm85_vm0, %v6392_v14 }
  0x66   :  { %932 = vperm.xlu1 %6267, %v6402_v15  }
  0x68   :  { %928 = vperm.xlu0 %6266, %v6392_v14   ;;  %5480 = vmatmul.mubr.msk.f32.gmra.mrb[50].mxu0 %vm85_vm0, %v6402_v15 }
  0x69   :  { %5482 = vmatprep.mubr.msk.f32.mxu0 %vm85_vm0, %v6415_v17 }
  0x6a   :  { %940 = vperm.xlu1 %6267, %v6432_v19  }
  0x6c   :  { %936 = vperm.xlu0 %6266, %v6415_v17   ;;  %5483 = vmatmul.mubr.msk.f32.gmra.mrb[52].mxu0 %vm85_vm0, %v6432_v19 }
  0x6d   :  { %5485 = vmatprep.mubr.msk.f32.mxu0 %vm85_vm0, %v6445_v21 }
  0x6e   :  { %948 = vperm.xlu1 %6267, %v6462_v23  }
  0x70   :  { %944 = vperm.xlu0 %6266, %v6445_v21   ;;  %5486 = vmatmul.mubr.msk.f32.gmra.mrb[54].mxu0 %vm85_vm0, %v6462_v23 }
  0x71   :  { %5488 = vmatprep.mubr.msk.f32.mxu0 %vm85_vm0, %v6475_v25 }
  0x72   :  { %956 = vperm.xlu1 %6267, %v6492_v27  }
  0x74   :  { %952 = vperm.xlu0 %6266, %v6475_v25   ;;  %5489 = vmatmul.mubr.msk.f32.gmra.mrb[56].mxu0 %vm85_vm0, %v6492_v27 }
  0x75   :  { %5491 = vmatprep.mubr.msk.f32.mxu0 %vm85_vm0, %v6505_v29 }
  0x76   :  { %964 = vperm.xlu1 %6267, %v6522_v31  }
  0x78   :  { %960 = vperm.xlu0 %6266, %v6505_v29   ;;  %5492 = vmatmul.mubr.msk.f32.gmra.mrb[58].mxu0 %vm85_vm0, %v6522_v31  ;;  %v2274_v31 = vld [vmem:[%s8303_s3 + $0x38] sm:$0xff] }
  0x79   :  { %5494 = vmatprep.mubr.msk.f32.mxu0 %vm85_vm0, %v6535_v33 }
  0x7a   :  { %972 = vperm.xlu1 %6267, %v6552_v35  }
  0x7c   :  { %968 = vperm.xlu0 %6266, %v6535_v33   ;;  %5495 = vmatmul.mubr.msk.f32.gmra.mrb[60].mxu0 %vm85_vm0, %v6552_v35  ;;  %v1497_v33 = vld [vmem:[%s8301_s2 + $0x10] sm:$0xff] }
  0x7d   :  { %5497 = vmatprep.mubr.msk.f32.mxu0 %vm85_vm0, %v6565_v37  ;;  %5598 = vmatprep.subr.mxu0 %v1497_v33  ;;  %v2273_v35 = vld [vmem:[%s8303_s3 + $0x30] sm:$0xff] }
  0x7e   :  { %980 = vperm.xlu1 %6267, %v6582_v39   ;;  %v6034_v29 = vpack.c.bf16 %v2274_v31, %v2273_v35  ;;  %v6271_v31 = vmov 7  }
  0x80   :  { %976 = vperm.xlu0 %6266, %v6565_v37   ;;  %5498 = vmatmul.mubr.msk.f32.gmra.mrb[62].mxu0 %vm85_vm0, %v6582_v39  ;;  %v2272_v39 = vld [vmem:[%s8303_s3 + $0x28] sm:$0xff] }
  0x81   :  { %5502 = vmatprep.mubr.msk.f32.mxu0 %vm85_vm0, %v6308_v1 }
  0x82   :  { %6269 = vset.pattern.permute.xlu1 %v6271_v31 }
  0x83   :  { %1952 = vperm.xlu1 %6269, %v6313_v2  }
  0x84   :  { %5503 = vmatmul.mubr.msk.f32.vlgmr.msra.gmra.mrb[64].mxu0 %vm85_vm0, %v6313_v2  ;;  %6268 = vset.pattern.permute.xlu0 %v6271_v31 }
  0x85   :  { %5505 = vmatprep.mubr.msk.f32.mxu0 %vm85_vm0, %v6320_v4  ;;  %5599 = vmatpush3.msra.mxu0 %v1497_v33  ;;  %v2271_v33 = vld [vmem:[%s8303_s3 + $0x20] sm:$0xff] }
  0x86   :  { %v6030_v37 = vpack.c.bf16 %v2272_v39, %v2271_v33  ;;  %1948 = vperm.xlu0 %6268, %v6308_v1  }
  0x87   :  { %1956 = vperm.xlu1 %6269, %v6320_v4  }
  0x88   :  { %5506 = vmatmul.mubr.msk.f32.gmra.mrb[66].mxu0 %vm85_vm0, %v6331_v5  ;;  %6031 = vmatprep.subr.bf16.mxu1 %v6030_v37 }
  0x89   :  { %5508 = vmatprep.mubr.msk.f32.mxu0 %vm85_vm0, %v6336_v6  ;;  %6033 = vmatpush3.bf16.msra.mxu1 %v6030_v37 }
  0x8a   :  { %6035 = vmatprep.subr.bf16.mxu1 %v6034_v29  ;;  %1960 = vperm.xlu0 %6268, %v6331_v5  }
  0x8b   :  { %1964 = vperm.xlu1 %6269, %v6336_v6  }
  0x8c   :  { %5509 = vmatmul.mubr.msk.f32.gmra.mrb[68].mxu0 %vm85_vm0, %v6347_v7 }
  0x8d   :  { %5511 = vmatprep.mubr.msk.f32.mxu0 %vm85_vm0, %v6352_v8  ;;  %6037 = vmatpush3.bf16.msra.mxu1 %v6034_v29 }
  0x8e   :  { %1968 = vperm.xlu0 %6268, %v6347_v7  }
  0x8f   :  { %1972 = vperm.xlu1 %6269, %v6352_v8  }
  0x90   :  { %5512 = vmatmul.mubr.msk.f32.gmra.mrb[70].mxu0 %vm85_vm0, %v6366_v10 }
  0x91   :  { %5514 = vmatprep.mubr.msk.f32.mxu0 %vm85_vm0, %v6371_v11 }
  0x92   :  { %1976 = vperm.xlu0 %6268, %v6366_v10  }
  0x93   :  { %1980 = vperm.xlu1 %6269, %v6371_v11  }
  0x94   :  { %5515 = vmatmul.mubr.msk.f32.gmra.mrb[72].mxu0 %vm85_vm0, %v6382_v12 }
  0x95   :  { %5517 = vmatprep.mubr.msk.f32.mxu0 %vm85_vm0, %v6387_v13 }
  0x96   :  { %1984 = vperm.xlu0 %6268, %v6382_v12  }
  0x97   :  { %1988 = vperm.xlu1 %6269, %v6387_v13  }
  0x98   :  { %5518 = vmatmul.mubr.msk.f32.gmra.mrb[74].mxu0 %vm85_vm0, %v6410_v16 }
  0x99   :  { %5520 = vmatprep.mubr.msk.f32.mxu0 %vm85_vm0, %v6422_v18 }
  0x9a   :  { %1992 = vperm.xlu0 %6268, %v6410_v16  }
  0x9b   :  { %1996 = vperm.xlu1 %6269, %v6422_v18  }
  0x9c   :  { %5521 = vmatmul.mubr.msk.f32.gmra.mrb[76].mxu0 %vm85_vm0, %v6440_v20 }
  0x9d   :  { %5523 = vmatprep.mubr.msk.f32.mxu0 %vm85_vm0, %v6452_v22 }
  0x9e   :  { %2000 = vperm.xlu0 %6268, %v6440_v20  }
  0x9f   :  { %2004 = vperm.xlu1 %6269, %v6452_v22  }
  0xa0   :  { %5524 = vmatmul.mubr.msk.f32.gmra.mrb[78].mxu0 %vm85_vm0, %v6470_v24 }
  0xa1   :  { %5526 = vmatprep.mubr.msk.f32.mxu0 %vm85_vm0, %v6482_v26 }
  0xa2   :  { %2008 = vperm.xlu0 %6268, %v6470_v24  }
  0xa3   :  { %2012 = vperm.xlu1 %6269, %v6482_v26  }
  0xa4   :  { %5527 = vmatmul.mubr.msk.f32.gmra.mrb[80].mxu0 %vm85_vm0, %v6500_v28 }
  0xa5   :  { %5529 = vmatprep.mubr.msk.f32.mxu0 %vm85_vm0, %v6512_v30 }
  0xa6   :  { %2016 = vperm.xlu0 %6268, %v6500_v28  }
  0xa7   :  { %2020 = vperm.xlu1 %6269, %v6512_v30  }
  0xa8   :  { %5530 = vmatmul.mubr.msk.f32.gmra.mrb[82].mxu0 %vm85_vm0, %v6530_v32 }
  0xa9   :  { %5532 = vmatprep.mubr.msk.f32.mxu0 %vm85_vm0, %v6542_v34 }
  0xaa   :  { %2024 = vperm.xlu0 %6268, %v6530_v32  }
  0xab   :  { %2028 = vperm.xlu1 %6269, %v6542_v34  }
  0xac   :  { %5533 = vmatmul.mubr.msk.f32.gmra.mrb[84].mxu0 %vm85_vm0, %v6560_v36 }
  0xad   :  { %5535 = vmatprep.mubr.msk.f32.mxu0 %vm85_vm0, %v6572_v38 }
  0xae   :  { %2032 = vperm.xlu0 %6268, %v6560_v36  }
  0xaf   :  { %2036 = vperm.xlu1 %6269, %v6572_v38  }
  0xb0   :  { %5536 = vmatmul.mubr.msk.f32.gmra.mrb[86].mxu0 %vm85_vm0, %v6590_v40 }
  0xb1   :  { %5538 = vmatprep.mubr.msk.f32.mxu0 %vm85_vm0, %v6597_v41 }
  0xb2   :  { %2040 = vperm.xlu0 %6268, %v6590_v40  }
  0xb3   :  { %2044 = vperm.xlu1 %6269, %v6597_v41  }
  0xb4   :  { %5539 = vmatmul.mubr.msk.f32.gmra.mrb[88].mxu0 %vm85_vm0, %v6608_v42 }
  0xb5   :  { %5541 = vmatprep.mubr.msk.f32.mxu0 %vm85_vm0, %v6613_v43 }
  0xb6   :  { %2048 = vperm.xlu0 %6268, %v6608_v42  }
  0xb7   :  { %2052 = vperm.xlu1 %6269, %v6613_v43  }
  0xb8   :  { %5542 = vmatmul.mubr.msk.f32.gmra.mrb[90].mxu0 %vm85_vm0, %v6624_v44 }
  0xb9   :  { %5544 = vmatprep.mubr.msk.f32.mxu0 %vm85_vm0, %v6629_v45 }
  0xba   :  { %2056 = vperm.xlu0 %6268, %v6624_v44  }
  0xbb   :  { %2060 = vperm.xlu1 %6269, %v6629_v45  }
  0xbc   :  { %5545 = vmatmul.mubr.msk.f32.gmra.mrb[92].mxu0 %vm85_vm0, %v6640_v46 }
  0xbd   :  { %5547 = vmatprep.mubr.msk.f32.mxu0 %vm85_vm0, %v6645_v47 }
  0xbe   :  { %2064 = vperm.xlu0 %6268, %v6640_v46  }
  0xbf   :  { %2068 = vperm.xlu1 %6269, %v6645_v47  }
  0xc0   :  { %5548 = vmatmul.mubr.msk.f32.gmra.mrb[94].mxu0 %vm85_vm0, %v6656_v48 }
  0xc1   :  { %5550 = vmatprep.mubr.msk.f32.mxu0 %vm85_vm0, %v6661_v49 }
  0xc2   :  { %2072 = vperm.xlu0 %6268, %v6656_v48  }
  0xc3   :  { %2076 = vperm.xlu1 %6269, %v6661_v49  }
  0xc4   :  { %5551 = vmatmul.mubr.msk.f32.gmra.mrb[96].mxu0 %vm85_vm0, %v6672_v50 }
  0xc5   :  { %5553 = vmatprep.mubr.msk.f32.mxu0 %vm85_vm0, %v6677_v51 }
  0xc6   :  { %2080 = vperm.xlu0 %6268, %v6672_v50  }
  0xc8   :  { %5554 = vmatmul.mubr.msk.f32.gmra.mrb[98].mxu0 %vm85_vm0, %v6688_v52 }
  0xc9   :  { %5556 = vmatprep.mubr.msk.f32.mxu0 %vm85_vm0, %v6693_v53 }
  0xcc   :  { %5557 = vmatmul.mubr.msk.f32.gmra.mrb[100].mxu0 %vm85_vm0, %v6704_v54 }
  0xcd   :  { %5559 = vmatprep.mubr.msk.f32.mxu0 %vm85_vm0, %v6709_v55 }
  0xd0   :  { %5560 = vmatmul.mubr.msk.f32.gmra.mrb[102].mxu0 %vm85_vm0, %v6720_v56 }
  0xd1   :  { %5562 = vmatprep.mubr.msk.f32.mxu0 %vm85_vm0, %v6725_v57 }
  0xd4   :  { %5563 = vmatmul.mubr.msk.f32.gmra.mrb[104].mxu0 %vm85_vm0, %v6736_v58 }
  0xd5   :  { %5565 = vmatprep.mubr.msk.f32.mxu0 %vm85_vm0, %v6741_v59 }
  0xd7   :  { %v6949_v27 = vpop.f32.mrb[0].mxu0 }
  0xd8   :  { %v6951_v39 = vpop.f32.mrb[1].mxu0  ;;  %5566 = vmatmul.mubr.msk.f32.gmra.mrb[106].mxu0 %vm85_vm0, %v6752_v60 }
  0xd9   :  { %5568 = vmatprep.mubr.msk.f32.mxu0 %vm85_vm0, %v6757_v61 }
  0xdb   :  { %v6957_v37 = vpop.f32.mrb[2].mxu0 }
  0xdc   :  { %8328 = vst [vmem:[#allocation9_spill] sm:$0xff] %v6957_v37  ;;  %v6959_v33 = vpop.f32.mrb[3].mxu0  ;;  %5569 = vmatmul.mubr.msk.f32.gmra.mrb[108].mxu0 %vm85_vm0, %v6768_v62 }
  0xdd   :  { %5571 = vmatprep.mubr.msk.f32.mxu0 %vm85_vm0, %v6773_v63 }
  0xdf   :  { %v6967_v35 = vpop.f32.mrb[4].mxu0 }
  0xe0   :  { %8329 = vst [vmem:[#allocation10_spill] sm:$0xff] %v6967_v35  ;;  %v6969_v29 = vpop.f32.mrb[5].mxu0  ;;  %5572 = vmatmul.mubr.msk.f32.gmra.mrb[110].mxu0 %vm85_vm0, %v6784_v0 }
  0xe1   :  { %8330 = vst [vmem:[#allocation11_spill] sm:$0xff] %v6969_v29  ;;  %5574 = vmatprep.mubr.msk.f32.mxu0 %vm85_vm0, %v6789_v3 }
  0xe3   :  { %v6977_v37 = vpop.f32.mrb[6].mxu0 }
  0xe4   :  { %8331 = vst [vmem:[#allocation12_spill] sm:$0xff] %v6977_v37  ;;  %v6979_v31 = vpop.f32.mrb[7].mxu0  ;;  %5575 = vmatmul.mubr.msk.f32.gmra.mrb[112].mxu0 %vm85_vm0, %v6800_v9 }
  0xe5   :  { %5600 = vmatprep.mubr.msk.f32.mxu0 %vm85_vm0, %v6308_v1 }
  0xe7   :  { %v6987_v35 = vpop.f32.mrb[8].mxu0 }
  0xe8   :  { %v6989_v29 = vpop.f32.mrb[9].mxu0  ;;  %5601 = vmatmul.mubr.msk.f32.vlgmr.msra.gmra.mrb[114].mxu0 %vm85_vm0, %v6313_v2 }
  0xe9   :  { %5603 = vmatprep.mubr.msk.f32.mxu0 %vm85_vm0, %v6320_v4 }
  0xeb   :  { %v6997_v37 = vpop.f32.mrb[10].mxu0 }
  0xec   :  { %v6999_v1 = vpop.f32.mrb[11].mxu0  ;;  %5604 = vmatmul.mubr.msk.f32.gmra.mrb[116].mxu0 %vm85_vm0, %v6331_v5 }
  0xed   :  { %5606 = vmatprep.mubr.msk.f32.mxu0 %vm85_vm0, %v6336_v6 }
  0xef   :  { %v7007_v2 = vpop.f32.mrb[12].mxu0 }
  0xf0   :  { %v7009_v4 = vpop.f32.mrb[13].mxu0  ;;  %5607 = vmatmul.mubr.msk.f32.gmra.mrb[118].mxu0 %vm85_vm0, %v6347_v7 }
  0xf1   :  { %5609 = vmatprep.mubr.msk.f32.mxu0 %vm85_vm0, %v6352_v8 }
  0xf3   :  { %v7017_v5 = vpop.f32.mrb[14].mxu0 }
  0xf4   :  { %v7019_v6 = vpop.f32.mrb[15].mxu0  ;;  %5610 = vmatmul.mubr.msk.f32.gmra.mrb[120].mxu0 %vm85_vm0, %v6366_v10 }
  0xf5   :  { %5612 = vmatprep.mubr.msk.f32.mxu0 %vm85_vm0, %v6371_v11 }
  0xf7   :  { %v7027_v7 = vpop.f32.mrb[16].mxu0 }
  0xf8   :  { %v7029_v8 = vpop.f32.mrb[17].mxu0  ;;  %5613 = vmatmul.mubr.msk.f32.gmra.mrb[122].mxu0 %vm85_vm0, %v6382_v12 }
  0xf9   :  { %5615 = vmatprep.mubr.msk.f32.mxu0 %vm85_vm0, %v6387_v13 }
  0xfb   :  { %v7037_v10 = vpop.f32.mrb[18].mxu0 }
  0xfc   :  { %8332 = vst [vmem:[#allocation13_spill] sm:$0xff] %v7037_v10  ;;  %v7039_v11 = vpop.f32.mrb[19].mxu0  ;;  %5616 = vmatmul.mubr.msk.f32.gmra.mrb[124].mxu0 %vm85_vm0, %v6410_v16 }
  0xfd   :  { %8333 = vst [vmem:[#allocation14_spill] sm:$0xff] %v7039_v11  ;;  %5618 = vmatprep.mubr.msk.f32.mxu0 %vm85_vm0, %v6422_v18  ;;  %v7059_v18 = vpop.permute.xlu0 %728  ;;  %2088 = vperm.xlu0 %6268, %v6688_v52  }
  0xff   :  { %v7047_v12 = vpop.f32.mrb[20].mxu0 }
 0x100   :  { %8334 = vst [vmem:[#allocation15_spill] sm:$0xff] %v7047_v12  ;;  %v7049_v13 = vpop.f32.mrb[21].mxu0  ;;  %5619 = vmatmul.mubr.msk.f32.gmra.mrb[126].mxu0 %vm85_vm0, %v6440_v20  ;;  %v7065_v12 = vpop.permute.xlu1 %736  ;;  %2084 = vperm.xlu1 %6269, %v6677_v51  }
 0x101   :  { %8335 = vst [vmem:[#allocation16_spill] sm:$0xff] %v7049_v13  ;;  %5621 = vmatprep.mubr.msk.f32.mxu0 %vm85_vm0, %v6452_v22  ;;  %v8394_v13 = vld [vmem:[#allocation7_spill] sm:$0xff] }
 0x103   :  { %v7057_v16 = vpop.f32.mrb[22].mxu0 }
 0x104   :  { %8336 = vst [vmem:[#allocation17_spill] sm:$0xff] %v7057_v16  ;;  %v7061_v10 = vpop.f32.mrb[23].mxu0  ;;  %5622 = vmatmul.mubr.msk.f32.gmra.mrb[128].mxu0 %vm85_vm0, %v6470_v24  ;;  %v7079_v24 = vpop.permute.xlu0 %732  ;;  %2096 = vperm.xlu0 %6268, %v6704_v54  }
 0x105   :  { %8337 = vst [vmem:[#allocation18_spill] sm:$0xff] %v7061_v10  ;;  %5624 = vmatprep.mubr.msk.f32.mxu0 %vm85_vm0, %v6482_v26  ;;  %v7083_v26 = vpop.permute.xlu1 %740  ;;  %2092 = vperm.xlu1 %6269, %v6693_v53  }
 0x107   :  { %v7071_v20 = vpop.f32.mrb[24].mxu0 }
 0x108   :  { %8338 = vst [vmem:[#allocation19_spill] sm:$0xff] %v7071_v20  ;;  %v7073_v22 = vpop.f32.mrb[25].mxu0  ;;  %5625 = vmatmul.mubr.msk.f32.gmra.mrb[130].mxu0 %vm85_vm0, %v6500_v28  ;;  %v7095_v28 = vpop.permute.xlu0 %744  ;;  %2104 = vperm.xlu0 %6268, %v6720_v56  }
 0x109   :  { %8339 = vst [vmem:[#allocation20_spill] sm:$0xff] %v7073_v22  ;;  %5627 = vmatprep.mubr.msk.f32.mxu0 %vm85_vm0, %v6512_v30 }
 0x10b   :  { %v7085_v16 = vpop.f32.mrb[26].mxu0 }
 0x10c   :  { %8340 = vst [vmem:[#allocation21_spill] sm:$0xff] %v7085_v16  ;;  %v7087_v10 = vpop.f32.mrb[27].mxu0  ;;  %5628 = vmatmul.mubr.msk.f32.gmra.mrb[132].mxu0 %vm85_vm0, %v6530_v32  ;;  %v7103_v16 = vpop.permute.xlu1 %748  ;;  %2100 = vperm.xlu1 %6269, %v6709_v55  }
 0x10d   :  { %8341 = vst [vmem:[#allocation22_spill] sm:$0xff] %v7087_v10  ;;  %5630 = vmatprep.mubr.msk.f32.mxu0 %vm85_vm0, %v6542_v34 }
 0x10f   :  { %v7097_v30 = vpop.f32.mrb[28].mxu0 }
 0x110   :  { %8342 = vst [vmem:[#allocation23_spill] sm:$0xff] %v7097_v30  ;;  %v7099_v20 = vpop.f32.mrb[29].mxu0  ;;  %5631 = vmatmul.mubr.msk.f32.gmra.mrb[134].mxu0 %vm85_vm0, %v6560_v36  ;;  %v7115_v30 = vpop.permute.xlu0 %752  ;;  %2112 = vperm.xlu0 %6268, %v6736_v58  }
 0x111   :  { %8343 = vst [vmem:[#allocation24_spill] sm:$0xff] %v7099_v20  ;;  %5633 = vmatprep.mubr.msk.f32.mxu0 %vm85_vm0, %v6572_v38  ;;  %v7121_v36 = vpop.permute.xlu1 %756  ;;  %2108 = vperm.xlu1 %6269, %v6725_v57  }
 0x113   :  { %v7109_v32 = vpop.f32.mrb[30].mxu0 }
 0x114   :  { %8344 = vst [vmem:[#allocation25_spill] sm:$0xff] %v7109_v32  ;;  %v7111_v34 = vpop.f32.mrb[31].mxu0  ;;  %5634 = vmatmul.mubr.msk.f32.gmra.mrb[136].mxu0 %vm85_vm0, %v6590_v40  ;;  %v7133_v40 = vpop.permute.xlu0 %760  ;;  %2120 = vperm.xlu0 %6268, %v6752_v60  }
 0x115   :  { %8345 = vst [vmem:[#allocation26_spill] sm:$0xff] %v7111_v34  ;;  %5636 = vmatprep.mubr.msk.f32.mxu0 %vm85_vm0, %v6597_v41 }
 0x117   :  { %v7123_v38 = vpop.f32.mrb[32].mxu0 }
 0x118   :  { %8346 = vst [vmem:[#allocation27_spill] sm:$0xff] %v7123_v38  ;;  %v7125_v20 = vpop.f32.mrb[33].mxu0  ;;  %5637 = vmatmul.mubr.msk.f32.gmra.mrb[138].mxu0 %vm85_vm0, %v6608_v42  ;;  %v2267_v42 = vld [vmem:[%s8303_s3] sm:$0xff]  ;;  %v7147_v38 = vpop.permute.xlu1 %764  ;;  %2116 = vperm.xlu1 %6269, %v6741_v59  }
 0x119   :  { %8347 = vst [vmem:[#allocation28_spill] sm:$0xff] %v7125_v20  ;;  %5639 = vmatprep.mubr.msk.f32.mxu0 %vm85_vm0, %v6613_v43  ;;  %v2268_v43 = vld [vmem:[%s8303_s3 + $0x8] sm:$0xff] }
 0x11a   :  { %v7151_v20 = vpack.c.bf16 %v2268_v43, %v2267_v42 }
 0x11b   :  { %v7135_v41 = vpop.f32.mrb[34].mxu0 }
 0x11c   :  { %8348 = vst [vmem:[#allocation29_spill] sm:$0xff] %v7135_v41  ;;  %v7137_v32 = vpop.f32.mrb[35].mxu0  ;;  %5640 = vmatmul.mubr.msk.f32.gmra.mrb[140].mxu0 %vm85_vm0, %v6624_v44  ;;  %6039 = vmatprep.subr.bf16.mxu1 %v7151_v20 }
 0x11d   :  { %8349 = vst [vmem:[#allocation30_spill] sm:$0xff] %v7137_v32  ;;  %5642 = vmatprep.mubr.msk.f32.mxu0 %vm85_vm0, %v6629_v45  ;;  %v7162_v32 = vpop.permute.xlu0 %768  ;;  %v7168_v45 = vpop.permute.xlu1 %772  ;;  %2124 = vperm.xlu1 %6269, %v6757_v61  }
 0x11e   :  { %2128 = vperm.xlu0 %6268, %v6768_v62  }
 0x11f   :  { %v7155_v44 = vpop.f32.mrb[36].mxu0 }
 0x120   :  { %8350 = vst [vmem:[#allocation31_spill] sm:$0xff] %v7155_v44  ;;  %v7158_v41 = vpop.f32.mrb[37].mxu0  ;;  %5643 = vmatmul.mubr.msk.f32.gmra.mrb[142].mxu0 %vm85_vm0, %v6640_v46 }
 0x121   :  { %8351 = vst [vmem:[#allocation32_spill] sm:$0xff] %v7158_v41  ;;  %5645 = vmatprep.mubr.msk.f32.mxu0 %vm85_vm0, %v6645_v47  ;;  %v7180_v46 = vpop.permute.xlu0 %776 }
 0x122   :  { %2136 = vperm.xlu0 %6268, %v6784_v0  }
 0x123   :  { %v7170_v42 = vpop.f32.mrb[38].mxu0 }
 0x124   :  { %8352 = vst [vmem:[#allocation33_spill] sm:$0xff] %v7170_v42  ;;  %v7172_v43 = vpop.f32.mrb[39].mxu0  ;;  %5646 = vmatmul.mubr.msk.f32.gmra.mrb[144].mxu0 %vm85_vm0, %v6656_v48  ;;  %v7188_v42 = vpop.permute.xlu1 %780  ;;  %2132 = vperm.xlu1 %6269, %v6773_v63  }
 0x125   :  { %8353 = vst [vmem:[#allocation34_spill] sm:$0xff] %v7172_v43  ;;  %5648 = vmatprep.mubr.msk.f32.mxu0 %vm85_vm0, %v6661_v49 }
 0x127   :  { %v7182_v47 = vpop.f32.mrb[40].mxu0 }
 0x128   :  { %8354 = vst [vmem:[#allocation35_spill] sm:$0xff] %v7182_v47  ;;  %v7184_v44 = vpop.f32.mrb[41].mxu0  ;;  %5649 = vmatmul.mubr.msk.f32.gmra.mrb[146].mxu0 %vm85_vm0, %v6672_v50  ;;  %v7200_v47 = vpop.permute.xlu0 %784  ;;  %2144 = vperm.xlu0 %6268, %v6800_v9  }
 0x129   :  { %8355 = vst [vmem:[#allocation36_spill] sm:$0xff] %v7184_v44  ;;  %5651 = vmatprep.mubr.msk.f32.mxu0 %vm85_vm0, %v6677_v51  ;;  %v7206_v50 = vpop.permute.xlu1 %788  ;;  %2140 = vperm.xlu1 %6269, %v6789_v3  }
 0x12b   :  { %v7194_v48 = vpop.f32.mrb[42].mxu0 }
 0x12c   :  { %8356 = vst [vmem:[#allocation37_spill] sm:$0xff] %v7194_v48  ;;  %v7196_v49 = vpop.f32.mrb[43].mxu0  ;;  %5652 = vmatmul.mubr.msk.f32.gmra.mrb[148].mxu0 %vm85_vm0, %v6688_v52  ;;  %v7218_v52 = vpop.permute.xlu0 %792  ;;  %2152 = vperm.xlu0 %6268, %v6402_v15  }
 0x12d   :  { %8357 = vst [vmem:[#allocation38_spill] sm:$0xff] %v7196_v49  ;;  %5654 = vmatprep.mubr.msk.f32.mxu0 %vm85_vm0, %v6693_v53 }
 0x12f   :  { %v7208_v51 = vpop.f32.mrb[44].mxu0 }
 0x130   :  { %8358 = vst [vmem:[#allocation39_spill] sm:$0xff] %v7208_v51  ;;  %v7210_v44 = vpop.f32.mrb[45].mxu0  ;;  %5655 = vmatmul.mubr.msk.f32.gmra.mrb[150].mxu0 %vm85_vm0, %v6704_v54  ;;  %v7226_v51 = vpop.permute.xlu1 %796  ;;  %2148 = vperm.xlu1 %6269, %v6392_v14  }
 0x131   :  { %8359 = vst [vmem:[#allocation40_spill] sm:$0xff] %v7210_v44  ;;  %5657 = vmatprep.mubr.msk.f32.mxu0 %vm85_vm0, %v6709_v55  ;;  %8362 = vst [vmem:[#allocation43_spill] sm:$0xff] %v7226_v51 }
 0x133   :  { %v7220_v53 = vpop.f32.mrb[46].mxu0 }
 0x134   :  { %8360 = vst [vmem:[#allocation41_spill] sm:$0xff] %v7220_v53  ;;  %v7222_v48 = vpop.f32.mrb[47].mxu0  ;;  %5658 = vmatmul.mubr.msk.f32.gmra.mrb[152].mxu0 %vm85_vm0, %v6720_v56  ;;  %v7238_v53 = vpop.permute.xlu0 %800  ;;  %2160 = vperm.xlu0 %6268, %v6432_v19  }
 0x135   :  { %8361 = vst [vmem:[#allocation42_spill] sm:$0xff] %v7222_v48  ;;  %5660 = vmatprep.mubr.msk.f32.mxu0 %vm85_vm0, %v6725_v57  ;;  %8365 = vst [vmem:[#allocation46_spill] sm:$0xff] %v7238_v53  ;;  %v7242_v56 = vpop.f32.mrb[0].mxu1  ;;  %v7248_v48 = vpop.permute.xlu1 %804  ;;  %2156 = vperm.xlu1 %6269, %v6415_v17   ;;  %v8395_v53 = vld [vmem:[#allocation8_spill] sm:$0xff] }
 0x136   :  { %v7246_v57 = vpop.f32.mrb[1].mxu1  ;;  %8366 = vst [vmem:[#allocation47_spill] sm:$0xff] %v7248_v48 }
 0x137   :  { %v7232_v54 = vpop.f32.mrb[48].mxu0 }
 0x138   :  { %8363 = vst [vmem:[#allocation44_spill] sm:$0xff] %v7232_v54  ;;  %v7234_v55 = vpop.f32.mrb[49].mxu0  ;;  %5661 = vmatmul.mubr.msk.f32.gmra.mrb[154].mxu0 %vm85_vm0, %v6736_v58  ;;  %v7256_v58 = vpop.f32.mrb[2].mxu1 }
 0x139   :  { %8364 = vst [vmem:[#allocation45_spill] sm:$0xff] %v7234_v55  ;;  %5663 = vmatprep.mubr.msk.f32.mxu0 %vm85_vm0, %v6741_v59  ;;  %v7260_v59 = vpop.f32.mrb[3].mxu1  ;;  %v7264_v44 = vpop.permute.xlu0 %808  ;;  %2168 = vperm.xlu0 %6268, %v6462_v23  }
 0x13a   :  { %8369 = vst [vmem:[#allocation50_spill] sm:$0xff] %v7264_v44 }
 0x13b   :  { %v7250_v54 = vpop.f32.mrb[50].mxu0 }
 0x13c   :  { %8367 = vst [vmem:[#allocation48_spill] sm:$0xff] %v7250_v54  ;;  %v7252_v55 = vpop.f32.mrb[51].mxu0  ;;  %5664 = vmatmul.mubr.msk.f32.gmra.mrb[156].mxu0 %vm85_vm0, %v6752_v60  ;;  %v7272_v60 = vpop.f32.mrb[4].mxu1 }
 0x13d   :  { %8368 = vst [vmem:[#allocation49_spill] sm:$0xff] %v7252_v55  ;;  %5666 = vmatprep.mubr.msk.f32.mxu0 %vm85_vm0, %v6757_v61  ;;  %v7274_v55 = vpop.permute.xlu1 %812  ;;  %v7278_v61 = vpop.f32.mrb[5].mxu1  ;;  %2164 = vperm.xlu1 %6269, %v6445_v21  }
 0x13e   :  { %8372 = vst [vmem:[#allocation53_spill] sm:$0xff] %v7274_v55 }
 0x13f   :  { %v7266_v49 = vpop.f32.mrb[52].mxu0 }
 0x140   :  { %8370 = vst [vmem:[#allocation51_spill] sm:$0xff] %v7266_v49  ;;  %v7268_v54 = vpop.f32.mrb[53].mxu0  ;;  %5667 = vmatmul.mubr.msk.f32.gmra.mrb[158].mxu0 %vm85_vm0, %v6768_v62  ;;  %v7288_v62 = vpop.f32.mrb[6].mxu1 }
 0x141   :  { %8371 = vst [vmem:[#allocation52_spill] sm:$0xff] %v7268_v54  ;;  %5669 = vmatprep.mubr.msk.f32.mxu0 %vm85_vm0, %v6773_v63  ;;  %v7292_v54 = vpop.f32.mrb[7].mxu1  ;;  %v7294_v63 = vpop.permute.xlu0 %816 }
 0x142   :  { %8375 = vst [vmem:[#allocation56_spill] sm:$0xff] %v7294_v63  ;;  %v7298_v41 = vpop.permute.xlu1 %820  ;;  %2172 = vperm.xlu1 %6269, %v6475_v25  }
 0x143   :  { %v7282_v43 = vpop.f32.mrb[54].mxu0  ;;  %8376 = vst [vmem:[#allocation57_spill] sm:$0xff] %v7298_v41  ;;  %v8383_v41 = vld [vmem:[#allocation2_spill] sm:$0xff] }
 0x144   :  { %8373 = vst [vmem:[#allocation54_spill] sm:$0xff] %v7282_v43  ;;  %v7284_v49 = vpop.f32.mrb[55].mxu0  ;;  %5670 = vmatmul.mubr.msk.f32.gmra.mrb[160].mxu0 %vm85_vm0, %v6784_v0  ;;  %v7306_v0 = vpop.f32.mrb[8].mxu1  ;;  %2176 = vperm.xlu0 %6268, %v8383_v41  }
 0x145   :  { %8374 = vst [vmem:[#allocation55_spill] sm:$0xff] %v7284_v49  ;;  %5672 = vmatprep.mubr.msk.f32.mxu0 %vm85_vm0, %v6789_v3  ;;  %v7310_v3 = vpop.f32.mrb[9].mxu1 }
 0x147   :  { %v7300_v43 = vpop.f32.mrb[56].mxu0 }
 0x148   :  { %8377 = vst [vmem:[#allocation58_spill] sm:$0xff] %v7300_v43  ;;  %v7302_v49 = vpop.f32.mrb[57].mxu0  ;;  %5673 = vmatmul.mubr.msk.f32.gmra.mrb[162].mxu0 %vm85_vm0, %v6800_v9  ;;  %v7320_v43 = vpop.f32.mrb[10].mxu1 }
 0x149   :  { %8378 = vst [vmem:[#allocation59_spill] sm:$0xff] %v7302_v49  ;;  %5675 = vmatprep.mubr.msk.f32.mxu0 %vm85_vm0, %v6392_v14  ;;  %v7322_v9 = vpop.permute.xlu0 %824  ;;  %v7326_v14 = vpop.f32.mrb[11].mxu1 }
 0x14a   :  { %8381 = vst [vmem:[#allocation62_spill] sm:$0xff] %v7322_v9  ;;  %v7328_v49 = vpop.permute.xlu1 %828  ;;  %v8386_v9 = vld [vmem:[#allocation3_spill] sm:$0xff] }
 0x14b   :  { %v7314_v34 = vpop.f32.mrb[58].mxu0  ;;  %8382 = vst [vmem:[#allocation63_spill] sm:$0xff] %v7328_v49  ;;  %2180 = vperm.xlu1 %6269, %v8386_v9   ;;  %v8387_v49 = vld [vmem:[#allocation4_spill] sm:$0xff] }
 0x14c   :  { %8379 = vst [vmem:[#allocation60_spill] sm:$0xff] %v7314_v34  ;;  %v7316_v10 = vpop.f32.mrb[59].mxu0  ;;  %5676 = vmatmul.mubr.msk.f32.gmra.mrb[164].mxu0 %vm85_vm0, %v6402_v15  ;;  %v7338_v15 = vpop.f32.mrb[12].mxu1  ;;  %2184 = vperm.xlu0 %6268, %v8387_v49  }
 0x14d   :  { %8380 = vst [vmem:[#allocation61_spill] sm:$0xff] %v7316_v10  ;;  %5678 = vmatprep.mubr.msk.f32.mxu0 %vm85_vm0, %v6415_v17  ;;  %v7342_v17 = vpop.f32.mrb[13].mxu1  ;;  %v7346_v22 = vpop.permute.xlu0 %832 }
 0x14e   :  { %8388 = vst [vmem:[#allocation3_spill] sm:$0xff] %v7346_v22  ;;  %v2269_v22 = vld [vmem:[%s8303_s3 + $0x10] sm:$0xff] }
 0x14f   :  { %v7332_v34 = vpop.f32.mrb[60].mxu0 }
 0x150   :  { %8384 = vst [vmem:[#allocation2_spill] sm:$0xff] %v7332_v34  ;;  %v7334_v10 = vpop.f32.mrb[61].mxu0  ;;  %5679 = vmatmul.mubr.msk.f32.gmra.mrb[166].mxu0 %vm85_vm0, %v6432_v19  ;;  %v7350_v34 = vpop.permute.xlu1 %836  ;;  %v8392_v19 = vld [vmem:[#allocation5_spill] sm:$0xff] }
 0x151   :  { %8385 = vst [vmem:[#allocation64_spill] sm:$0xff] %v7334_v10  ;;  %5681 = vmatprep.mubr.msk.f32.mxu0 %vm85_vm0, %v6445_v21  ;;  %8390 = vst [vmem:[#allocation65_spill] sm:$0xff] %v7350_v34  ;;  %2188 = vperm.xlu1 %6269, %v8392_v19   ;;  %v8393_v21 = vld [vmem:[#allocation6_spill] sm:$0xff]  ;;  %v7372_v34 = vpop.permute.xlu0 %840 }
 0x152   :  { %2192 = vperm.xlu0 %6268, %v8393_v21  }
 0x153   :  { %v7348_v63 = vpop.f32.mrb[62].mxu0 }
 0x154   :  { %8389 = vst [vmem:[#allocation4_spill] sm:$0xff] %v7348_v63  ;;  %v7352_v10 = vpop.f32.mrb[63].mxu0  ;;  %5682 = vmatmul.mubr.msk.f32.gmra.mrb[168].mxu0 %vm85_vm0, %v6462_v23  ;;  %v2270_v63 = vld [vmem:[%s8303_s3 + $0x18] sm:$0xff] }
 0x155   :  { %8391 = vst [vmem:[#allocation66_spill] sm:$0xff] %v7352_v10  ;;  %5684 = vmatprep.mubr.msk.f32.mxu0 %vm85_vm0, %v6475_v25  ;;  %v7370_v25 = vpop.permute.xlu1 %844  ;;  %v6042_v48 = vpack.c.bf16 %v2270_v63, %v2269_v22  ;;  %2196 = vperm.xlu1 %6269, %v8394_v13  }
 0x156   :  { %2200 = vperm.xlu0 %6268, %v8395_v53  }
 0x157   :  { %v5504_v55 = vpop.f32.mrb[64].mxu0 }
 0x158   :  { %v1114_v10 = vpop.f32.mrb[65].mxu0  ;;  %5685 = vmatmul.mubr.msk.f32.gmra.mrb[170].mxu0 %vm85_vm0, %v8383_v41  ;;  %v1434_v44 = vmax.f32 %v5504_v55, 0.0 }
 0x159   :  { %v1433_v23 = vmax.f32 %v1114_v10, 0.0  ;;  %5687 = vmatprep.mubr.msk.f32.mxu0 %vm85_vm0, %v8386_v9 }
 0x15b   :  { %v5507_v51 = vpop.f32.mrb[66].mxu0  ;;  %5704 = vmatprep.mubr.msk.f32.mxu1 %vm2275_vm1, %v1433_v23 }
 0x15c   :  { %v1124_v11 = vpop.f32.mrb[67].mxu0  ;;  %5705 = vmatmul.mubr.msk.f32.vlgmr.msra.gmra.mrb[14].mxu1 %vm2275_vm1, %v1434_v44  ;;  %5688 = vmatmul.mubr.msk.f32.gmra.mrb[172].mxu0 %vm85_vm0, %v8387_v49  ;;  %v1436_v22 = vmax.f32 %v5507_v51, 0.0 }
 0x15d   :  { %v1435_v10 = vmax.f32 %v1124_v11, 0.0  ;;  %5690 = vmatprep.mubr.msk.f32.mxu0 %vm85_vm0, %v8392_v19  ;;  %6041 = vmatpush3.bf16.msra.mxu1 %v7151_v20 }
 0x15e   :  { %6043 = vmatprep.subr.bf16.mxu1 %v6042_v48 }
 0x15f   :  { %v5510_v41 = vpop.f32.mrb[68].mxu0  ;;  %5707 = vmatprep.mubr.msk.f32.mxu1 %vm2275_vm1, %v1435_v10 }
 0x160   :  { %v1134_v55 = vpop.f32.mrb[69].mxu0  ;;  %5708 = vmatmul.mubr.msk.f32.gmra.mrb[16].mxu1 %vm2275_vm1, %v1436_v22  ;;  %5691 = vmatmul.mubr.msk.f32.gmra.mrb[174].mxu0 %vm85_vm0, %v8393_v21  ;;  %v1438_v11 = vmax.f32 %v5510_v41, 0.0 }
 0x161   :  { %v1437_v44 = vmax.f32 %v1134_v55, 0.0  ;;  %5693 = vmatprep.mubr.msk.f32.mxu0 %vm85_vm0, %v8394_v13  ;;  %6045 = vmatpush3.bf16.msra.mxu1 %v6042_v48 }
 0x163   :  { %v5513_v49 = vpop.f32.mrb[70].mxu0  ;;  %5710 = vmatprep.mubr.msk.f32.mxu1 %vm2275_vm1, %v1437_v44 }
 0x164   :  { %v1144_v20 = vpop.f32.mrb[71].mxu0  ;;  %5711 = vmatmul.mubr.msk.f32.gmra.mrb[18].mxu1 %vm2275_vm1, %v1438_v11  ;;  %5694 = vmatmul.mubr.msk.f32.gmra.mrb[176].mxu0 %vm85_vm0, %v8395_v53  ;;  %v1440_v63 = vmax.f32 %v5513_v49, 0.0 }
 0x165   :  { %v1439_v51 = vmax.f32 %v1144_v20, 0.0 }
 0x167   :  { %v5516_v9 = vpop.f32.mrb[72].mxu0  ;;  %5713 = vmatprep.mubr.msk.f32.mxu1 %vm2275_vm1, %v1439_v51 }
 0x168   :  { %v1154_v19 = vpop.f32.mrb[73].mxu0  ;;  %5714 = vmatmul.mubr.msk.f32.gmra.mrb[20].mxu1 %vm2275_vm1, %v1440_v63  ;;  %v1442_v48 = vmax.f32 %v5516_v9, 0.0 }
 0x169   :  { %v1441_v13 = vmax.f32 %v1154_v19, 0.0 }
 0x16b   :  { %v5519_v21 = vpop.f32.mrb[74].mxu0  ;;  %5716 = vmatprep.mubr.msk.f32.mxu1 %vm2275_vm1, %v1441_v13 }
 0x16c   :  { %v1164_v23 = vpop.f32.mrb[75].mxu0  ;;  %5717 = vmatmul.mubr.msk.f32.gmra.mrb[22].mxu1 %vm2275_vm1, %v1442_v48  ;;  %v1444_v22 = vmax.f32 %v5519_v21, 0.0 }
 0x16d   :  { %v1443_v10 = vmax.f32 %v1164_v23, 0.0 }
 0x16f   :  { %v5522_v41 = vpop.f32.mrb[76].mxu0  ;;  %5719 = vmatprep.mubr.msk.f32.mxu1 %vm2275_vm1, %v1443_v10 }
 0x170   :  { %v1174_v53 = vpop.f32.mrb[77].mxu0  ;;  %5720 = vmatmul.mubr.msk.f32.gmra.mrb[24].mxu1 %vm2275_vm1, %v1444_v22  ;;  %v1446_v44 = vmax.f32 %v5522_v41, 0.0 }
 0x171   :  { %v1445_v55 = vmax.f32 %v1174_v53, 0.0 }
 0x173   :  { %v5525_v11 = vpop.f32.mrb[78].mxu0  ;;  %5722 = vmatprep.mubr.msk.f32.mxu1 %vm2275_vm1, %v1445_v55 }
 0x174   :  { %v1184_v49 = vpop.f32.mrb[79].mxu0  ;;  %5723 = vmatmul.mubr.msk.f32.gmra.mrb[26].mxu1 %vm2275_vm1, %v1446_v44  ;;  %v1448_v51 = vmax.f32 %v5525_v11, 0.0 }
 0x175   :  { %v1447_v20 = vmax.f32 %v1184_v49, 0.0 }
 0x177   :  { %v5528_v63 = vpop.f32.mrb[80].mxu0  ;;  %5725 = vmatprep.mubr.msk.f32.mxu1 %vm2275_vm1, %v1447_v20 }
 0x178   :  { %v1194_v9 = vpop.f32.mrb[81].mxu0  ;;  %5726 = vmatmul.mubr.msk.f32.gmra.mrb[28].mxu1 %vm2275_vm1, %v1448_v51  ;;  %v1450_v13 = vmax.f32 %v5528_v63, 0.0 }
 0x179   :  { %v1449_v19 = vmax.f32 %v1194_v9, 0.0 }
 0x17b   :  { %v5531_v48 = vpop.f32.mrb[82].mxu0  ;;  %5728 = vmatprep.mubr.msk.f32.mxu1 %vm2275_vm1, %v1449_v19 }
 0x17c   :  { %v1204_v21 = vpop.f32.mrb[83].mxu0  ;;  %5729 = vmatmul.mubr.msk.f32.gmra.mrb[30].mxu1 %vm2275_vm1, %v1450_v13  ;;  %v1452_v10 = vmax.f32 %v5531_v48, 0.0 }
 0x17d   :  { %v1451_v23 = vmax.f32 %v1204_v21, 0.0 }
 0x17f   :  { %v5534_v22 = vpop.f32.mrb[84].mxu0  ;;  %5731 = vmatprep.mubr.msk.f32.mxu1 %vm2275_vm1, %v1451_v23 }
 0x180   :  { %v1214_v41 = vpop.f32.mrb[85].mxu0  ;;  %5732 = vmatmul.mubr.msk.f32.gmra.mrb[32].mxu1 %vm2275_vm1, %v1452_v10  ;;  %v1454_v55 = vmax.f32 %v5534_v22, 0.0 }
 0x181   :  { %v1453_v53 = vmax.f32 %v1214_v41, 0.0 }
 0x183   :  { %v5537_v44 = vpop.f32.mrb[86].mxu0  ;;  %5734 = vmatprep.mubr.msk.f32.mxu1 %vm2275_vm1, %v1453_v53 }
 0x184   :  { %v1224_v11 = vpop.f32.mrb[87].mxu0  ;;  %5735 = vmatmul.mubr.msk.f32.gmra.mrb[34].mxu1 %vm2275_vm1, %v1454_v55  ;;  %v1456_v20 = vmax.f32 %v5537_v44, 0.0 }
 0x185   :  { %v1455_v49 = vmax.f32 %v1224_v11, 0.0 }
 0x187   :  { %v5540_v51 = vpop.f32.mrb[88].mxu0  ;;  %5737 = vmatprep.mubr.msk.f32.mxu1 %vm2275_vm1, %v1455_v49 }
 0x188   :  { %v1234_v63 = vpop.f32.mrb[89].mxu0  ;;  %5738 = vmatmul.mubr.msk.f32.gmra.mrb[36].mxu1 %vm2275_vm1, %v1456_v20  ;;  %v1458_v19 = vmax.f32 %v5540_v51, 0.0 }
 0x189   :  { %v1457_v9 = vmax.f32 %v1234_v63, 0.0 }
 0x18b   :  { %v5543_v13 = vpop.f32.mrb[90].mxu0  ;;  %5740 = vmatprep.mubr.msk.f32.mxu1 %vm2275_vm1, %v1457_v9  ;;  %v3430_v9 = vld [vmem:[%s8303_s3 + $0x40] sm:$0xff] }
 0x18c   :  { %v1244_v48 = vpop.f32.mrb[91].mxu0  ;;  %5741 = vmatmul.mubr.msk.f32.gmra.mrb[38].mxu1 %vm2275_vm1, %v1458_v19  ;;  %v1460_v23 = vmax.f32 %v5543_v13, 0.0  ;;  %v3431_v19 = vld [vmem:[%s8303_s3 + $0x48] sm:$0xff] }
 0x18d   :  { %v1459_v21 = vmax.f32 %v1244_v48, 0.0  ;;  %v7425_v48 = vpack.c.bf16 %v3431_v19, %v3430_v9 }
 0x18f   :  { %v5546_v10 = vpop.f32.mrb[92].mxu0  ;;  %5743 = vmatprep.mubr.msk.f32.mxu1 %vm2275_vm1, %v1459_v21  ;;  %6047 = vmatprep.subr.bf16.mxu1 %v7425_v48 }
 0x190   :  { %v1254_v22 = vpop.f32.mrb[93].mxu0  ;;  %5744 = vmatmul.mubr.msk.f32.gmra.mrb[40].mxu1 %vm2275_vm1, %v1460_v23  ;;  %v1462_v53 = vmax.f32 %v5546_v10, 0.0 }
 0x191   :  { %v1461_v41 = vmax.f32 %v1254_v22, 0.0 }
 0x193   :  { %v5549_v55 = vpop.f32.mrb[94].mxu0  ;;  %5746 = vmatprep.mubr.msk.f32.mxu1 %vm2275_vm1, %v1461_v41 }
 0x194   :  { %v1264_v44 = vpop.f32.mrb[95].mxu0  ;;  %5747 = vmatmul.mubr.msk.f32.gmra.mrb[42].mxu1 %vm2275_vm1, %v1462_v53  ;;  %v1464_v49 = vmax.f32 %v5549_v55, 0.0 }
 0x195   :  { %v1463_v11 = vmax.f32 %v1264_v44, 0.0 }
 0x197   :  { %v5552_v20 = vpop.f32.mrb[96].mxu0  ;;  %5749 = vmatprep.mubr.msk.f32.mxu1 %vm2275_vm1, %v1463_v11 }
 0x198   :  { %v1274_v51 = vpop.f32.mrb[97].mxu0  ;;  %5750 = vmatmul.mubr.msk.f32.gmra.mrb[44].mxu1 %vm2275_vm1, %v1464_v49  ;;  %v1466_v13 = vmax.f32 %v5552_v20, 0.0 }
 0x199   :  { %v1465_v63 = vmax.f32 %v1274_v51, 0.0 }
 0x19b   :  { %v5555_v21 = vpop.f32.mrb[98].mxu0  ;;  %5752 = vmatprep.mubr.msk.f32.mxu1 %vm2275_vm1, %v1465_v63 }
 0x19c   :  { %v1284_v23 = vpop.f32.mrb[99].mxu0  ;;  %5753 = vmatmul.mubr.msk.f32.gmra.mrb[46].mxu1 %vm2275_vm1, %v1466_v13  ;;  %v1468_v22 = vmax.f32 %v5555_v21, 0.0 }
 0x19d   :  { %v1467_v10 = vmax.f32 %v1284_v23, 0.0 }
 0x19f   :  { %v5558_v41 = vpop.f32.mrb[100].mxu0  ;;  %5755 = vmatprep.mubr.msk.f32.mxu1 %vm2275_vm1, %v1467_v10 }
 0x1a0   :  { %v1294_v53 = vpop.f32.mrb[101].mxu0  ;;  %5756 = vmatmul.mubr.msk.f32.gmra.mrb[48].mxu1 %vm2275_vm1, %v1468_v22  ;;  %v1470_v44 = vmax.f32 %v5558_v41, 0.0 }
 0x1a1   :  { %v1469_v55 = vmax.f32 %v1294_v53, 0.0 }
 0x1a3   :  { %v5561_v11 = vpop.f32.mrb[102].mxu0  ;;  %5758 = vmatprep.mubr.msk.f32.mxu1 %vm2275_vm1, %v1469_v55 }
 0x1a4   :  { %v1304_v49 = vpop.f32.mrb[103].mxu0  ;;  %5759 = vmatmul.mubr.msk.f32.gmra.mrb[50].mxu1 %vm2275_vm1, %v1470_v44  ;;  %v1472_v51 = vmax.f32 %v5561_v11, 0.0  ;;  %v7440_v44 = vpop.permute.xlu1 %852 }
 0x1a5   :  { %v1471_v20 = vmax.f32 %v1304_v49, 0.0 }
 0x1a7   :  { %v5564_v63 = vpop.f32.mrb[104].mxu0  ;;  %5761 = vmatprep.mubr.msk.f32.mxu1 %vm2275_vm1, %v1471_v20 }
 0x1a8   :  { %v1314_v9 = vpop.f32.mrb[105].mxu0  ;;  %5762 = vmatmul.mubr.msk.f32.gmra.mrb[52].mxu1 %vm2275_vm1, %v1472_v51  ;;  %v1474_v13 = vmax.f32 %v5564_v63, 0.0  ;;  %v7444_v51 = vpop.permute.xlu0 %848 }
 0x1a9   :  { %v1473_v19 = vmax.f32 %v1314_v9, 0.0 }
 0x1ab   :  { %v5567_v21 = vpop.f32.mrb[106].mxu0  ;;  %5764 = vmatprep.mubr.msk.f32.mxu1 %vm2275_vm1, %v1473_v19 }
 0x1ac   :  { %v1324_v23 = vpop.f32.mrb[107].mxu0  ;;  %5765 = vmatmul.mubr.msk.f32.gmra.mrb[54].mxu1 %vm2275_vm1, %v1474_v13  ;;  %v1476_v22 = vmax.f32 %v5567_v21, 0.0  ;;  %v7447_v13 = vpop.permute.xlu1 %860 }
 0x1ad   :  { %v1475_v10 = vmax.f32 %v1324_v23, 0.0 }
 0x1af   :  { %v5570_v41 = vpop.f32.mrb[108].mxu0  ;;  %5767 = vmatprep.mubr.msk.f32.mxu1 %vm2275_vm1, %v1475_v10  ;;  %v1483_v10 = vmax.f32 %v7246_v57, 0.0 }
 0x1b0   :  { %v1334_v53 = vpop.f32.mrb[109].mxu0  ;;  %5768 = vmatmul.mubr.msk.f32.gmra.mrb[56].mxu1 %vm2275_vm1, %v1476_v22  ;;  %v1478_v11 = vmax.f32 %v5570_v41, 0.0  ;;  %v7451_v41 = vpop.permute.xlu0 %856 }
 0x1b1   :  { %v1477_v55 = vmax.f32 %v1334_v53, 0.0 }
 0x1b3   :  { %v5573_v49 = vpop.f32.mrb[110].mxu0  ;;  %5770 = vmatprep.mubr.msk.f32.mxu1 %vm2275_vm1, %v1477_v55 }
 0x1b4   :  { %v1344_v20 = vpop.f32.mrb[111].mxu0  ;;  %5771 = vmatmul.mubr.msk.f32.gmra.mrb[58].mxu1 %vm2275_vm1, %v1478_v11  ;;  %v1480_v9 = vmax.f32 %v5573_v49, 0.0  ;;  %v1485_v11 = vmax.f32 %v7260_v59, 0.0  ;;  %v7461_v49 = vpop.permute.xlu1 %868 }
 0x1b5   :  { %v1479_v63 = vmax.f32 %v1344_v20, 0.0  ;;  %v1484_v20 = vmax.f32 %v7242_v56, 0.0 }
 0x1b7   :  { %v5576_v19 = vpop.f32.mrb[112].mxu0  ;;  %5773 = vmatprep.mubr.msk.f32.mxu1 %vm2275_vm1, %v1479_v63 }
 0x1b8   :  { %v1354_v21 = vpop.f32.mrb[113].mxu0  ;;  %5774 = vmatmul.mubr.msk.f32.gmra.mrb[60].mxu1 %vm2275_vm1, %v1480_v9  ;;  %v1482_v22 = vmax.f32 %v5576_v19, 0.0  ;;  %v7469_v9 = vpop.permute.xlu0 %864  ;;  %v1487_v19 = vmax.f32 %v7278_v61, 0.0  ;;  %v1491_v61 = vmax.f32 %v7310_v3, 0.0 }
 0x1b9   :  { %v1481_v23 = vmax.f32 %v1354_v21, 0.0  ;;  %v1486_v21 = vmax.f32 %v7256_v58, 0.0  ;;  %v7476_v59 = vpop.permute.xlu1 %876 }
 0x1bb   :  { %5776 = vmatprep.mubr.msk.f32.mxu1 %vm2275_vm1, %v1481_v23  ;;  %v7454_v53 = vpop.f32.mrb[114].mxu0 }
 0x1bc   :  { %5777 = vmatmul.mubr.msk.f32.gmra.mrb[62].mxu1 %vm2275_vm1, %v1482_v22  ;;  %v7457_v55 = vpop.f32.mrb[115].mxu0  ;;  %v1488_v22 = vmax.f32 %v7272_v60, 0.0 }
 0x1bd   :  { %5779 = vmatprep.mubr.msk.f32.mxu1 %vm2275_vm1, %v1483_v10  ;;  %v1489_v10 = vmax.f32 %v7292_v54, 0.0 }
 0x1bf   :  { %v7464_v57 = vpop.f32.mrb[116].mxu0 }
 0x1c0   :  { %5780 = vmatmul.mubr.msk.f32.gmra.mrb[64].mxu1 %vm2275_vm1, %v1484_v20  ;;  %v7467_v63 = vpop.f32.mrb[117].mxu0  ;;  %v7484_v20 = vpop.permute.xlu0 %872 }
 0x1c1   :  { %5782 = vmatprep.mubr.msk.f32.mxu1 %vm2275_vm1, %v1485_v11 }
 0x1c3   :  { %v7474_v23 = vpop.f32.mrb[118].mxu0 }
 0x1c4   :  { %8396 = vst [vmem:[#allocation5_spill] sm:$0xff] %v7474_v23  ;;  %5783 = vmatmul.mubr.msk.f32.gmra.mrb[66].mxu1 %vm2275_vm1, %v1486_v21  ;;  %v7479_v56 = vpop.f32.mrb[119].mxu0  ;;  %v7493_v21 = vpop.permute.xlu1 %884 }
 0x1c5   :  { %8397 = vst [vmem:[#allocation6_spill] sm:$0xff] %v7479_v56  ;;  %5785 = vmatprep.mubr.msk.f32.mxu1 %vm2275_vm1, %v1487_v19  ;;  %v1490_v19 = vmax.f32 %v7288_v62, 0.0  ;;  %v7501_v60 = vpop.permute.xlu0 %880 }
 0x1c7   :  { %v7486_v11 = vpop.f32.mrb[120].mxu0 }
 0x1c8   :  { %8398 = vst [vmem:[#allocation7_spill] sm:$0xff] %v7486_v11  ;;  %5786 = vmatmul.mubr.msk.f32.gmra.mrb[68].mxu1 %vm2275_vm1, %v1488_v22  ;;  %v7489_v58 = vpop.f32.mrb[121].mxu0  ;;  %v1493_v22 = vmax.f32 %v7326_v14, 0.0  ;;  %v7508_v3 = vpop.permute.xlu1 %892 }
 0x1c9   :  { %8399 = vst [vmem:[#allocation8_spill] sm:$0xff] %v7489_v58  ;;  %5788 = vmatprep.mubr.msk.f32.mxu1 %vm2275_vm1, %v1489_v10  ;;  %v1492_v10 = vmax.f32 %v7306_v0, 0.0 }
 0x1cb   :  { %v7496_v23 = vpop.f32.mrb[122].mxu0 }
 0x1cc   :  { %8400 = vst [vmem:[#allocation67_spill] sm:$0xff] %v7496_v23  ;;  %5789 = vmatmul.mubr.msk.f32.gmra.mrb[70].mxu1 %vm2275_vm1, %v1490_v19  ;;  %v7499_v54 = vpop.f32.mrb[123].mxu0  ;;  %v1495_v19 = vmax.f32 %v7342_v17, 0.0  ;;  %v1494_v23 = vmax.f32 %v7320_v43, 0.0  ;;  %v1496_v17 = vmax.f32 %v7338_v15, 0.0 }
 0x1cd   :  { %8401 = vst [vmem:[#allocation68_spill] sm:$0xff] %v7499_v54  ;;  %5791 = vmatprep.mubr.msk.f32.mxu1 %vm2275_vm1, %v1491_v61  ;;  %v663_v61 = vmax.f32 %v6951_v39, 0.0  ;;  %v7517_v54 = vpop.permute.xlu0 %888  ;;  %v665_v39 = vmax.f32 %v6959_v33, 0.0 }
 0x1cf   :  { %v7506_v11 = vpop.f32.mrb[124].mxu0  ;;  %v983_v43 = vmul.f32 %v7059_v18, %v663_v61  ;;  %v8407_v18 = vld [vmem:[#allocation9_spill] sm:$0xff] }
 0x1d0   :  { %8402 = vst [vmem:[#allocation69_spill] sm:$0xff] %v7506_v11  ;;  %5792 = vmatmul.mubr.msk.f32.gmra.mrb[72].mxu1 %vm2275_vm1, %v1492_v10  ;;  %v7511_v62 = vpop.f32.mrb[125].mxu0  ;;  %v664_v10 = vmax.f32 %v6949_v27, 0.0  ;;  %v7526_v11 = vpop.permute.xlu1 %900  ;;  %v666_v15 = vmax.f32 %v8407_v18, 0.0 }
 0x1d1   :  { %8403 = vst [vmem:[#allocation70_spill] sm:$0xff] %v7511_v62  ;;  %5794 = vmatprep.mubr.msk.f32.mxu1 %vm2275_vm1, %v1493_v22 }
 0x1d2   :  { %v984_v33 = vmul.f32 %v7079_v24, %v664_v10  ;;  %v986_v24 = vmul.f32 %v7083_v26, %v666_v15  ;;  %v8409_v10 = vld [vmem:[#allocation10_spill] sm:$0xff] }
 0x1d3   :  { %v7519_v14 = vpop.f32.mrb[126].mxu0 }
 0x1d4   :  { %8404 = vst [vmem:[#allocation71_spill] sm:$0xff] %v7519_v14  ;;  %5795 = vmatmul.mubr.msk.f32.gmra.mrb[74].mxu1 %vm2275_vm1, %v1494_v23  ;;  %v7522_v0 = vpop.f32.mrb[127].mxu0  ;;  %v3432_v23 = vld [vmem:[%s8303_s3 + $0x50] sm:$0xff]  ;;  %v7542_v14 = vpop.permute.xlu0 %896 }
 0x1d5   :  { %8405 = vst [vmem:[#allocation72_spill] sm:$0xff] %v7522_v0  ;;  %5797 = vmatprep.mubr.msk.f32.mxu1 %vm2275_vm1, %v1495_v19  ;;  %v3433_v19 = vld [vmem:[%s8303_s3 + $0x58] sm:$0xff]  ;;  %v8408_v0 = vld [vmem:[#allocation11_spill] sm:$0xff]  ;;  %v7551_v56 = vpop.permute.xlu1 %908 }
 0x1d6   :  { %v6050_v61 = vpack.c.bf16 %v3433_v19, %v3432_v23  ;;  %v667_v62 = vmax.f32 %v8408_v0, 0.0  ;;  %v669_v0 = vmax.f32 %v6979_v31, 0.0  ;;  %v671_v31 = vmax.f32 %v6989_v29, 0.0 }
 0x1d7   :  { %v7531_v22 = vpop.f32.mrb[128].mxu0 }
 0x1d8   :  { %8406 = vst [vmem:[#allocation73_spill] sm:$0xff] %v7531_v22  ;;  %5798 = vmatmul.mubr.msk.f32.gmra.mrb[76].mxu1 %vm2275_vm1, %v1496_v17  ;;  %v7540_v27 = vpop.f32.mrb[129].mxu0  ;;  %v985_v22 = vmul.f32 %v7065_v12, %v665_v39  ;;  %v987_v12 = vmul.f32 %v7095_v28, %v667_v62  ;;  %v7562_v39 = vpop.permute.xlu0 %904  ;;  %v989_v28 = vmul.f32 %v7115_v30, %v669_v0  ;;  %v673_v30 = vmax.f32 %v6999_v1, 0.0 }
 0x1d9   :  { %5808 = vmatprep.mubr.msk.f32.mxu1 %vm2275_vm1, %v983_v43  ;;  %v668_v43 = vmax.f32 %v8409_v10, 0.0 }
 0x1db   :  { %v7549_v58 = vpop.f32.mrb[130].mxu0  ;;  %v988_v26 = vmul.f32 %v7103_v16, %v668_v43 }
 0x1dc   :  { %5809 = vmatmul.mubr.msk.f32.vlgmr.msra.gmra.mrb[14].mxu1 %vm2275_vm1, %v984_v33  ;;  %v7554_v17 = vpop.f32.mrb[131].mxu0  ;;  %v7572_v33 = vpop.permute.xlu1 %916 }
 0x1dd   :  { %5811 = vmatprep.mubr.msk.f32.mxu1 %vm2275_vm1, %v985_v22  ;;  %6049 = vmatpush3.bf16.msra.mxu1 %v7425_v48  ;;  %v8410_v48 = vld [vmem:[#allocation12_spill] sm:$0xff]  ;;  %v7581_v15 = vpop.permute.xlu0 %912 }
 0x1de   :  { %6051 = vmatprep.subr.bf16.mxu1 %v6050_v61  ;;  %v670_v22 = vmax.f32 %v8410_v48, 0.0 }
 0x1df   :  { %v7564_v23 = vpop.f32.mrb[132].mxu0 }
 0x1e0   :  { %5812 = vmatmul.mubr.msk.f32.gmra.mrb[16].mxu1 %vm2275_vm1, %v986_v24  ;;  %v7567_v19 = vpop.f32.mrb[133].mxu0  ;;  %v990_v16 = vmul.f32 %v7121_v36, %v670_v22  ;;  %v991_v24 = vmul.f32 %v7133_v40, %v671_v31  ;;  %v7590_v29 = vpop.permute.xlu1 %924  ;;  %v674_v36 = vmax.f32 %v6997_v37, 0.0  ;;  %v675_v40 = vmax.f32 %v7009_v4, 0.0 }
 0x1e1   :  { %5814 = vmatprep.mubr.msk.f32.mxu1 %vm2275_vm1, %v987_v12  ;;  %6053 = vmatpush3.bf16.msra.mxu1 %v6050_v61  ;;  %v672_v61 = vmax.f32 %v6987_v35, 0.0  ;;  %v993_v35 = vmul.f32 %v7162_v32, %v673_v30  ;;  %v7600_v0 = vpop.permute.xlu0 %920  ;;  %v677_v4 = vmax.f32 %v7019_v6, 0.0 }
 0x1e2   :  { %v994_v48 = vmul.f32 %v7168_v45, %v674_v36  ;;  %v995_v37 = vmul.f32 %v7180_v46, %v675_v40  ;;  %v679_v46 = vmax.f32 %v7029_v8, 0.0  ;;  %v8417_v40 = vld [vmem:[#allocation43_spill] sm:$0xff] }
 0x1e3   :  { %v7576_v62 = vpop.f32.mrb[134].mxu0  ;;  %v992_v12 = vmul.f32 %v7147_v38, %v672_v61  ;;  %v676_v38 = vmax.f32 %v7007_v2, 0.0  ;;  %v678_v2 = vmax.f32 %v7017_v5, 0.0 }
 0x1e4   :  { %5815 = vmatmul.mubr.msk.f32.gmra.mrb[18].mxu1 %vm2275_vm1, %v988_v26  ;;  %v7579_v18 = vpop.f32.mrb[135].mxu0  ;;  %v7610_v22 = vpop.permute.xlu1 %932  ;;  %v999_v5 = vmul.f32 %v7218_v52, %v679_v46 }
 0x1e5   :  { %5817 = vmatprep.mubr.msk.f32.mxu1 %vm2275_vm1, %v989_v28  ;;  %v7619_v31 = vpop.permute.xlu0 %928  ;;  %v996_v45 = vmul.f32 %v7188_v42, %v676_v38  ;;  %v998_v30 = vmul.f32 %v7206_v50, %v678_v2  ;;  %v680_v42 = vmax.f32 %v7027_v7, 0.0  ;;  %v8418_v38 = vld [vmem:[#allocation13_spill] sm:$0xff]  ;;  %v8419_v7 = vld [vmem:[#allocation46_spill] sm:$0xff] }
 0x1e6   :  { %v682_v50 = vmax.f32 %v8418_v38, 0.0 }
 0x1e7   :  { %v7588_v10 = vpop.f32.mrb[136].mxu0 }
 0x1e8   :  { %5818 = vmatmul.mubr.msk.f32.gmra.mrb[20].mxu1 %vm2275_vm1, %v990_v16  ;;  %v7593_v43 = vpop.f32.mrb[137].mxu0  ;;  %v997_v16 = vmul.f32 %v7200_v47, %v677_v4  ;;  %v7628_v6 = vpop.permute.xlu1 %940  ;;  %v8420_v4 = vld [vmem:[#allocation16_spill] sm:$0xff] }
 0x1e9   :  { %5820 = vmatprep.mubr.msk.f32.mxu1 %vm2275_vm1, %v991_v24  ;;  %v7638_v36 = vpop.permute.xlu0 %936 }
 0x1eb   :  { %v7602_v1 = vpop.f32.mrb[138].mxu0 }
 0x1ec   :  { %5821 = vmatmul.mubr.msk.f32.gmra.mrb[22].mxu1 %vm2275_vm1, %v992_v12  ;;  %v7605_v26 = vpop.f32.mrb[139].mxu0  ;;  %v8414_v12 = vld [vmem:[#allocation14_spill] sm:$0xff] }
 0x1ed   :  { %5823 = vmatprep.mubr.msk.f32.mxu1 %vm2275_vm1, %v993_v35  ;;  %v681_v47 = vmax.f32 %v8414_v12, 0.0  ;;  %v7657_v46 = vpop.permute.xlu0 %944 }
 0x1ef   :  { %v7614_v32 = vpop.f32.mrb[140].mxu0  ;;  %v1001_v52 = vmul.f32 %v8419_v7, %v681_v47 }
 0x1f0   :  { %8411 = vst [vmem:[#allocation9_spill] sm:$0xff] %v7614_v32  ;;  %5824 = vmatmul.mubr.msk.f32.gmra.mrb[24].mxu1 %vm2275_vm1, %v994_v48  ;;  %v7617_v28 = vpop.f32.mrb[141].mxu0  ;;  %v1000_v48 = vmul.f32 %v8417_v40, %v680_v42  ;;  %v8425_v40 = vld [vmem:[#allocation50_spill] sm:$0xff]  ;;  %v8444_v32 = vld [vmem:[#allocation24_spill] sm:$0xff] }
 0x1f1   :  { %5826 = vmatprep.mubr.msk.f32.mxu1 %vm2275_vm1, %v995_v37  ;;  %v7648_v37 = vpop.permute.xlu1 %948 }
 0x1f3   :  { %v7626_v61 = vpop.f32.mrb[142].mxu0 }
 0x1f4   :  { %8412 = vst [vmem:[#allocation11_spill] sm:$0xff] %v7626_v61  ;;  %5827 = vmatmul.mubr.msk.f32.gmra.mrb[26].mxu1 %vm2275_vm1, %v996_v45  ;;  %v7631_v24 = vpop.f32.mrb[143].mxu0  ;;  %v683_v45 = vmax.f32 %v8420_v4, 0.0 }
 0x1f5   :  { %8413 = vst [vmem:[#allocation10_spill] sm:$0xff] %v7631_v24  ;;  %5829 = vmatprep.mubr.msk.f32.mxu1 %vm2275_vm1, %v997_v16  ;;  %v7666_v4 = vpop.permute.xlu1 %956 }
 0x1f6   :  { %v1003_v38 = vmul.f32 %v8425_v40, %v683_v45  ;;  %v7676_v40 = vpop.permute.xlu0 %952 }
 0x1f7   :  { %v7640_v8 = vpop.f32.mrb[144].mxu0 }
 0x1f8   :  { %8415 = vst [vmem:[#allocation12_spill] sm:$0xff] %v7640_v8  ;;  %5830 = vmatmul.mubr.msk.f32.gmra.mrb[28].mxu1 %vm2275_vm1, %v998_v30  ;;  %v7643_v35 = vpop.f32.mrb[145].mxu0  ;;  %v8423_v30 = vld [vmem:[#allocation47_spill] sm:$0xff]  ;;  %v8426_v8 = vld [vmem:[#allocation18_spill] sm:$0xff] }
 0x1f9   :  { %8416 = vst [vmem:[#allocation14_spill] sm:$0xff] %v7643_v35  ;;  %5832 = vmatprep.mubr.msk.f32.mxu1 %vm2275_vm1, %v999_v5  ;;  %v1002_v42 = vmul.f32 %v8423_v30, %v682_v50  ;;  %v8424_v5 = vld [vmem:[#allocation15_spill] sm:$0xff]  ;;  %v685_v47 = vmax.f32 %v8426_v8, 0.0  ;;  %v8431_v30 = vld [vmem:[#allocation56_spill] sm:$0xff] }
 0x1fa   :  { %v684_v12 = vmax.f32 %v8424_v5, 0.0  ;;  %v8432_v35 = vld [vmem:[#allocation20_spill] sm:$0xff] }
 0x1fb   :  { %v7652_v2 = vpop.f32.mrb[146].mxu0  ;;  %v1005_v5 = vmul.f32 %v8431_v30, %v685_v47  ;;  %v687_v45 = vmax.f32 %v8432_v35, 0.0  ;;  %v8438_v30 = vld [vmem:[#allocation22_spill] sm:$0xff] }
 0x1fc   :  { %8421 = vst [vmem:[#allocation43_spill] sm:$0xff] %v7652_v2  ;;  %5833 = vmatmul.mubr.msk.f32.gmra.mrb[30].mxu1 %vm2275_vm1, %v1000_v48  ;;  %v7655_v16 = vpop.f32.mrb[147].mxu0  ;;  %v8429_v2 = vld [vmem:[#allocation53_spill] sm:$0xff]  ;;  %v689_v35 = vmax.f32 %v8438_v30, 0.0 }
 0x1fd   :  { %8422 = vst [vmem:[#allocation13_spill] sm:$0xff] %v7655_v16  ;;  %5835 = vmatprep.mubr.msk.f32.mxu1 %vm2275_vm1, %v1001_v52  ;;  %v1004_v52 = vmul.f32 %v8429_v2, %v684_v12  ;;  %v8430_v16 = vld [vmem:[#allocation17_spill] sm:$0xff]  ;;  %v7686_v12 = vpop.permute.xlu1 %964 }
 0x1fe   :  { %v686_v50 = vmax.f32 %v8430_v16, 0.0  ;;  %v8437_v16 = vld [vmem:[#allocation62_spill] sm:$0xff] }
 0x1ff   :  { %v7664_v7 = vpop.f32.mrb[148].mxu0  ;;  %v1007_v47 = vmul.f32 %v8437_v16, %v687_v45  ;;  %v691_v45 = vmax.f32 %v8444_v32, 0.0 }
 0x200   :  { %8427 = vst [vmem:[#allocation46_spill] sm:$0xff] %v7664_v7  ;;  %5836 = vmatmul.mubr.msk.f32.gmra.mrb[32].mxu1 %vm2275_vm1, %v1002_v42  ;;  %v7669_v48 = vpop.f32.mrb[149].mxu0  ;;  %v8435_v42 = vld [vmem:[#allocation57_spill] sm:$0xff] }
 0x201   :  { %8428 = vst [vmem:[#allocation16_spill] sm:$0xff] %v7669_v48  ;;  %5838 = vmatprep.mubr.msk.f32.mxu1 %vm2275_vm1, %v1003_v38  ;;  %v1006_v38 = vmul.f32 %v8435_v42, %v686_v50  ;;  %v8436_v48 = vld [vmem:[#allocation19_spill] sm:$0xff]  ;;  %v8442_v42 = vld [vmem:[#allocation21_spill] sm:$0xff]  ;;  %v7704_v30 = vpop.permute.xlu1 %972 }
 0x202   :  { %v688_v2 = vmax.f32 %v8436_v48, 0.0  ;;  %v690_v48 = vmax.f32 %v8442_v42, 0.0  ;;  %v8448_v42 = vld [vmem:[#allocation26_spill] sm:$0xff] }
 0x203   :  { %v7678_v8 = vpop.f32.mrb[150].mxu0 }
 0x204   :  { %8433 = vst [vmem:[#allocation47_spill] sm:$0xff] %v7678_v8  ;;  %5839 = vmatmul.mubr.msk.f32.gmra.mrb[34].mxu1 %vm2275_vm1, %v1004_v52  ;;  %v7681_v7 = vpop.f32.mrb[151].mxu0  ;;  %v7695_v52 = vpop.permute.xlu0 %960 }
 0x205   :  { %8434 = vst [vmem:[#allocation15_spill] sm:$0xff] %v7681_v7  ;;  %5841 = vmatprep.mubr.msk.f32.mxu1 %vm2275_vm1, %v1005_v5  ;;  %v8441_v5 = vld [vmem:[#allocation63_spill] sm:$0xff] }
 0x206   :  { %v1008_v50 = vmul.f32 %v8441_v5, %v688_v2  ;;  %v8443_v7 = vld [vmem:[#allocation3_spill] sm:$0xff]  ;;  %v1011_v5 = vmul.f32 %v7372_v34, %v691_v45 }
 0x207   :  { %v7690_v61 = vpop.f32.mrb[152].mxu0  ;;  %v1009_v24 = vmul.f32 %v8443_v7, %v689_v35  ;;  %v693_v7 = vmax.f32 %v8448_v42, 0.0 }
 0x208   :  { %8439 = vst [vmem:[#allocation50_spill] sm:$0xff] %v7690_v61  ;;  %5842 = vmatmul.mubr.msk.f32.gmra.mrb[36].mxu1 %vm2275_vm1, %v1006_v38  ;;  %v7693_v8 = vpop.f32.mrb[153].mxu0  ;;  %v8446_v61 = vld [vmem:[#allocation65_spill] sm:$0xff]  ;;  %v7714_v35 = vpop.permute.xlu0 %968 }
 0x209   :  { %8440 = vst [vmem:[#allocation18_spill] sm:$0xff] %v7693_v8  ;;  %5844 = vmatprep.mubr.msk.f32.mxu1 %vm2275_vm1, %v1007_v47  ;;  %v1010_v47 = vmul.f32 %v8446_v61, %v690_v48  ;;  %v8447_v8 = vld [vmem:[#allocation23_spill] sm:$0xff]  ;;  %v7724_v48 = vpop.permute.xlu1 %980  ;;  %v1013_v34 = vmul.f32 %v7444_v51, %v693_v7  ;;  %v8456_v7 = vld [vmem:[#allocation30_spill] sm:$0xff] }
 0x20a   :  { %v692_v2 = vmax.f32 %v8447_v8, 0.0  ;;  %v8452_v8 = vld [vmem:[#allocation28_spill] sm:$0xff] }
 0x20b   :  { %v7702_v16 = vpop.f32.mrb[154].mxu0  ;;  %v695_v45 = vmax.f32 %v8452_v8, 0.0  ;;  %v697_v8 = vmax.f32 %v8456_v7, 0.0 }
 0x20c   :  { %8445 = vst [vmem:[#allocation53_spill] sm:$0xff] %v7702_v16  ;;  %5845 = vmatmul.mubr.msk.f32.gmra.mrb[38].mxu1 %vm2275_vm1, %v1008_v50  ;;  %v7707_v38 = vpop.f32.mrb[155].mxu0  ;;  %v8451_v50 = vld [vmem:[#allocation25_spill] sm:$0xff] }
 0x20d   :  { %5847 = vmatprep.mubr.msk.f32.mxu1 %vm2275_vm1, %v1009_v24  ;;  %v1012_v24 = vmul.f32 %v7370_v25, %v692_v2  ;;  %v694_v61 = vmax.f32 %v8451_v50, 0.0  ;;  %v8455_v2 = vld [vmem:[#allocation27_spill] sm:$0xff]  ;;  %v7738_v50 = vpop.permute.xlu1 %1952  ;;  %v1015_v51 = vmul.f32 %v7451_v41, %v695_v45 }
 0x20f   :  { %v7716_v32 = vpop.f32.mrb[156].mxu0  ;;  %v1014_v25 = vmul.f32 %v7440_v44, %v694_v61  ;;  %v8458_v61 = vld [vmem:[#allocation29_spill] sm:$0xff] }
 0x210   :  { %8449 = vst [vmem:[#allocation17_spill] sm:$0xff] %v7716_v32  ;;  %5848 = vmatmul.mubr.msk.f32.gmra.mrb[40].mxu1 %vm2275_vm1, %v1010_v47  ;;  %v7719_v16 = vpop.f32.mrb[157].mxu0  ;;  %v7733_v47 = vpop.permute.xlu0 %976 }
 0x211   :  { %8450 = vst [vmem:[#allocation56_spill] sm:$0xff] %v7719_v16  ;;  %5850 = vmatprep.mubr.msk.f32.mxu1 %vm2275_vm1, %v1011_v5  ;;  %v696_v5 = vmax.f32 %v8455_v2, 0.0  ;;  %v1017_v2 = vmul.f32 %v7469_v9, %v697_v8  ;;  %v7756_v7 = vpop.permute.xlu1 %1956 }
 0x213   :  { %v7728_v42 = vpop.f32.mrb[158].mxu0  ;;  %v1016_v44 = vmul.f32 %v7447_v13, %v696_v5 }
 0x214   :  { %8453 = vst [vmem:[#allocation20_spill] sm:$0xff] %v7728_v42  ;;  %5851 = vmatmul.mubr.msk.f32.gmra.mrb[42].mxu1 %vm2275_vm1, %v1012_v24  ;;  %v7731_v32 = vpop.f32.mrb[159].mxu0  ;;  %v7747_v42 = vpop.permute.xlu0 %1948 }
 0x215   :  { %8454 = vst [vmem:[#allocation57_spill] sm:$0xff] %v7731_v32  ;;  %5853 = vmatprep.mubr.msk.f32.mxu1 %vm2275_vm1, %v1013_v34  ;;  %v698_v34 = vmax.f32 %v8458_v61, 0.0  ;;  %v8459_v32 = vld [vmem:[#allocation32_spill] sm:$0xff]  ;;  %v8462_v61 = vld [vmem:[#allocation34_spill] sm:$0xff] }
 0x216   :  { %v699_v41 = vmax.f32 %v8459_v32, 0.0  ;;  %v701_v9 = vmax.f32 %v8462_v61, 0.0 }
 0x217   :  { %v7742_v16 = vpop.f32.mrb[160].mxu0 }
 0x218   :  { %8457 = vst [vmem:[#allocation19_spill] sm:$0xff] %v7742_v16  ;;  %5854 = vmatmul.mubr.msk.f32.gmra.mrb[44].mxu1 %vm2275_vm1, %v1014_v25  ;;  %v7745_v24 = vpop.f32.mrb[161].mxu0  ;;  %v8461_v16 = vld [vmem:[#allocation31_spill] sm:$0xff]  ;;  %v1019_v5 = vmul.f32 %v7484_v20, %v699_v41  ;;  %v7766_v8 = vpop.permute.xlu0 %1960  ;;  %v1021_v20 = vmul.f32 %v7501_v60, %v701_v9 }
 0x219   :  { %5856 = vmatprep.mubr.msk.f32.mxu1 %vm2275_vm1, %v1015_v51  ;;  %v1018_v51 = vmul.f32 %v7461_v49, %v698_v34  ;;  %v700_v13 = vmax.f32 %v8461_v16, 0.0  ;;  %v7776_v34 = vpop.permute.xlu1 %1964  ;;  %v8466_v16 = vld [vmem:[#allocation36_spill] sm:$0xff] }
 0x21a   :  { %v703_v41 = vmax.f32 %v8466_v16, 0.0 }
 0x21b   :  { %v7754_v45 = vpop.f32.mrb[162].mxu0 }
 0x21c   :  { %8460 = vst [vmem:[#allocation62_spill] sm:$0xff] %v7754_v45  ;;  %5857 = vmatmul.mubr.msk.f32.gmra.mrb[46].mxu1 %vm2275_vm1, %v1016_v44  ;;  %v7759_v25 = vpop.f32.mrb[163].mxu0  ;;  %v1020_v44 = vmul.f32 %v7476_v59, %v700_v13  ;;  %v8468_v13 = vld [vmem:[#allocation35_spill] sm:$0xff] }
 0x21d   :  { %5859 = vmatprep.mubr.msk.f32.mxu1 %vm2275_vm1, %v1017_v2  ;;  %v8465_v2 = vld [vmem:[#allocation33_spill] sm:$0xff]  ;;  %v7794_v16 = vpop.permute.xlu1 %1972 }
 0x21e   :  { %v702_v49 = vmax.f32 %v8465_v2, 0.0  ;;  %v1023_v2 = vmul.f32 %v7517_v54, %v703_v41 }
 0x21f   :  { %v7768_v32 = vpop.f32.mrb[164].mxu0 }
 0x220   :  { %8463 = vst [vmem:[#allocation22_spill] sm:$0xff] %v7768_v32  ;;  %5860 = vmatmul.mubr.msk.f32.gmra.mrb[48].mxu1 %vm2275_vm1, %v1018_v51  ;;  %v7771_v45 = vpop.f32.mrb[165].mxu0  ;;  %v7785_v51 = vpop.permute.xlu0 %1968  ;;  %v1022_v59 = vmul.f32 %v7493_v21, %v702_v49 }
 0x221   :  { %8464 = vst [vmem:[#allocation63_spill] sm:$0xff] %v7771_v45  ;;  %5862 = vmatprep.mubr.msk.f32.mxu1 %vm2275_vm1, %v1019_v5  ;;  %v704_v5 = vmax.f32 %v8468_v13, 0.0  ;;  %v8469_v45 = vld [vmem:[#allocation38_spill] sm:$0xff]  ;;  %v8472_v13 = vld [vmem:[#allocation40_spill] sm:$0xff] }
 0x222   :  { %v705_v60 = vmax.f32 %v8469_v45, 0.0  ;;  %v707_v54 = vmax.f32 %v8472_v13, 0.0 }
 0x223   :  { %v7780_v61 = vpop.f32.mrb[166].mxu0 }
 0x224   :  { %8467 = vst [vmem:[#allocation21_spill] sm:$0xff] %v7780_v61  ;;  %5863 = vmatmul.mubr.msk.f32.gmra.mrb[50].mxu1 %vm2275_vm1, %v1020_v44  ;;  %v7783_v32 = vpop.f32.mrb[167].mxu0  ;;  %v8471_v61 = vld [vmem:[#allocation37_spill] sm:$0xff]  ;;  %v1025_v49 = vmul.f32 %v7542_v14, %v705_v60  ;;  %v7804_v41 = vpop.permute.xlu0 %1976  ;;  %v1027_v14 = vmul.f32 %v7562_v39, %v707_v54 }
 0x225   :  { %5865 = vmatprep.mubr.msk.f32.mxu1 %vm2275_vm1, %v1021_v20  ;;  %v1024_v20 = vmul.f32 %v7508_v3, %v704_v5  ;;  %v706_v21 = vmax.f32 %v8471_v61, 0.0  ;;  %v7814_v5 = vpop.permute.xlu1 %1980  ;;  %v8476_v61 = vld [vmem:[#allocation42_spill] sm:$0xff] }
 0x226   :  { %v709_v60 = vmax.f32 %v8476_v61, 0.0 }
 0x227   :  { %v7792_v9 = vpop.f32.mrb[168].mxu0 }
 0x228   :  { %8470 = vst [vmem:[#allocation3_spill] sm:$0xff] %v7792_v9  ;;  %5866 = vmatmul.mubr.msk.f32.gmra.mrb[52].mxu1 %vm2275_vm1, %v1022_v59  ;;  %v7797_v44 = vpop.f32.mrb[169].mxu0  ;;  %v1026_v59 = vmul.f32 %v7526_v11, %v706_v21  ;;  %v8478_v21 = vld [vmem:[#allocation41_spill] sm:$0xff] }
 0x229   :  { %5868 = vmatprep.mubr.msk.f32.mxu1 %vm2275_vm1, %v1023_v2  ;;  %v8475_v2 = vld [vmem:[#allocation39_spill] sm:$0xff]  ;;  %v7832_v61 = vpop.permute.xlu1 %1988 }
 0x22a   :  { %v708_v3 = vmax.f32 %v8475_v2, 0.0  ;;  %v1029_v2 = vmul.f32 %v7581_v15, %v709_v60 }
 0x22b   :  { %v7806_v45 = vpop.f32.mrb[170].mxu0 }
 0x22c   :  { %8473 = vst [vmem:[#allocation24_spill] sm:$0xff] %v7806_v45  ;;  %5869 = vmatmul.mubr.msk.f32.gmra.mrb[54].mxu1 %vm2275_vm1, %v1024_v20  ;;  %v7809_v9 = vpop.f32.mrb[171].mxu0  ;;  %v7823_v20 = vpop.permute.xlu0 %1984  ;;  %v1028_v11 = vmul.f32 %v7551_v56, %v708_v3 }
 0x22d   :  { %8474 = vst [vmem:[#allocation65_spill] sm:$0xff] %v7809_v9  ;;  %5871 = vmatprep.mubr.msk.f32.mxu1 %vm2275_vm1, %v1025_v49  ;;  %v710_v49 = vmax.f32 %v8478_v21, 0.0  ;;  %v8479_v9 = vld [vmem:[#allocation45_spill] sm:$0xff] }
 0x22e   :  { %v711_v39 = vmax.f32 %v8479_v9, 0.0  ;;  %v8482_v21 = vld [vmem:[#allocation49_spill] sm:$0xff] }
 0x22f   :  { %v7818_v13 = vpop.f32.mrb[172].mxu0  ;;  %v713_v15 = vmax.f32 %v8482_v21, 0.0 }
 0x230   :  { %8477 = vst [vmem:[#allocation23_spill] sm:$0xff] %v7818_v13  ;;  %5872 = vmatmul.mubr.msk.f32.gmra.mrb[56].mxu1 %vm2275_vm1, %v1026_v59  ;;  %v7821_v45 = vpop.f32.mrb[173].mxu0  ;;  %v8481_v13 = vld [vmem:[#allocation44_spill] sm:$0xff]  ;;  %v1031_v3 = vmul.f32 %v7600_v0, %v711_v39  ;;  %v7842_v60 = vpop.permute.xlu0 %1992 }
 0x231   :  { %5874 = vmatprep.mubr.msk.f32.mxu1 %vm2275_vm1, %v1027_v14  ;;  %v1030_v14 = vmul.f32 %v7572_v33, %v710_v49  ;;  %v712_v56 = vmax.f32 %v8481_v13, 0.0  ;;  %v7852_v49 = vpop.permute.xlu1 %1996  ;;  %v1033_v0 = vmul.f32 %v7619_v31, %v713_v15  ;;  %v8486_v13 = vld [vmem:[#allocation52_spill] sm:$0xff]  ;;  %v8489_v15 = vld [vmem:[#allocation54_spill] sm:$0xff] }
 0x232   :  { %v715_v39 = vmax.f32 %v8486_v13, 0.0  ;;  %v8490_v13 = vld [vmem:[#allocation59_spill] sm:$0xff] }
 0x233   :  { %v7830_v54 = vpop.f32.mrb[174].mxu0 }
 0x234   :  { %8480 = vst [vmem:[#allocation26_spill] sm:$0xff] %v7830_v54  ;;  %5875 = vmatmul.mubr.msk.f32.gmra.mrb[58].mxu1 %vm2275_vm1, %v1028_v11  ;;  %v7835_v59 = vpop.f32.mrb[175].mxu0  ;;  %v1032_v11 = vmul.f32 %v7590_v29, %v712_v56  ;;  %v7857_v21 = vpop.permute.xlu0 %2000  ;;  %v1035_v29 = vmul.f32 %v7638_v36, %v715_v39  ;;  %v8488_v56 = vld [vmem:[#allocation55_spill] sm:$0xff] }
 0x235   :  { %5877 = vmatprep.mubr.msk.f32.mxu1 %vm2275_vm1, %v1029_v2  ;;  %v8485_v2 = vld [vmem:[#allocation48_spill] sm:$0xff] }
 0x236   :  { %v714_v33 = vmax.f32 %v8485_v2, 0.0  ;;  %v717_v2 = vmax.f32 %v8488_v56, 0.0 }
 0x237   :  { %v7844_v9 = vpop.f32.mrb[176].mxu0 }
 0x238   :  { %8483 = vst [vmem:[#allocation25_spill] sm:$0xff] %v7844_v9  ;;  %5878 = vmatmul.mubr.msk.f32.gmra.mrb[60].mxu1 %vm2275_vm1, %v1030_v14  ;;  %v7847_v54 = vpop.f32.mrb[177].mxu0  ;;  %v1034_v14 = vmul.f32 %v7610_v22, %v714_v33  ;;  %v8487_v9 = vld [vmem:[#allocation51_spill] sm:$0xff]  ;;  %v719_v22 = vmax.f32 %v8490_v13, 0.0  ;;  %v7872_v33 = vpop.permute.xlu0 %2008  ;;  %v8495_v13 = vld [vmem:[#allocation2_spill] sm:$0xff] }
 0x239   :  { %8484 = vst [vmem:[#allocation28_spill] sm:$0xff] %v7847_v54  ;;  %5880 = vmatprep.mubr.msk.f32.mxu1 %vm2275_vm1, %v1031_v3  ;;  %v716_v3 = vmax.f32 %v8487_v9, 0.0  ;;  %v7864_v54 = vpop.permute.xlu1 %2004  ;;  %v8491_v9 = vld [vmem:[#allocation58_spill] sm:$0xff] }
 0x23a   :  { %v720_v39 = vmax.f32 %v8491_v9, 0.0  ;;  %v8496_v9 = vld [vmem:[#allocation66_spill] sm:$0xff] }
 0x23b   :  { %v1036_v31 = vmul.f32 %v7628_v6, %v716_v3  ;;  %v1039_v6 = vmul.f32 %v7676_v40, %v719_v22  ;;  %v8492_v3 = vld [vmem:[#allocation61_spill] sm:$0xff]  ;;  %v724_v22 = vmax.f32 %v8495_v13, 0.0 }
 0x23c   :  { %5881 = vmatmul.mubr.msk.f32.gmra.mrb[62].mxu1 %vm2275_vm1, %v1032_v11  ;;  %v718_v11 = vmax.f32 %v8489_v15, 0.0  ;;  %v1040_v56 = vmul.f32 %v7666_v4, %v720_v39  ;;  %v8494_v15 = vld [vmem:[#allocation64_spill] sm:$0xff]  ;;  %v725_v4 = vmax.f32 %v8496_v9, 0.0  ;;  %v8499_v13 = vld [vmem:[#allocation5_spill] sm:$0xff] }
 0x23d   :  { %5883 = vmatprep.mubr.msk.f32.mxu1 %vm2275_vm1, %v1033_v0  ;;  %v1037_v0 = vmul.f32 %v7657_v46, %v717_v2  ;;  %v7883_v46 = vpop.permute.xlu0 %2016  ;;  %v8493_v2 = vld [vmem:[#allocation60_spill] sm:$0xff] }
 0x23e   :  { %v1038_v36 = vmul.f32 %v7648_v37, %v718_v11  ;;  %v723_v11 = vmax.f32 %v8494_v15, 0.0  ;;  %v1886_v15 = vmax.f32 %v7464_v57, 0.0 }
 0x240   :  { %5884 = vmatmul.mubr.msk.f32.gmra.mrb[64].mxu1 %vm2275_vm1, %v1034_v14  ;;  %v7878_v14 = vpop.permute.xlu1 %2012 }
 0x241   :  { %5886 = vmatprep.mubr.msk.f32.mxu1 %vm2275_vm1, %v1035_v29  ;;  %v721_v29 = vmax.f32 %v8492_v3, 0.0  ;;  %v7898_v39 = vpop.permute.xlu0 %2024  ;;  %v8497_v3 = vld [vmem:[#allocation4_spill] sm:$0xff] }
 0x243   :  { %v1041_v37 = vmul.f32 %v7695_v52, %v721_v29  ;;  %v1883_v52 = vmax.f32 %v7457_v55, 0.0  ;;  %v726_v29 = vmax.f32 %v8497_v3, 0.0  ;;  %v8502_v3 = vld [vmem:[#allocation68_spill] sm:$0xff] }
 0x244   :  { %5887 = vmatmul.mubr.msk.f32.gmra.mrb[66].mxu1 %vm2275_vm1, %v1036_v31  ;;  %v722_v31 = vmax.f32 %v8493_v2, 0.0 }
 0x245   :  { %5889 = vmatprep.mubr.msk.f32.mxu1 %vm2275_vm1, %v1037_v0  ;;  %v7890_v0 = vpop.permute.xlu1 %2020  ;;  %v2203_v2 = vmul.f32 %v7747_v42, %v1883_v52  ;;  %v1046_v55 = vmul.f32 %v7724_v48, %v726_v29 }
 0x246   :  { %v1042_v40 = vmul.f32 %v7686_v12, %v722_v31  ;;  %v1045_v12 = vmul.f32 %v7733_v47, %v725_v4  ;;  %v1884_v31 = vmax.f32 %v7454_v53, 0.0  ;;  %v8501_v4 = vld [vmem:[#allocation7_spill] sm:$0xff] }
 0x247   :  { %v1890_v52 = vmax.f32 %v8501_v4, 0.0 }
 0x248   :  { %5890 = vmatmul.mubr.msk.f32.gmra.mrb[68].mxu1 %vm2275_vm1, %v1038_v36  ;;  %v1043_v36 = vmul.f32 %v7714_v35, %v723_v11  ;;  %v7909_v35 = vpop.permute.xlu0 %2032  ;;  %v2204_v47 = vmul.f32 %v7738_v50, %v1884_v31  ;;  %v8504_v31 = vld [vmem:[#allocation70_spill] sm:$0xff] }
 0x249   :  { %5892 = vmatprep.mubr.msk.f32.mxu1 %vm2275_vm1, %v1039_v6  ;;  %v1044_v6 = vmul.f32 %v7704_v30, %v724_v22  ;;  %v1885_v30 = vmax.f32 %v7467_v63, 0.0  ;;  %v2206_v63 = vmul.f32 %v7766_v8, %v1886_v15  ;;  %v1888_v22 = vmax.f32 %v8499_v13, 0.0  ;;  %v8505_v15 = vld [vmem:[#allocation69_spill] sm:$0xff]  ;;  %v8507_v13 = vld [vmem:[#allocation71_spill] sm:$0xff] }
 0x24a   :  { %v1891_v8 = vmax.f32 %v8502_v3, 0.0 }
 0x24b   :  { %v2205_v42 = vmul.f32 %v7756_v7, %v1885_v30  ;;  %v2208_v7 = vmul.f32 %v7785_v51, %v1888_v22  ;;  %v1893_v30 = vmax.f32 %v8504_v31, 0.0  ;;  %v1896_v22 = vmax.f32 %v8507_v13, 0.0  ;;  %v8513_v13 = vld [vmem:[#allocation12_spill] sm:$0xff] }
 0x24c   :  { %5893 = vmatmul.mubr.msk.f32.gmra.mrb[70].mxu1 %vm2275_vm1, %v1040_v56  ;;  %v7905_v56 = vpop.permute.xlu1 %2028  ;;  %v7922_v11 = vpop.permute.xlu0 %2040  ;;  %v2211_v51 = vmul.f32 %v7814_v5, %v1891_v8 }
 0x24d   :  { %5895 = vmatprep.mubr.msk.f32.mxu1 %vm2275_vm1, %v1041_v37 }
 0x250   :  { %5896 = vmatmul.mubr.msk.f32.gmra.mrb[72].mxu1 %vm2275_vm1, %v1042_v40  ;;  %v7916_v37 = vpop.permute.xlu1 %2036  ;;  %v8498_v40 = vld [vmem:[#allocation6_spill] sm:$0xff]  ;;  %v7935_v9 = vpop.permute.xlu0 %2048 }
 0x251   :  { %5898 = vmatprep.mubr.msk.f32.mxu1 %vm2275_vm1, %v1043_v36  ;;  %v1887_v48 = vmax.f32 %v8498_v40, 0.0  ;;  %v8500_v36 = vld [vmem:[#allocation8_spill] sm:$0xff] }
 0x252   :  { %v1889_v57 = vmax.f32 %v8500_v36, 0.0  ;;  %v8506_v40 = vld [vmem:[#allocation72_spill] sm:$0xff] }
 0x253   :  { %v2207_v50 = vmul.f32 %v7776_v34, %v1887_v48  ;;  %v2210_v34 = vmul.f32 %v7804_v41, %v1890_v52  ;;  %v2213_v41 = vmul.f32 %v7832_v61, %v1893_v30  ;;  %v1895_v48 = vmax.f32 %v8506_v40, 0.0 }
 0x254   :  { %5899 = vmatmul.mubr.msk.f32.gmra.mrb[74].mxu1 %vm2275_vm1, %v1044_v6  ;;  %v7928_v53 = vpop.permute.xlu1 %2044  ;;  %v2209_v6 = vmul.f32 %v7794_v16, %v1889_v57  ;;  %v2216_v61 = vmul.f32 %v7857_v21, %v1896_v22  ;;  %v8508_v57 = vld [vmem:[#allocation73_spill] sm:$0xff]  ;;  %v1899_v52 = vmax.f32 %v7554_v17, 0.0  ;;  %v1901_v21 = vmax.f32 %v7567_v19, 0.0 }
 0x255   :  { %5901 = vmatprep.mubr.msk.f32.mxu1 %vm2275_vm1, %v1045_v12  ;;  %v8503_v12 = vld [vmem:[#allocation67_spill] sm:$0xff]  ;;  %v1904_v19 = vmax.f32 %v7576_v62, 0.0  ;;  %v1909_v30 = vmax.f32 %v7617_v28, 0.0  ;;  %v1914_v22 = vmax.f32 %v8513_v13, 0.0 }
 0x256   :  { %v2219_v3 = vmul.f32 %v7878_v14, %v1899_v52 }
 0x258   :  { %5902 = vmatmul.mubr.msk.f32.gmra.mrb[76].mxu1 %vm2275_vm1, %v1046_v55  ;;  %v7942_v29 = vpop.permute.xlu1 %2052  ;;  %v7948_v55 = vpop.permute.xlu0 %2056 }
 0x259   :  { %5912 = vmatprep.mubr.msk.f32.mxu1 %vm2275_vm1, %v2203_v2  ;;  %v1892_v2 = vmax.f32 %v8503_v12, 0.0  ;;  %v1903_v12 = vmax.f32 %v7579_v18, 0.0  ;;  %v2224_v18 = vmul.f32 %v7909_v35, %v1904_v19 }
 0x25c   :  { %5913 = vmatmul.mubr.msk.f32.vlgmr.msra.gmra.mrb[14].mxu1 %vm2275_vm1, %v2204_v47  ;;  %v7954_v16 = vpop.permute.xlu1 %2060  ;;  %v2212_v47 = vmul.f32 %v7823_v20, %v1892_v2  ;;  %v1897_v20 = vmax.f32 %v7540_v27, 0.0  ;;  %v2223_v2 = vmul.f32 %v7905_v56, %v1903_v12  ;;  %v1908_v56 = vmax.f32 %v7602_v1, 0.0 }
 0x25d   :  { %5915 = vmatprep.mubr.msk.f32.mxu1 %vm2275_vm1, %v2205_v42  ;;  %v1894_v42 = vmax.f32 %v8505_v15, 0.0  ;;  %v2229_v15 = vmul.f32 %v7942_v29, %v1909_v30 }
 0x25f   :  { %v2214_v5 = vmul.f32 %v7842_v60, %v1894_v42  ;;  %v2217_v60 = vmul.f32 %v7864_v54, %v1897_v20  ;;  %v1902_v54 = vmax.f32 %v7564_v23, 0.0  ;;  %v8510_v42 = vld [vmem:[#allocation10_spill] sm:$0xff]  ;;  %v8514_v20 = vld [vmem:[#allocation13_spill] sm:$0xff] }
 0x260   :  { %5916 = vmatmul.mubr.msk.f32.gmra.mrb[16].mxu1 %vm2275_vm1, %v2206_v63  ;;  %v7961_v63 = vpop.permute.xlu0 %2064  ;;  %v7968_v36 = vpop.permute.xlu1 %2068 }
 0x261   :  { %5918 = vmatprep.mubr.msk.f32.mxu1 %vm2275_vm1, %v2207_v50  ;;  %v2215_v50 = vmul.f32 %v7852_v49, %v1895_v48  ;;  %v8512_v48 = vld [vmem:[#allocation14_spill] sm:$0xff] }
 0x264   :  { %5919 = vmatmul.mubr.msk.f32.gmra.mrb[18].mxu1 %vm2275_vm1, %v2208_v7  ;;  %v1898_v7 = vmax.f32 %v8508_v57, 0.0  ;;  %v7974_v4 = vpop.permute.xlu0 %2072  ;;  %v2077_v27 = vpop.permute.xlu1 %2076  ;;  %v8515_v57 = vld [vmem:[#allocation43_spill] sm:$0xff] }
 0x265   :  { %5921 = vmatprep.mubr.msk.f32.mxu1 %vm2275_vm1, %v2209_v6  ;;  %v1900_v6 = vmax.f32 %v7549_v58, 0.0  ;;  %v2222_v58 = vmul.f32 %v7898_v39, %v1902_v54  ;;  %v1907_v39 = vmax.f32 %v7605_v26, 0.0  ;;  %v8509_v26 = vld [vmem:[#allocation9_spill] sm:$0xff]  ;;  %v8518_v54 = vld [vmem:[#allocation15_spill] sm:$0xff] }
 0x266   :  { %v2218_v49 = vmul.f32 %v7872_v33, %v1898_v7  ;;  %v1916_v7 = vmax.f32 %v8515_v57, 0.0  ;;  %v8529_v57 = vld [vmem:[#allocation63_spill] sm:$0xff] }
 0x267   :  { %v2220_v17 = vmul.f32 %v7883_v46, %v1900_v6  ;;  %v1905_v46 = vmax.f32 %v7593_v43, 0.0  ;;  %v2227_v31 = vmul.f32 %v7928_v53, %v1907_v39  ;;  %v8511_v53 = vld [vmem:[#allocation11_spill] sm:$0xff] }
 0x268   :  { %5922 = vmatmul.mubr.msk.f32.gmra.mrb[20].mxu1 %vm2275_vm1, %v2210_v34  ;;  %v2081_v8 = vpop.permute.xlu0 %2080  ;;  %v2221_v34 = vmul.f32 %v7890_v0, %v1901_v21  ;;  %v2085_v33 = vpop.permute.xlu1 %2084  ;;  %v1906_v0 = vmax.f32 %v7588_v10, 0.0  ;;  %v2228_v10 = vmul.f32 %v7935_v9, %v1908_v56  ;;  %v1913_v9 = vmax.f32 %v8512_v48, 0.0  ;;  %v8522_v56 = vld [vmem:[#allocation53_spill] sm:$0xff] }
 0x269   :  { %5924 = vmatprep.mubr.msk.f32.mxu1 %vm2275_vm1, %v2211_v51  ;;  %v2225_v51 = vmul.f32 %v7916_v37, %v1905_v46  ;;  %v1910_v37 = vmax.f32 %v8509_v26, 0.0  ;;  %v1929_v48 = vmax.f32 %v7745_v24, 0.0 }
 0x26a   :  { %v2226_v43 = vmul.f32 %v7922_v11, %v1906_v0  ;;  %v1911_v11 = vmax.f32 %v8510_v42, 0.0  ;;  %v8525_v42 = vld [vmem:[#allocation57_spill] sm:$0xff] }
 0x26b   :  { %v2230_v28 = vmul.f32 %v7948_v55, %v1910_v37 }
 0x26c   :  { %5925 = vmatmul.mubr.msk.f32.gmra.mrb[22].mxu1 %vm2275_vm1, %v2212_v47  ;;  %v2089_v14 = vpop.permute.xlu0 %2088  ;;  %v2093_v23 = vpop.permute.xlu1 %2092  ;;  %v2231_v40 = vmul.f32 %v7954_v16, %v1911_v11  ;;  %v2234_v16 = vmul.f32 %v7974_v4, %v1914_v22  ;;  %v1927_v11 = vmax.f32 %v8525_v42, 0.0 }
 0x26d   :  { %5927 = vmatprep.mubr.msk.f32.mxu1 %vm2275_vm1, %v2213_v41  ;;  %v1912_v41 = vmax.f32 %v8511_v53, 0.0 }
 0x26f   :  { %v2232_v29 = vmul.f32 %v7961_v63, %v1912_v41 }
 0x270   :  { %5928 = vmatmul.mubr.msk.f32.gmra.mrb[24].mxu1 %vm2275_vm1, %v2214_v5  ;;  %v2097_v62 = vpop.permute.xlu0 %2096  ;;  %v2101_v35 = vpop.permute.xlu1 %2100 }
 0x271   :  { %5930 = vmatprep.mubr.msk.f32.mxu1 %vm2275_vm1, %v2215_v50  ;;  %v2233_v50 = vmul.f32 %v7968_v36, %v1913_v9  ;;  %v2236_v36 = vmul.f32 %v2081_v8, %v1916_v7  ;;  %v1933_v7 = vmax.f32 %v8529_v57, 0.0 }
 0x274   :  { %5931 = vmatmul.mubr.msk.f32.gmra.mrb[26].mxu1 %vm2275_vm1, %v2216_v61  ;;  %v2105_v47 = vpop.permute.xlu0 %2104  ;;  %v2109_v1 = vpop.permute.xlu1 %2108  ;;  %v1915_v61 = vmax.f32 %v8514_v20, 0.0 }
 0x275   :  { %5933 = vmatprep.mubr.msk.f32.mxu1 %vm2275_vm1, %v2217_v60 }
 0x276   :  { %v2235_v52 = vmul.f32 %v2077_v27, %v1915_v61  ;;  %v8519_v27 = vld [vmem:[#allocation47_spill] sm:$0xff] }
 0x278   :  { %5934 = vmatmul.mubr.msk.f32.gmra.mrb[28].mxu1 %vm2275_vm1, %v2218_v49  ;;  %v2113_v5 = vpop.permute.xlu0 %2112  ;;  %v2117_v55 = vpop.permute.xlu1 %2116  ;;  %v8516_v49 = vld [vmem:[#allocation16_spill] sm:$0xff] }
 0x279   :  { %5936 = vmatprep.mubr.msk.f32.mxu1 %vm2275_vm1, %v2219_v3  ;;  %v1917_v6 = vmax.f32 %v8516_v49, 0.0  ;;  %v8517_v3 = vld [vmem:[#allocation46_spill] sm:$0xff] }
 0x27a   :  { %v1918_v21 = vmax.f32 %v8517_v3, 0.0  ;;  %v8530_v49 = vld [vmem:[#allocation22_spill] sm:$0xff] }
 0x27c   :  { %5937 = vmatmul.mubr.msk.f32.gmra.mrb[30].mxu1 %vm2275_vm1, %v2220_v17  ;;  %v2121_v60 = vpop.permute.xlu0 %2120  ;;  %v2125_v63 = vpop.permute.xlu1 %2124  ;;  %v2237_v17 = vmul.f32 %v2085_v33, %v1917_v6  ;;  %v2238_v12 = vmul.f32 %v2089_v14, %v1918_v21  ;;  %v8521_v33 = vld [vmem:[#allocation50_spill] sm:$0xff]  ;;  %v1934_v6 = vmax.f32 %v8530_v49, 0.0  ;;  %v8531_v21 = vld [vmem:[#allocation21_spill] sm:$0xff] }
 0x27d   :  { %5939 = vmatprep.mubr.msk.f32.mxu1 %vm2275_vm1, %v2221_v34  ;;  %v1919_v34 = vmax.f32 %v8518_v54, 0.0  ;;  %v1922_v0 = vmax.f32 %v8521_v33, 0.0  ;;  %v8534_v33 = vld [vmem:[#allocation24_spill] sm:$0xff] }
 0x27f   :  { %v2239_v19 = vmul.f32 %v2093_v23, %v1919_v34  ;;  %v2242_v23 = vmul.f32 %v2105_v47, %v1922_v0  ;;  %v1940_v0 = vmax.f32 %v8534_v33, 0.0 }
 0x280   :  { %5940 = vmatmul.mubr.msk.f32.gmra.mrb[32].mxu1 %vm2275_vm1, %v2222_v58  ;;  %v2129_v4 = vpop.permute.xlu0 %2128  ;;  %v1920_v58 = vmax.f32 %v8519_v27, 0.0 }
 0x281   :  { %5942 = vmatprep.mubr.msk.f32.mxu1 %vm2275_vm1, %v2223_v2  ;;  %v8520_v2 = vld [vmem:[#allocation18_spill] sm:$0xff] }
 0x282   :  { %v1921_v46 = vmax.f32 %v8520_v2, 0.0  ;;  %v2240_v8 = vmul.f32 %v2097_v62, %v1920_v58  ;;  %v8532_v58 = vld [vmem:[#allocation3_spill] sm:$0xff]  ;;  %v8533_v2 = vld [vmem:[#allocation65_spill] sm:$0xff] }
 0x284   :  { %5943 = vmatmul.mubr.msk.f32.gmra.mrb[34].mxu1 %vm2275_vm1, %v2224_v18  ;;  %v2133_v18 = vpop.permute.xlu1 %2132  ;;  %v2241_v39 = vmul.f32 %v2101_v35, %v1921_v46  ;;  %v8524_v35 = vld [vmem:[#allocation17_spill] sm:$0xff]  ;;  %v1939_v46 = vmax.f32 %v8533_v2, 0.0 }
 0x285   :  { %5945 = vmatprep.mubr.msk.f32.mxu1 %vm2275_vm1, %v2225_v51  ;;  %v2137_v51 = vpop.permute.xlu0 %2136  ;;  %v2249_v22 = vmul.f32 %v2133_v18, %v1929_v48 }
 0x288   :  { %5946 = vmatmul.mubr.msk.f32.gmra.mrb[36].mxu1 %vm2275_vm1, %v2226_v43  ;;  %v1923_v43 = vmax.f32 %v7707_v38, 0.0  ;;  %v2141_v14 = vpop.permute.xlu1 %2140 }
 0x289   :  { %5948 = vmatprep.mubr.msk.f32.mxu1 %vm2275_vm1, %v2227_v31  ;;  %v1924_v31 = vmax.f32 %v8522_v56, 0.0  ;;  %v2145_v62 = vpop.permute.xlu0 %2144 }
 0x28a   :  { %v2243_v30 = vmul.f32 %v2109_v1, %v1923_v43  ;;  %v8526_v1 = vld [vmem:[#allocation20_spill] sm:$0xff] }
 0x28b   :  { %v2244_v37 = vmul.f32 %v2113_v5, %v1924_v31  ;;  %v1928_v53 = vmax.f32 %v8526_v1, 0.0 }
 0x28c   :  { %5949 = vmatmul.mubr.msk.f32.gmra.mrb[38].mxu1 %vm2275_vm1, %v2228_v10  ;;  %v8523_v10 = vld [vmem:[#allocation56_spill] sm:$0xff] }
 0x28d   :  { %5951 = vmatprep.mubr.msk.f32.mxu1 %vm2275_vm1, %v2229_v15  ;;  %v1925_v26 = vmax.f32 %v8523_v10, 0.0  ;;  %v1926_v15 = vmax.f32 %v8524_v35, 0.0  ;;  %v2153_v41 = vpop.permute.xlu0 %2152  ;;  %v2248_v9 = vmul.f32 %v2129_v4, %v1928_v53  ;;  %v1937_v4 = vmax.f32 %v7797_v44, 0.0  ;;  %v8537_v35 = vld [vmem:[#allocation28_spill] sm:$0xff]  ;;  %v4209_v53 = vld [vmem:[%s8304_s1 + $0x8] sm:$0xff] }
 0x28e   :  { %v2254_v3 = vmul.f32 %v2153_v41, %v1934_v6  ;;  %4288 = vmatprep.mubr.f32.mxu0 %v4209_v53  ;;  %v8099_v41 = vld [vmem:[%s8303_s3 + $0x60] ss:$0 sm:$0xff] }
 0x28f   :  { %v2245_v38 = vmul.f32 %v2117_v55, %v1925_v26  ;;  %v2246_v47 = vmul.f32 %v2121_v60, %v1926_v15  ;;  %v8528_v55 = vld [vmem:[#allocation62_spill] sm:$0xff]  ;;  %v1945_v15 = vmax.f32 %v8537_v35, 0.0 }
 0x290   :  { %5952 = vmatmul.mubr.msk.f32.gmra.mrb[40].mxu1 %vm2275_vm1, %v2230_v28  ;;  %v2149_v28 = vpop.permute.xlu1 %2148 }
 0x291   :  { %5954 = vmatprep.mubr.msk.f32.mxu1 %vm2275_vm1, %v2231_v40  ;;  %v2247_v40 = vmul.f32 %v2125_v63, %v1927_v11  ;;  %v2161_v20 = vpop.permute.xlu0 %2160  ;;  %v2253_v63 = vmul.f32 %v2149_v28, %v1933_v7  ;;  %v8538_v11 = vld [vmem:[#allocation25_spill] sm:$0xff] }
 0x292   :  { %v1946_v28 = vmax.f32 %v8538_v11, 0.0 }
 0x294   :  { %5955 = vmatmul.mubr.msk.f32.gmra.mrb[42].mxu1 %vm2275_vm1, %v2232_v29  ;;  %v2157_v5 = vpop.permute.xlu1 %2156  ;;  %v8527_v29 = vld [vmem:[#allocation19_spill] sm:$0xff] }
 0x295   :  { %5957 = vmatprep.mubr.msk.f32.mxu1 %vm2275_vm1, %v2233_v50  ;;  %v1930_v13 = vmax.f32 %v8527_v29, 0.0  ;;  %v1931_v50 = vmax.f32 %v7759_v25, 0.0  ;;  %v2169_v25 = vpop.permute.xlu0 %2168 }
 0x297   :  { %v2250_v61 = vmul.f32 %v2137_v51, %v1930_v13  ;;  %v2251_v24 = vmul.f32 %v2141_v14, %v1931_v50  ;;  %v8535_v14 = vld [vmem:[#allocation23_spill] sm:$0xff] }
 0x298   :  { %5958 = vmatmul.mubr.msk.f32.gmra.mrb[44].mxu1 %vm2275_vm1, %v2234_v16  ;;  %v1932_v16 = vmax.f32 %v8528_v55, 0.0  ;;  %v2165_v60 = vpop.permute.xlu1 %2164 }
 0x299   :  { %5960 = vmatprep.mubr.msk.f32.mxu1 %vm2275_vm1, %v2235_v52 }
 0x29a   :  { %v2252_v52 = vmul.f32 %v2145_v62, %v1932_v16  ;;  %v8536_v62 = vld [vmem:[#allocation26_spill] sm:$0xff] }
 0x29c   :  { %5961 = vmatmul.mubr.msk.f32.gmra.mrb[46].mxu1 %vm2275_vm1, %v2236_v36  ;;  %v1935_v36 = vmax.f32 %v7783_v32, 0.0  ;;  %v2173_v54 = vpop.permute.xlu1 %2172  ;;  %v2257_v32 = vmul.f32 %v2165_v60, %v1937_v4 }
 0x29d   :  { %5963 = vmatprep.mubr.msk.f32.mxu1 %vm2275_vm1, %v2237_v17  ;;  %v1936_v17 = vmax.f32 %v8531_v21, 0.0  ;;  %v2259_v51 = vmul.f32 %v2173_v54, %v1939_v46 }
 0x29e   :  { %v2255_v34 = vmul.f32 %v2157_v5, %v1935_v36 }
 0x29f   :  { %v2256_v27 = vmul.f32 %v2161_v20, %v1936_v17 }
 0x2a0   :  { %5964 = vmatmul.mubr.msk.f32.gmra.mrb[48].mxu1 %vm2275_vm1, %v2238_v12  ;;  %v2177_v12 = vpop.permute.xlu0 %2176  ;;  %v2181_v18 = vpop.permute.xlu1 %2180 }
 0x2a1   :  { %5966 = vmatprep.mubr.msk.f32.mxu1 %vm2275_vm1, %v2239_v19  ;;  %v1938_v19 = vmax.f32 %v8532_v58, 0.0  ;;  %v2260_v43 = vmul.f32 %v2177_v12, %v1940_v0 }
 0x2a4   :  { %5967 = vmatmul.mubr.msk.f32.gmra.mrb[50].mxu1 %vm2275_vm1, %v2240_v8  ;;  %v2258_v8 = vmul.f32 %v2169_v25, %v1938_v19  ;;  %v2185_v44 = vpop.permute.xlu0 %2184  ;;  %v2189_v56 = vpop.permute.xlu1 %2188 }
 0x2a5   :  { %5969 = vmatprep.mubr.msk.f32.mxu1 %vm2275_vm1, %v2241_v39  ;;  %v1941_v39 = vmax.f32 %v7821_v45, 0.0 }
 0x2a7   :  { %v2261_v31 = vmul.f32 %v2181_v18, %v1941_v39 }
 0x2a8   :  { %5970 = vmatmul.mubr.msk.f32.gmra.mrb[52].mxu1 %vm2275_vm1, %v2242_v23  ;;  %v1942_v23 = vmax.f32 %v8535_v14, 0.0  ;;  %v2193_v10 = vpop.permute.xlu0 %2192 }
 0x2a9   :  { %5972 = vmatprep.mubr.msk.f32.mxu1 %vm2275_vm1, %v2243_v30  ;;  %v1943_v30 = vmax.f32 %v7835_v59, 0.0 }
 0x2aa   :  { %v2262_v26 = vmul.f32 %v2185_v44, %v1942_v23 }
 0x2ab   :  { %v2263_v45 = vmul.f32 %v2189_v56, %v1943_v30 }
 0x2ac   :  { %5973 = vmatmul.mubr.msk.f32.gmra.mrb[54].mxu1 %vm2275_vm1, %v2244_v37  ;;  %v1944_v37 = vmax.f32 %v8536_v62, 0.0 }
 0x2ad   :  { %5975 = vmatprep.mubr.msk.f32.mxu1 %vm2275_vm1, %v2245_v38  ;;  %v2197_v38 = vpop.permute.xlu1 %2196 }
 0x2ae   :  { %v2264_v42 = vmul.f32 %v2193_v10, %v1944_v37  ;;  %v2265_v59 = vmul.f32 %v2197_v38, %v1945_v15 }
 0x2b0   :  { %5976 = vmatmul.mubr.msk.f32.gmra.mrb[56].mxu1 %vm2275_vm1, %v2246_v47  ;;  %v2201_v47 = vpop.permute.xlu0 %2200 }
 0x2b1   :  { %5978 = vmatprep.mubr.msk.f32.mxu1 %vm2275_vm1, %v2247_v40  ;;  %v2266_v1 = vmul.f32 %v2201_v47, %v1946_v28 }
 0x2b4   :  { %5979 = vmatmul.mubr.msk.f32.gmra.mrb[58].mxu1 %vm2275_vm1, %v2248_v9 }
 0x2b5   :  { %5981 = vmatprep.mubr.msk.f32.mxu1 %vm2275_vm1, %v2249_v22 }
 0x2b8   :  { %5982 = vmatmul.mubr.msk.f32.gmra.mrb[60].mxu1 %vm2275_vm1, %v2250_v61 }
 0x2b9   :  { %5984 = vmatprep.mubr.msk.f32.mxu1 %vm2275_vm1, %v2251_v24 }
 0x2bc   :  { %5985 = vmatmul.mubr.msk.f32.gmra.mrb[62].mxu1 %vm2275_vm1, %v2252_v52 }
 0x2bd   :  { %5987 = vmatprep.mubr.msk.f32.mxu1 %vm2275_vm1, %v2253_v63 }
 0x2c0   :  { %5988 = vmatmul.mubr.msk.f32.gmra.mrb[64].mxu1 %vm2275_vm1, %v2254_v3 }
 0x2c1   :  { %5990 = vmatprep.mubr.msk.f32.mxu1 %vm2275_vm1, %v2255_v34 }
 0x2c4   :  { %5991 = vmatmul.mubr.msk.f32.gmra.mrb[66].mxu1 %vm2275_vm1, %v2256_v27 }
 0x2c5   :  { %5993 = vmatprep.mubr.msk.f32.mxu1 %vm2275_vm1, %v2257_v32 }
 0x2c8   :  { %5994 = vmatmul.mubr.msk.f32.gmra.mrb[68].mxu1 %vm2275_vm1, %v2258_v8 }
 0x2c9   :  { %5996 = vmatprep.mubr.msk.f32.mxu1 %vm2275_vm1, %v2259_v51 }
 0x2cc   :  { %5997 = vmatmul.mubr.msk.f32.gmra.mrb[70].mxu1 %vm2275_vm1, %v2260_v43 }
 0x2cd   :  { %5999 = vmatprep.mubr.msk.f32.mxu1 %vm2275_vm1, %v2261_v31 }
 0x2d0   :  { %6000 = vmatmul.mubr.msk.f32.gmra.mrb[72].mxu1 %vm2275_vm1, %v2262_v26 }
 0x2d1   :  { %6002 = vmatprep.mubr.msk.f32.mxu1 %vm2275_vm1, %v2263_v45 }
 0x2d4   :  { %6003 = vmatmul.mubr.msk.f32.gmra.mrb[74].mxu1 %vm2275_vm1, %v2264_v42 }
 0x2d5   :  { %6005 = vmatprep.mubr.msk.f32.mxu1 %vm2275_vm1, %v2265_v59 }
 0x2d8   :  { %6006 = vmatmul.mubr.msk.f32.gmra.mrb[76].mxu1 %vm2275_vm1, %v2266_v1 }
 0x32f   :  { %v5914_v40 = vpop.f32.mrb[14].mxu1 }
 0x330   :  { %v4081_v48 = vadd.f32 %v5914_v40, %v8099_v41  ;;  %v3692_v9 = vpop.f32.mrb[15].mxu1 }
 0x331   :  { %v4080_v5 = vadd.f32 %v8099_v41, %v3692_v9 }
 0x332   :  { %v4145_v29 = vmax.f32 %v4081_v48, 0.0 }
 0x333   :  { %v4144_v13 = vmax.f32 %v4080_v5, 0.0  ;;  %v5917_v22 = vpop.f32.mrb[16].mxu1 }
 0x334   :  { %v4083_v50 = vadd.f32 %v5917_v22, %v8099_v41  ;;  %v3702_v20 = vpop.f32.mrb[17].mxu1 }
 0x335   :  { %v8104_v61 = vpack.c.bf16 %v4145_v29, %v4144_v13  ;;  %v4082_v55 = vadd.f32 %v8099_v41, %v3702_v20 }
 0x336   :  { %v4147_v16 = vmax.f32 %v4083_v50, 0.0 }
 0x337   :  { %v4146_v24 = vmax.f32 %v4082_v55, 0.0  ;;  %v5920_v57 = vpop.f32.mrb[18].mxu1 }
 0x338   :  { %v4085_v7 = vadd.f32 %v5920_v57, %v8099_v41  ;;  %v3712_v60 = vpop.f32.mrb[19].mxu1 }
 0x339   :  { %v8108_v52 = vpack.c.bf16 %v4147_v16, %v4146_v24  ;;  %v4084_v49 = vadd.f32 %v8099_v41, %v3712_v60 }
 0x33a   :  { %v4149_v6 = vmax.f32 %v4085_v7, 0.0 }
 0x33b   :  { %v4148_v25 = vmax.f32 %v4084_v49, 0.0  ;;  %v5923_v63 = vpop.f32.mrb[20].mxu1 }
 0x33c   :  { %v4087_v36 = vadd.f32 %v5923_v63, %v8099_v41  ;;  %v3722_v3 = vpop.f32.mrb[21].mxu1 }
 0x33d   :  { %v8112_v21 = vpack.c.bf16 %v4149_v6, %v4148_v25  ;;  %v4086_v17 = vadd.f32 %v8099_v41, %v3722_v3 }
 0x33e   :  { %v4151_v54 = vmax.f32 %v4087_v36, 0.0 }
 0x33f   :  { %v4150_v34 = vmax.f32 %v4086_v17, 0.0  ;;  %v5926_v4 = vpop.f32.mrb[22].mxu1 }
 0x340   :  { %v4089_v12 = vadd.f32 %v5926_v4, %v8099_v41  ;;  %v3732_v27 = vpop.f32.mrb[23].mxu1 }
 0x341   :  { %v8116_v58 = vpack.c.bf16 %v4151_v54, %v4150_v34  ;;  %v4088_v19 = vadd.f32 %v8099_v41, %v3732_v27 }
 0x342   :  { %v4153_v32 = vmax.f32 %v4089_v12, 0.0 }
 0x343   :  { %v4152_v2 = vmax.f32 %v4088_v19, 0.0  ;;  %v5929_v46 = vpop.f32.mrb[24].mxu1 }
 0x344   :  { %v4091_v18 = vadd.f32 %v5929_v46, %v8099_v41  ;;  %v3742_v8 = vpop.f32.mrb[25].mxu1 }
 0x345   :  { %v8120_v33 = vpack.c.bf16 %v4153_v32, %v4152_v2  ;;  %v4090_v0 = vadd.f32 %v8099_v41, %v3742_v8 }
 0x346   :  { %v4155_v44 = vmax.f32 %v4091_v18, 0.0 }
 0x347   :  { %v4154_v51 = vmax.f32 %v4090_v0, 0.0  ;;  %v5932_v39 = vpop.f32.mrb[26].mxu1 }
 0x348   :  { %v4093_v43 = vadd.f32 %v5932_v39, %v8099_v41  ;;  %v3752_v14 = vpop.f32.mrb[27].mxu1 }
 0x349   :  { %v8124_v23 = vpack.c.bf16 %v4155_v44, %v4154_v51  ;;  %v4092_v56 = vadd.f32 %v8099_v41, %v3752_v14 }
 0x34a   :  { %v4157_v31 = vmax.f32 %v4093_v43, 0.0 }
 0x34b   :  { %v4156_v30 = vmax.f32 %v4092_v56, 0.0  ;;  %v5935_v10 = vpop.f32.mrb[28].mxu1 }
 0x34c   :  { %v4095_v26 = vadd.f32 %v5935_v10, %v8099_v41  ;;  %v3762_v62 = vpop.f32.mrb[29].mxu1 }
 0x34d   :  { %v8128_v37 = vpack.c.bf16 %v4157_v31, %v4156_v30  ;;  %v4094_v45 = vadd.f32 %v8099_v41, %v3762_v62 }
 0x34e   :  { %v4159_v35 = vmax.f32 %v4095_v26, 0.0 }
 0x34f   :  { %v4158_v15 = vmax.f32 %v4094_v45, 0.0  ;;  %v5938_v38 = vpop.f32.mrb[30].mxu1 }
 0x350   :  { %v4097_v42 = vadd.f32 %v5938_v38, %v8099_v41  ;;  %v3772_v11 = vpop.f32.mrb[31].mxu1 }
 0x351   :  { %v8132_v28 = vpack.c.bf16 %v4159_v35, %v4158_v15  ;;  %v4096_v59 = vadd.f32 %v8099_v41, %v3772_v11 }
 0x352   :  { %v4161_v47 = vmax.f32 %v4097_v42, 0.0 }
 0x353   :  { %v4160_v1 = vmax.f32 %v4096_v59, 0.0  ;;  %v5941_v53 = vpop.f32.mrb[32].mxu1 }
 0x354   :  { %v4099_v40 = vadd.f32 %v5941_v53, %v8099_v41  ;;  %v3782_v48 = vpop.f32.mrb[33].mxu1  ;;  %v4213_v53 = vld [vmem:[%s8304_s1 + $0x28] sm:$0xff] }
 0x355   :  { %v6054_v9 = vpack.c.bf16 %v4161_v47, %v4160_v1  ;;  %v4098_v5 = vadd.f32 %v8099_v41, %v3782_v48  ;;  %v4208_v47 = vld [vmem:[%s8304_s1] sm:$0xff] }
 0x356   :  { %v4163_v29 = vmax.f32 %v4099_v40, 0.0 }
 0x357   :  { %v4162_v13 = vmax.f32 %v4098_v5, 0.0  ;;  %v5944_v22 = vpop.f32.mrb[34].mxu1  ;;  %6055 = vmatprep.subr.bf16.mxu0 %v6054_v9 }
 0x358   :  { %v4101_v50 = vadd.f32 %v5944_v22, %v8099_v41  ;;  %v3792_v20 = vpop.f32.mrb[35].mxu1  ;;  %6057 = vmatpush3.bf16.msra.mxu0 %v8104_v61 }
 0x359   :  { %v6058_v55 = vpack.c.bf16 %v4163_v29, %v4162_v13  ;;  %v4100_v16 = vadd.f32 %v8099_v41, %v3792_v20 }
 0x35a   :  { %v4165_v24 = vmax.f32 %v4101_v50, 0.0  ;;  %v4217_v50 = vld [vmem:[%s8304_s1 + $0x48] sm:$0xff] }
 0x35b   :  { %v4164_v57 = vmax.f32 %v4100_v16, 0.0  ;;  %v5947_v7 = vpop.f32.mrb[36].mxu1  ;;  %6059 = vmatprep.subr.bf16.mxu0 %v6058_v55 }
 0x35c   :  { %v4103_v60 = vadd.f32 %v5947_v7, %v8099_v41  ;;  %v3802_v49 = vpop.f32.mrb[37].mxu1  ;;  %6061 = vmatpush3.bf16.msra.mxu0 %v8108_v52  ;;  %v4216_v7 = vld [vmem:[%s8304_s1 + $0x40] sm:$0xff] }
 0x35d   :  { %v6062_v6 = vpack.c.bf16 %v4165_v24, %v4164_v57  ;;  %v4102_v25 = vadd.f32 %v8099_v41, %v3802_v49 }
 0x35e   :  { %v4167_v63 = vmax.f32 %v4103_v60, 0.0 }
 0x35f   :  { %v4166_v36 = vmax.f32 %v4102_v25, 0.0  ;;  %v5950_v3 = vpop.f32.mrb[38].mxu1  ;;  %6063 = vmatprep.subr.bf16.mxu0 %v6062_v6  ;;  %v4221_v6 = vld [vmem:[%s8304_s1 + $0x68] sm:$0xff] }
 0x360   :  { %v4105_v61 = vadd.f32 %v5950_v3, %v8099_v41  ;;  %v3812_v17 = vpop.f32.mrb[39].mxu1  ;;  %6065 = vmatpush3.bf16.msra.mxu0 %v8112_v21 }
 0x361   :  { %v6066_v54 = vpack.c.bf16 %v4167_v63, %v4166_v36  ;;  %v4104_v34 = vadd.f32 %v8099_v41, %v3812_v17  ;;  %v4220_v17 = vld [vmem:[%s8304_s1 + $0x60] sm:$0xff] }
 0x362   :  { %v4169_v4 = vmax.f32 %v4105_v61, 0.0 }
 0x363   :  { %v4168_v12 = vmax.f32 %v4104_v34, 0.0  ;;  %v5953_v27 = vpop.f32.mrb[40].mxu1  ;;  %6067 = vmatprep.subr.bf16.mxu0 %v6066_v54 }
 0x364   :  { %v4107_v52 = vadd.f32 %v5953_v27, %v8099_v41  ;;  %v3822_v19 = vpop.f32.mrb[41].mxu1  ;;  %6069 = vmatpush3.bf16.msra.mxu0 %v8116_v58 }
 0x365   :  { %v6070_v32 = vpack.c.bf16 %v4169_v4, %v4168_v12  ;;  %v4106_v2 = vadd.f32 %v8099_v41, %v3822_v19  ;;  %v4211_v4 = vld [vmem:[%s8304_s1 + $0x18] sm:$0xff] }
 0x366   :  { %v4171_v46 = vmax.f32 %v4107_v52, 0.0 }
 0x367   :  { %v4170_v18 = vmax.f32 %v4106_v2, 0.0  ;;  %v5956_v8 = vpop.f32.mrb[42].mxu1  ;;  %6071 = vmatprep.subr.bf16.mxu0 %v6070_v32 }
 0x368   :  { %v4109_v21 = vadd.f32 %v5956_v8, %v8099_v41  ;;  %v3832_v0 = vpop.f32.mrb[43].mxu1  ;;  %6073 = vmatpush3.bf16.msra.mxu0 %v8120_v33 }
 0x369   :  { %v6074_v44 = vpack.c.bf16 %v4171_v46, %v4170_v18  ;;  %v4108_v51 = vadd.f32 %v8099_v41, %v3832_v0 }
 0x36a   :  { %v4173_v39 = vmax.f32 %v4109_v21, 0.0 }
 0x36b   :  { %v4172_v43 = vmax.f32 %v4108_v51, 0.0  ;;  %v5959_v14 = vpop.f32.mrb[44].mxu1  ;;  %6075 = vmatprep.subr.bf16.mxu0 %v6074_v44 }
 0x36c   :  { %v4111_v58 = vadd.f32 %v5959_v14, %v8099_v41  ;;  %v3842_v56 = vpop.f32.mrb[45].mxu1  ;;  %6077 = vmatpush3.bf16.msra.mxu0 %v8124_v23 }
 0x36d   :  { %v6078_v31 = vpack.c.bf16 %v4173_v39, %v4172_v43  ;;  %v4110_v30 = vadd.f32 %v8099_v41, %v3842_v56 }
 0x36e   :  { %v4175_v10 = vmax.f32 %v4111_v58, 0.0 }
 0x36f   :  { %v4174_v26 = vmax.f32 %v4110_v30, 0.0  ;;  %v5962_v62 = vpop.f32.mrb[46].mxu1  ;;  %6079 = vmatprep.subr.bf16.mxu0 %v6078_v31 }
 0x370   :  { %v4113_v33 = vadd.f32 %v5962_v62, %v8099_v41  ;;  %v3852_v45 = vpop.f32.mrb[47].mxu1  ;;  %6081 = vmatpush3.bf16.msra.mxu0 %v8128_v37 }
 0x371   :  { %v6082_v35 = vpack.c.bf16 %v4175_v10, %v4174_v26  ;;  %v4112_v15 = vadd.f32 %v8099_v41, %v3852_v45 }
 0x372   :  { %v4177_v38 = vmax.f32 %v4113_v33, 0.0 }
 0x373   :  { %v4176_v42 = vmax.f32 %v4112_v15, 0.0  ;;  %v5965_v11 = vpop.f32.mrb[48].mxu1  ;;  %6083 = vmatprep.subr.bf16.mxu0 %v6082_v35 }
 0x374   :  { %v4115_v23 = vadd.f32 %v5965_v11, %v8099_v41  ;;  %v3862_v59 = vpop.f32.mrb[49].mxu1  ;;  %6085 = vmatpush3.bf16.msra.mxu0 %v8132_v28  ;;  %v4212_v28 = vld [vmem:[%s8304_s1 + $0x20] sm:$0xff] }
 0x375   :  { %v8163_v1 = vpack.c.bf16 %v4177_v38, %v4176_v42  ;;  %v4114_v37 = vadd.f32 %v8099_v41, %v3862_v59 }
 0x376   :  { %v4179_v40 = vmax.f32 %v4115_v23, 0.0 }
 0x377   :  { %v4178_v48 = vmax.f32 %v4114_v37, 0.0  ;;  %v5968_v9 = vpop.f32.mrb[50].mxu1  ;;  %4289 = vmatmul.mubr.f32.vlgmr.msra.gmra.mrb[178].mxu0 %v4208_v47 }
 0x378   :  { %v4117_v5 = vadd.f32 %v5968_v9, %v8099_v41  ;;  %v3872_v29 = vpop.f32.mrb[51].mxu1  ;;  %4293 = vmatprep.mubr.f32.mxu0 %v4213_v53 }
 0x379   :  { %v8173_v13 = vpack.c.bf16 %v4179_v40, %v4178_v48  ;;  %v4116_v22 = vadd.f32 %v8099_v41, %v3872_v29 }
 0x37a   :  { %v4181_v20 = vmax.f32 %v4117_v5, 0.0 }
 0x37b   :  { %v4180_v55 = vmax.f32 %v4116_v22, 0.0  ;;  %v5971_v16 = vpop.f32.mrb[52].mxu1  ;;  %4294 = vmatmul.mubr.f32.gmra.mrb[180].mxu0 %v4212_v28 }
 0x37c   :  { %v4119_v24 = vadd.f32 %v5971_v16, %v8099_v41  ;;  %v3882_v57 = vpop.f32.mrb[53].mxu1  ;;  %4298 = vmatprep.mubr.f32.mxu0 %v4217_v50 }
 0x37d   :  { %v8183_v60 = vpack.c.bf16 %v4181_v20, %v4180_v55  ;;  %v4118_v49 = vadd.f32 %v8099_v41, %v3882_v57 }
 0x37e   :  { %v4183_v25 = vmax.f32 %v4119_v24, 0.0 }
 0x37f   :  { %v4182_v63 = vmax.f32 %v4118_v49, 0.0  ;;  %v5974_v36 = vpop.f32.mrb[54].mxu1  ;;  %4299 = vmatmul.mubr.f32.gmra.mrb[182].mxu0 %v4216_v7 }
 0x380   :  { %v4121_v3 = vadd.f32 %v5974_v36, %v8099_v41  ;;  %v3892_v61 = vpop.f32.mrb[55].mxu1  ;;  %4303 = vmatprep.mubr.f32.mxu0 %v4221_v6 }
 0x381   :  { %v8193_v54 = vpack.c.bf16 %v4183_v25, %v4182_v63  ;;  %v4120_v34 = vadd.f32 %v8099_v41, %v3892_v61 }
 0x382   :  { %v4185_v12 = vmax.f32 %v4121_v3, 0.0 }
 0x383   :  { %v4184_v27 = vmax.f32 %v4120_v34, 0.0  ;;  %v5977_v52 = vpop.f32.mrb[56].mxu1  ;;  %4304 = vmatmul.mubr.f32.gmra.mrb[184].mxu0 %v4220_v17 }
 0x384   :  { %v4123_v19 = vadd.f32 %v5977_v52, %v8099_v41  ;;  %v3902_v32 = vpop.f32.mrb[57].mxu1  ;;  %4373 = vmatprep.mubr.f32.mxu0 %v4211_v4 }
 0x385   :  { %v8200_v2 = vpack.c.bf16 %v4185_v12, %v4184_v27  ;;  %v4122_v46 = vadd.f32 %v8099_v41, %v3902_v32 }
 0x386   :  { %v4187_v18 = vmax.f32 %v4123_v19, 0.0 }
 0x387   :  { %v4186_v8 = vmax.f32 %v4122_v46, 0.0  ;;  %v5980_v21 = vpop.f32.mrb[58].mxu1 }
 0x388   :  { %v4125_v0 = vadd.f32 %v5980_v21, %v8099_v41  ;;  %v3912_v44 = vpop.f32.mrb[59].mxu1 }
 0x389   :  { %v8204_v51 = vpack.c.bf16 %v4187_v18, %v4186_v8  ;;  %v4124_v39 = vadd.f32 %v8099_v41, %v3912_v44 }
 0x38a   :  { %v4189_v43 = vmax.f32 %v4125_v0, 0.0 }
 0x38b   :  { %v4188_v14 = vmax.f32 %v4124_v39, 0.0  ;;  %v5983_v58 = vpop.f32.mrb[60].mxu1 }
 0x38c   :  { %v4127_v56 = vadd.f32 %v5983_v58, %v8099_v41  ;;  %v3922_v31 = vpop.f32.mrb[61].mxu1 }
 0x38d   :  { %v8208_v30 = vpack.c.bf16 %v4189_v43, %v4188_v14  ;;  %v4126_v10 = vadd.f32 %v8099_v41, %v3922_v31  ;;  %v4210_v31 = vld [vmem:[%s8304_s1 + $0x10] sm:$0xff] }
 0x38e   :  { %v4191_v26 = vmax.f32 %v4127_v56, 0.0 }
 0x38f   :  { %v4190_v62 = vmax.f32 %v4126_v10, 0.0  ;;  %v5986_v33 = vpop.f32.mrb[62].mxu1  ;;  %v4218_v10 = vld [vmem:[%s8304_s1 + $0x50] sm:$0xff] }
 0x390   :  { %v4129_v45 = vadd.f32 %v5986_v33, %v8099_v41  ;;  %v3932_v35 = vpop.f32.mrb[63].mxu1  ;;  %v4394_v33 = vld [vmem:[%s8305_s4] sm:$0xff] }
 0x391   :  { %v8212_v15 = vpack.c.bf16 %v4191_v26, %v4190_v62  ;;  %v4128_v38 = vadd.f32 %v8099_v41, %v3932_v35  ;;  %v4223_v26 = vld [vmem:[%s8304_s1 + $0x78] sm:$0xff]  ;;  %v4222_v62 = vld [vmem:[%s8304_s1 + $0x70] sm:$0xff] }
 0x392   :  { %v4193_v42 = vmax.f32 %v4129_v45, 0.0  ;;  %v4395_v45 = vld [vmem:[%s8305_s4 + $0x8] sm:$0xff] }
 0x393   :  { %v4192_v11 = vmax.f32 %v4128_v38, 0.0  ;;  %v5989_v23 = vpop.f32.mrb[64].mxu1  ;;  %v6118_v35 = vpack.c.bf16 %v4395_v45, %v4394_v33  ;;  %v4397_v38 = vld [vmem:[%s8305_s4 + $0x18] sm:$0xff] }
 0x394   :  { %v4131_v59 = vadd.f32 %v5989_v23, %v8099_v41  ;;  %v3942_v47 = vpop.f32.mrb[65].mxu1  ;;  %v4399_v23 = vld [vmem:[%s8305_s4 + $0x28] sm:$0xff] }
 0x395   :  { %v6086_v37 = vpack.c.bf16 %v4193_v42, %v4192_v11  ;;  %v4130_v53 = vadd.f32 %v8099_v41, %v3942_v47  ;;  %v4398_v11 = vld [vmem:[%s8305_s4 + $0x20] sm:$0xff]  ;;  %v4400_v47 = vld [vmem:[%s8305_s4 + $0x30] sm:$0xff] }
 0x396   :  { %v4195_v40 = vmax.f32 %v4131_v59, 0.0  ;;  %v6126_v59 = vpack.c.bf16 %v4399_v23, %v4398_v11 }
 0x397   :  { %v4194_v48 = vmax.f32 %v4130_v53, 0.0  ;;  %v5992_v9 = vpop.f32.mrb[66].mxu1  ;;  %6087 = vmatprep.subr.bf16.mxu0 %v6086_v37  ;;  %v4401_v37 = vld [vmem:[%s8305_s4 + $0x38] sm:$0xff] }
 0x398   :  { %v4133_v5 = vadd.f32 %v5992_v9, %v8099_v41  ;;  %v3952_v29 = vpop.f32.mrb[67].mxu1  ;;  %6089 = vmatpush3.bf16.msra.mxu0 %v8163_v1  ;;  %v6130_v53 = vpack.c.bf16 %v4401_v37, %v4400_v47 }
 0x399   :  { %v6090_v28 = vpack.c.bf16 %v4195_v40, %v4194_v48  ;;  %v4132_v22 = vadd.f32 %v8099_v41, %v3952_v29 }
 0x39a   :  { %v4197_v50 = vmax.f32 %v4133_v5, 0.0 }
 0x39b   :  { %v4196_v20 = vmax.f32 %v4132_v22, 0.0  ;;  %v5995_v55 = vpop.f32.mrb[68].mxu1  ;;  %6091 = vmatprep.subr.bf16.mxu0 %v6090_v28 }
 0x39c   :  { %v4135_v16 = vadd.f32 %v5995_v55, %v8099_v41  ;;  %v3962_v24 = vpop.f32.mrb[69].mxu1  ;;  %6093 = vmatpush3.bf16.msra.mxu0 %v8173_v13 }
 0x39d   :  { %v6094_v57 = vpack.c.bf16 %v4197_v50, %v4196_v20  ;;  %v4134_v7 = vadd.f32 %v8099_v41, %v3962_v24 }
 0x39e   :  { %v4199_v49 = vmax.f32 %v4135_v16, 0.0 }
 0x39f   :  { %v4198_v6 = vmax.f32 %v4134_v7, 0.0  ;;  %v5998_v25 = vpop.f32.mrb[70].mxu1  ;;  %6095 = vmatprep.subr.bf16.mxu0 %v6094_v57 }
 0x3a0   :  { %v4137_v1 = vadd.f32 %v5998_v25, %v8099_v41  ;;  %v3972_v63 = vpop.f32.mrb[71].mxu1  ;;  %6097 = vmatpush3.bf16.msra.mxu0 %v8183_v60 }
 0x3a1   :  { %v6098_v36 = vpack.c.bf16 %v4199_v49, %v4198_v6  ;;  %v4136_v3 = vadd.f32 %v8099_v41, %v3972_v63 }
 0x3a2   :  { %v4201_v61 = vmax.f32 %v4137_v1, 0.0 }
 0x3a3   :  { %v4200_v17 = vmax.f32 %v4136_v3, 0.0  ;;  %v6001_v34 = vpop.f32.mrb[72].mxu1  ;;  %6099 = vmatprep.subr.bf16.mxu0 %v6098_v36 }
 0x3a4   :  { %v4139_v13 = vadd.f32 %v6001_v34, %v8099_v41  ;;  %v3982_v4 = vpop.f32.mrb[73].mxu1  ;;  %6101 = vmatpush3.bf16.msra.mxu0 %v8193_v54 }
 0x3a5   :  { %v6102_v12 = vpack.c.bf16 %v4201_v61, %v4200_v17  ;;  %v4138_v27 = vadd.f32 %v8099_v41, %v3982_v4 }
 0x3a6   :  { %v4203_v52 = vmax.f32 %v4139_v13, 0.0 }
 0x3a7   :  { %v4202_v19 = vmax.f32 %v4138_v27, 0.0  ;;  %v6004_v32 = vpop.f32.mrb[74].mxu1  ;;  %6103 = vmatprep.subr.bf16.mxu0 %v6102_v12 }
 0x3a8   :  { %v4141_v60 = vadd.f32 %v6004_v32, %v8099_v41  ;;  %v3992_v46 = vpop.f32.mrb[75].mxu1  ;;  %6105 = vmatpush3.bf16.msra.mxu0 %v8200_v2 }
 0x3a9   :  { %v6106_v18 = vpack.c.bf16 %v4203_v52, %v4202_v19  ;;  %v4140_v8 = vadd.f32 %v8099_v41, %v3992_v46  ;;  %v4898_v52 = vld [vmem:[%s8305_s4 + $0x40] ss:$0 sm:$0xff] }
 0x3aa   :  { %v4205_v21 = vmax.f32 %v4141_v60, 0.0 }
 0x3ab   :  { %v4204_v0 = vmax.f32 %v4140_v8, 0.0  ;;  %v6007_v44 = vpop.f32.mrb[76].mxu1  ;;  %6107 = vmatprep.subr.bf16.mxu0 %v6106_v18 }
 0x3ac   :  { %v4143_v54 = vadd.f32 %v6007_v44, %v8099_v41  ;;  %v4002_v39 = vpop.f32.mrb[77].mxu1  ;;  %6109 = vmatpush3.bf16.msra.mxu0 %v8204_v51  ;;  %v4215_v51 = vld [vmem:[%s8304_s1 + $0x38] sm:$0xff] }
 0x3ad   :  { %v6110_v43 = vpack.c.bf16 %v4205_v21, %v4204_v0  ;;  %v4142_v14 = vadd.f32 %v8099_v41, %v4002_v39  ;;  %v4214_v41 = vld [vmem:[%s8304_s1 + $0x30] sm:$0xff] }
 0x3ae   :  { %v4207_v58 = vmax.f32 %v4143_v54, 0.0 }
 0x3af   :  { %v4206_v56 = vmax.f32 %v4142_v14, 0.0  ;;  %6111 = vmatprep.subr.bf16.mxu0 %v6110_v43 }
 0x3b0   :  { %6113 = vmatpush3.bf16.msra.mxu0 %v8208_v30  ;;  %v4219_v30 = vld [vmem:[%s8304_s1 + $0x58] sm:$0xff] }
 0x3b1   :  { %v6114_v2 = vpack.c.bf16 %v4207_v58, %v4206_v56 }
 0x3b3   :  { %6115 = vmatprep.subr.bf16.mxu0 %v6114_v2 }
 0x3b4   :  { %6117 = vmatpush3.bf16.msra.mxu0 %v8212_v15  ;;  %v4396_v15 = vld [vmem:[%s8305_s4 + $0x10] sm:$0xff] }
 0x3b5   :  { %6119 = vmatprep.subr.bf16.mxu0 %v6118_v35  ;;  %v6122_v42 = vpack.c.bf16 %v4397_v38, %v4396_v15 }
 0x3b7   :  { %4374 = vmatmul.mubr.f32.vlgmr.msra.gmra.mrb[186].mxu0 %v4210_v31 }
 0x3b8   :  { %4378 = vmatprep.mubr.f32.mxu0 %v4215_v51  ;;  %6121 = vmatpush3.bf16.msra.mxu0 %v6118_v35 }
 0x3b9   :  { %6123 = vmatprep.subr.bf16.mxu0 %v6122_v42 }
 0x3bb   :  { %4379 = vmatmul.mubr.f32.gmra.mrb[188].mxu0 %v4214_v41 }
 0x3bc   :  { %4383 = vmatprep.mubr.f32.mxu0 %v4219_v30  ;;  %6125 = vmatpush3.bf16.msra.mxu0 %v6122_v42 }
 0x3bd   :  { %6127 = vmatprep.subr.bf16.mxu0 %v6126_v59 }
 0x3bf   :  { %4384 = vmatmul.mubr.f32.gmra.mrb[190].mxu0 %v4218_v10 }
 0x3c0   :  { %4388 = vmatprep.mubr.f32.mxu0 %v4223_v26  ;;  %6129 = vmatpush3.bf16.msra.mxu0 %v6126_v59 }
 0x3c1   :  { %6131 = vmatprep.subr.bf16.mxu0 %v6130_v53 }
 0x3c3   :  { %4389 = vmatmul.mubr.f32.gmra.mrb[192].mxu0 %v4222_v62 }
 0x3c4   :  { %6133 = vmatpush3.bf16.msra.mxu0 %v6130_v53 }
 0x44a   :  { %v5334_v40 = vpop.f32.mrb[178].mxu0 }
 0x44b   :  { %v5335_v48 = vpop.f32.mrb[179].mxu0 }
 0x44c   :  { %v5336_v9 = vadd.f32 %v5335_v48, %v5334_v40 }
 0x44e   :  { %v5337_v5 = vpop.f32.mrb[180].mxu0 }
 0x44f   :  { %v5338_v29 = vpop.f32.mrb[181].mxu0 }
 0x450   :  { %v5339_v28 = vadd.f32 %v5338_v29, %v5337_v5 }
 0x452   :  { %v5340_v22 = vpop.f32.mrb[182].mxu0 }
 0x453   :  { %v5341_v50 = vpop.f32.mrb[183].mxu0 }
 0x454   :  { %v5342_v20 = vadd.f32 %v5341_v50, %v5340_v22 }
 0x456   :  { %v5343_v55 = vpop.f32.mrb[184].mxu0 }
 0x457   :  { %v5344_v16 = vpop.f32.mrb[185].mxu0 }
 0x458   :  { %v5345_v24 = vadd.f32 %v5344_v16, %v5343_v55 }
 0x48a   :  { %v5378_v57 = vpop.f32.mrb[186].mxu0 }
 0x48b   :  { %v5379_v7 = vpop.f32.mrb[187].mxu0 }
 0x48c   :  { %v5380_v49 = vadd.f32 %v5379_v7, %v5378_v57 }
 0x48e   :  { %v4376_v6 = vadd.f32 %v5380_v49, %v5336_v9  ;;  %v5381_v25 = vpop.f32.mrb[188].mxu0 }
 0x48f   :  { %v5382_v1 = vpop.f32.mrb[189].mxu0 }
 0x490   :  { %6024 = vmatprep.mubr.msk.f32.mxu0 %vm4407_vm2, %v4376_v6  ;;  %v5383_v63 = vadd.f32 %v5382_v1, %v5381_v25 }
 0x492   :  { %v4381_v36 = vadd.f32 %v5383_v63, %v5339_v28  ;;  %v5384_v3 = vpop.f32.mrb[190].mxu0 }
 0x493   :  { %v5385_v61 = vpop.f32.mrb[191].mxu0 }
 0x494   :  { %v5386_v17 = vadd.f32 %v5385_v61, %v5384_v3  ;;  %6025 = vmatmul.mubr.msk.f32.vlgmr.msra.gmra.mrb[194].mxu0 %vm4407_vm2, %v4381_v36 }
 0x496   :  { %v4386_v34 = vadd.f32 %v5386_v17, %v5342_v20  ;;  %v5387_v13 = vpop.f32.mrb[192].mxu0 }
 0x497   :  { %v5388_v4 = vpop.f32.mrb[193].mxu0 }
 0x498   :  { %v5389_v12 = vadd.f32 %v5388_v4, %v5387_v13  ;;  %6027 = vmatprep.mubr.msk.f32.mxu0 %vm4407_vm2, %v4386_v34 }
 0x49a   :  { %v4391_v27 = vadd.f32 %v5389_v12, %v5345_v24 }
 0x49c   :  { %6028 = vmatmul.mubr.msk.f32.gmra.mrb[196].mxu0 %vm4407_vm2, %v4391_v27 }
 0x567   :  { %v6026_v19 = vpop.f32.mrb[194].mxu0 }
 0x568   :  { %v4492_v32 = vadd.f32 %v6026_v19, %v4898_v52  ;;  %v4486_v60 = vpop.f32.mrb[195].mxu0 }
 0x569   :  { %v4487_v46 = vadd.f32 %v4898_v52, %v4486_v60 }
 0x56a   :  { %4506 = vst [vmem:[%s8306_s5 + $0x8] sm:$0xff] %v4492_v32 }
 0x56b   :  { %4505 = vst [vmem:[%s8306_s5] sm:$0xff] %v4487_v46 }
 0x56f   :  { %v6029_v18 = vpop.f32.mrb[196].mxu0 }
 0x570   :  { %v4502_v8 = vadd.f32 %v6029_v18, %v4898_v52  ;;  %v4496_v21 = vpop.f32.mrb[197].mxu0 }
 0x571   :  { %v4497_v0 = vadd.f32 %v4898_v52, %v4496_v21 }
 0x572   :  { %4508 = vst [vmem:[%s8306_s5 + $0x18] sm:$0xff] %v4502_v8 }
 0x573   :  { %4507 = vst [vmem:[%s8306_s5 + $0x10] sm:$0xff] %v4497_v0 }

</bundles_post_ra>
